<compile_context>
chip_gen: v5e
topology: v5e:2x2
jax: 0.10.0
libtpu: 0.0.40
codegen_flags: <defaults>
</compile_context>

<pallas_src>
import functools

import jax
import jax.numpy as jnp
from jax.experimental import pallas as pl
from jax.experimental.pallas import tpu as pltpu


NEG_INF = -1e30   # pad value for attention / vocab bias columns (softmax -> 0)


# -----------------------------------------------------------------------------
# Kernel: grid = (decode step t, vocab tile v).  Step math runs once per step
# (v == 0); every (t, v) streams one vocab tile of the output projection.
# -----------------------------------------------------------------------------
def _attn_decoder_kernel(
    H,              # static python int: hidden size
    tok_ref,        # SMEM (T,) int32  teacher-forcing tokens (scalar prefetch)
    emb_ref,        # (1, H)   f32   embedding row of tokens[t] (gathered by index_map)
    hid0_ref,       # (1, H)   f32   initial hidden state
    enc_ref,        # (Lp, H)  bf16  encoder outputs, rows L..Lp zero-padded
    attn_w_ref,     # (2H, Lp) bf16  stacked attn weight [W_emb ; W_hid]
    attn_b_ref,     # (1, Lp)  f32   attn bias, padded cols = NEG_INF
    comb_w_ref,     # (2H, H)  bf16  stacked attn_combine weight [W_emb ; W_applied]
    comb_b_ref,     # (1, H)   f32
    wih_ref,        # (H, 3H)  bf16  GRU input weights, gate order [r | z | n]
    whh_ref,        # (H, 3H)  bf16  GRU hidden weights
    bih_ref,        # (1, 3H)  f32
    bhh_ref,        # (1, 3H)  f32
    out_w_ref,      # (H, TN)  bf16  current vocab tile of the output projection
    out_b_ref,      # (1, TN)  f32   padded cols = NEG_INF
    logits_ref,     # OUT (1, TN) f32  raw logits for this (step, vocab tile)
    newh_ref,       # OUT (1, H)  f32  hidden after this step
    aw_ref,         # OUT (1, Lp) f32  attention weights for this step
    lse_ref,        # OUT (1, 1)  f32  logsumexp over the full vocab for this step
    h_carry,        # VMEM (1, H) f32  hidden state carried across steps
    m_scr,          # VMEM (1, 1) f32  running max over vocab tiles
    s_scr,          # VMEM (1, 1) f32  running sum(exp) over vocab tiles
):
    del tok_ref  # consumed only by the embedding BlockSpec index_map
    t = pl.program_id(0)
    v = pl.program_id(1)
    nv = pl.num_programs(1)
    f32, bf16 = jnp.float32, jnp.bfloat16

    @pl.when((t == 0) & (v == 0))
    def _():
        h_carry[...] = hid0_ref[...]

    # ------------- per-step work (attention + combine + GRU), once per step ----
    @pl.when(v == 0)
    def _():
        emb_bf = emb_ref[...].astype(bf16)                       # (1, H)
        h_prev = h_carry[...]                                    # (1, H) f32
        h_bf = h_prev.astype(bf16)
        # TODO(synk): nn.Dropout(p=0.1) is identity in eval mode; training-mode
        # dropout (pltpu.prng_* mask on emb_bf) intentionally not applied.

        # attn_weights = softmax(attn(cat(embedded, hidden)))
        # two dots against static halves of the stacked weight (no lane concat)
        a_logits = (
            jnp.dot(emb_bf, attn_w_ref[:H, :], preferred_element_type=f32)
            + jnp.dot(h_bf, attn_w_ref[H:, :], preferred_element_type=f32)
            + attn_b_ref[...])                                   # (1, Lp)
        m = jnp.max(a_logits, axis=-1, keepdims=True)
        e = jnp.exp(a_logits - m)
        attn_w = e / jnp.sum(e, axis=-1, keepdims=True)          # exact probabilities
        aw_ref[...] = attn_w

        # attn_applied = attn_weights @ encoder_outputs (zero-padded rows give 0)
        attn_applied = jnp.dot(attn_w.astype(bf16), enc_ref[...],
                               preferred_element_type=f32)       # (1, H)

        # output = relu(attn_combine(cat(embedded, attn_applied)))
        comb = (
            jnp.dot(emb_bf, comb_w_ref[:H, :], preferred_element_type=f32)
            + jnp.dot(attn_applied.astype(bf16), comb_w_ref[H:, :],
                      preferred_element_type=f32)
            + comb_b_ref[...])                                   # (1, H)
        x = jnp.maximum(comb, 0.0).astype(bf16)

        # n_layers = 1 GRU step.  gi/gh cannot be fused into one cat(x,h) matmul:
        # the 'n' gate is tanh(i_n + r * (h @ Whn + bhn)); hidden path stays separate.
        gi = jnp.dot(x, wih_ref[...], preferred_element_type=f32) + bih_ref[...]
        gh = jnp.dot(h_bf, whh_ref[...], preferred_element_type=f32) + bhh_ref[...]
        r = jax.nn.sigmoid(gi[:, 0:H] + gh[:, 0:H])
        z = jax.nn.sigmoid(gi[:, H:2 * H] + gh[:, H:2 * H])
        n = jnp.tanh(gi[:, 2 * H:3 * H] + r * gh[:, 2 * H:3 * H])
        h_new = (1.0 - z) * n + z * h_prev                       # (1, H) f32

        h_carry[...] = h_new
        newh_ref[...] = h_new

        # reset online-logsumexp state for this step's vocab sweep
        m_scr[...] = jnp.full((1, 1), -jnp.inf, f32)
        s_scr[...] = jnp.zeros((1, 1), f32)

    # ------------- vocab-tile projection, every (t, v) --------------------------
    h_new_bf = h_carry[...].astype(bf16)                         # (1, H)
    lg = (jnp.dot(h_new_bf, out_w_ref[...], preferred_element_type=f32)
          + out_b_ref[...])                                      # (1, TN)
    logits_ref[...] = lg                                         # raw logits, lane-dense

    m_prev = m_scr[...]
    m_new = jnp.maximum(m_prev, jnp.max(lg, axis=-1, keepdims=True))
    s_scr[...] = (s_scr[...] * jnp.exp(m_prev - m_new)
                  + jnp.sum(jnp.exp(lg - m_new), axis=-1, keepdims=True))
    m_scr[...] = m_new

    @pl.when(v == nv - 1)
    def _():
        # log_softmax is finished outside the kernel as `logits - lse`.
        lse_ref[...] = m_scr[...] + jnp.log(s_scr[...])


# -----------------------------------------------------------------------------
# Wrapper: runs T teacher-forced decoder steps in ONE pallas_call.
# -----------------------------------------------------------------------------
def attn_decoder_forward(params, tokens, hidden, encoder_outputs, *, tn=128,
                         single_buffer_weights=True):
    """tokens: (T,) int32, hidden: (1,1,H), encoder_outputs: (L,H).

    Returns (log_probs (T,V), hiddens (T,H), attn_weights (T,L)).  The module's
    per-step (output, hidden, attn_weights) is (log_probs[t:t+1],
    hiddens[t].reshape(1,1,H), attn_weights[t:t+1]).
    """
    H = hidden.shape[-1]
    L = encoder_outputs.shape[0]
    Lp = params["attn_w"].shape[1]
    V = params["emb"].shape[0]
    Vp = params["out_w"].shape[1]
    T = int(tokens.shape[0])
    assert Vp % tn == 0 and tn % 128 == 0
    nv = Vp // tn

    tok = jnp.asarray(tokens, jnp.int32).reshape(T)
    hid0 = hidden.reshape(1, H).astype(jnp.float32)
    # Loop-invariant across the whole decode: pad/cast once per sequence.
    enc_p = jnp.pad(encoder_outputs.astype(jnp.float32),
                    ((0, Lp - L), (0, 0))).astype(jnp.bfloat16)

    in_arrays = [
        params["emb"], hid0, enc_p,
        params["attn_w"], params["attn_b"],
        params["comb_w"], params["comb_b"],
        params["wih"], params["whh"], params["bih"], params["bhh"],
        params["out_w"], params["out_b"],
    ]

    out_shape = (
        jax.ShapeDtypeStruct((T, 1, Vp), jnp.float32),   # raw logits
        jax.ShapeDtypeStruct((T, 1, H), jnp.float32),    # per-step hidden
        jax.ShapeDtypeStruct((T, 1, Lp), jnp.float32),   # per-step attn weights
        jax.ShapeDtypeStruct((T, 1, 1), jnp.float32),    # per-step logsumexp
    )

    def build_specs(use_single_buffer):
        def const_spec(shape):
            # Weights / enc / initial hidden: same block every grid step ->
            # DMA'd once, VMEM-resident for the whole decode.
            idx = lambda t, v, tok_ref, _n=len(shape): (0,) * _n
            if use_single_buffer:
                try:
                    # nothing to double-buffer for a constant block
                    return pl.BlockSpec(shape, idx, pipeline_mode=pl.Buffered(1))
                except (TypeError, AttributeError):
                    pass
            return pl.BlockSpec(shape, idx)

        # Embedding row gather via the scalar-prefetch token array (P2 pattern):
        # only the (1, H) row of the current token is DMA'd, once per step.
        emb_spec = pl.BlockSpec((None, 1, H),
                                lambda t, v, tok_ref: (tok_ref[t], 0, 0))
        in_specs = [
            emb_spec,
            const_spec((1, H)),            # hid0
            const_spec((Lp, H)),           # encoder outputs
            const_spec((2 * H, Lp)), const_spec((1, Lp)),     # attn
            const_spec((2 * H, H)), const_spec((1, H)),       # attn_combine
            const_spec((H, 3 * H)), const_spec((H, 3 * H)),   # GRU weights
            const_spec((1, 3 * H)), const_spec((1, 3 * H)),   # GRU biases
            # vocab projection streamed tile-by-tile (default double-buffered)
            pl.BlockSpec((H, tn), lambda t, v, tok_ref: (0, v)),
            pl.BlockSpec((1, tn), lambda t, v, tok_ref: (0, v)),
        ]
        out_specs = (
            pl.BlockSpec((None, 1, tn), lambda t, v, tok_ref: (t, 0, v)),
            pl.BlockSpec((None, 1, H), lambda t, v, tok_ref: (t, 0, 0)),
            pl.BlockSpec((None, 1, Lp), lambda t, v, tok_ref: (t, 0, 0)),
            pl.BlockSpec((None, 1, 1), lambda t, v, tok_ref: (t, 0, 0)),
        )
        return in_specs, out_specs

    def run(use_single_buffer):
        in_specs, out_specs = build_specs(use_single_buffer)
        kernel = functools.partial(_attn_decoder_kernel, H)
        return pl.pallas_call(
            kernel,
            out_shape=out_shape,
            grid_spec=pltpu.PrefetchScalarGridSpec(
                num_scalar_prefetch=1,
                grid=(T, nv),
                in_specs=in_specs,
                out_specs=out_specs,
                scratch_shapes=[
                    pltpu.VMEM((1, H), jnp.float32),   # carried hidden state
                    pltpu.VMEM((1, 1), jnp.float32),   # running max
                    pltpu.VMEM((1, 1), jnp.float32),   # running sum(exp)
                ],
            ),
            # TODO(synk): if a batch axis is added (B decode sequences), mark it
            # "parallel" so the two v7x TensorCores split it; the step and vocab
            # axes must stay "arbitrary" (carried hidden / vocab stream).
            compiler_params=pltpu.CompilerParams(
                dimension_semantics=("arbitrary", "arbitrary"),
                vmem_limit_bytes=32 * 1024 * 1024),
        )(tok, *in_arrays)

    if single_buffer_weights:
        try:
            logits, hs, aw, lse = run(True)
        except Exception:
            # TODO(synk): jax builds without BlockSpec(pipeline_mode=...) support;
            # fall back to default double-buffered (still constant-index) specs.
            logits, hs, aw, lse = run(False)
    else:
        logits, hs, aw, lse = run(False)

    log_probs = (logits - lse)[:, 0, :V]        # finish log_softmax: one subtract
    return log_probs, hs[:, 0, :], aw[:, 0, :L]


# -----------------------------------------------------------------------------
# Deterministic parameter init (mirrors the PyTorch module's shapes), pre-laid
# out for the kernel: transposed, stacked, lane-padded, bf16 weights.
# -----------------------------------------------------------------------------
def init_params(key, hidden_size, output_size, max_length, *, lane=128):
    H, V, L = hidden_size, output_size, max_length
    Lp = ((L + lane - 1) // lane) * lane
    Vp = ((V + lane - 1) // lane) * lane
    ks = jax.random.split(key, 11)
    bf16 = jnp.bfloat16

    def unif(k, shape, fan_in):
        bound = 1.0 / jnp.sqrt(fan_in)
        return jax.random.uniform(k, shape, jnp.float32, -bound, bound)

    # nn.Embedding(V, H): N(0,1).  Stored (V, 1, H) so a token-indexed BlockSpec
    # DMAs exactly one row (no per-call reshape, no full-table copy).
    emb = jax.random.normal(ks[0], (V, 1, H), jnp.float32)

    # nn.Linear(2H, L): weight (L,2H) -> transposed (2H,L), zero-padded to Lp lanes.
    attn_w_t = unif(ks[1], (L, 2 * H), 2 * H).T                           # (2H, L)
    attn_w = jnp.pad(attn_w_t, ((0, 0), (0, Lp - L))).astype(bf16)        # (2H, Lp)
    attn_b = jnp.pad(unif(ks[2], (1, L), 2 * H), ((0, 0), (0, Lp - L)),
                     constant_values=NEG_INF)                             # (1, Lp) f32

    # nn.Linear(2H, H): weight (H,2H) -> transposed (2H,H)
    comb_w = unif(ks[3], (H, 2 * H), 2 * H).T.astype(bf16)                # (2H, H)
    comb_b = unif(ks[4], (1, H), 2 * H)

    # nn.GRU(H, H): weight_ih_l0 (3H,H), weight_hh_l0 (3H,H), gate order [r|z|n]
    wih = unif(ks[5], (3 * H, H), H).T.astype(bf16)                       # (H, 3H)
    whh = unif(ks[6], (3 * H, H), H).T.astype(bf16)
    bih = unif(ks[7], (1, 3 * H), H)
    bhh = unif(ks[8], (1, 3 * H), H)

    # nn.Linear(H, V): weight (V,H) -> transposed (H,V), padded to Vp lanes.
    out_w_t = unif(ks[9], (V, H), H).T                                    # (H, V)
    out_w = jnp.pad(out_w_t, ((0, 0), (0, Vp - V))).astype(bf16)          # (H, Vp)
    out_b = jnp.pad(unif(ks[10], (1, V), H), ((0, 0), (0, Vp - V)),
                    constant_values=NEG_INF)                              # (1, Vp) f32

    return dict(emb=emb, attn_w=attn_w, attn_b=attn_b,
                comb_w=comb_w, comb_b=comb_b,
                wih=wih, whh=whh, bih=bih, bhh=bhh,
                out_w=out_w, out_b=out_b)


# Pure-JAX reference with the SAME precision policy (bf16 weights / matmul
# operands, f32 accumulation and elementwise) for correctness checking.
def reference_forward(params, tokens, hidden, encoder_outputs):
    H = hidden.shape[-1]
    L = encoder_outputs.shape[0]
    Lp = params["attn_w"].shape[1]
    V = params["emb"].shape[0]
    f32, bf16 = jnp.float32, jnp.bfloat16

    enc_p = jnp.pad(encoder_outputs.astype(f32), ((0, Lp - L), (0, 0))).astype(bf16)
    h = hidden.reshape(1, H).astype(f32)
    logps, hs, aws = [], [], []
    for t in range(int(tokens.shape[0])):
        emb_bf = params["emb"][tokens[t]].reshape(1, H).astype(bf16)
        h_bf = h.astype(bf16)
        a_logits = (jnp.dot(emb_bf, params["attn_w"][:H], preferred_element_type=f32)
                    + jnp.dot(h_bf, params["attn_w"][H:], preferred_element_type=f32)
                    + params["attn_b"])
        attn_w = jax.nn.softmax(a_logits, axis=-1)
        attn_applied = jnp.dot(attn_w.astype(bf16), enc_p, preferred_element_type=f32)
        comb = (jnp.dot(emb_bf, params["comb_w"][:H], preferred_element_type=f32)
                + jnp.dot(attn_applied.astype(bf16), params["comb_w"][H:],
                          preferred_element_type=f32)
                + params["comb_b"])
        x = jnp.maximum(comb, 0.0).astype(bf16)
        gi = jnp.dot(x, params["wih"], preferred_element_type=f32) + params["bih"]
        gh = jnp.dot(h_bf, params["whh"], preferred_element_type=f32) + params["bhh"]
        i_r, i_z, i_n = jnp.split(gi, 3, axis=1)
        h_r, h_z, h_n = jnp.split(gh, 3, axis=1)
        r = jax.nn.sigmoid(i_r + h_r)
        z = jax.nn.sigmoid(i_z + h_z)
        n = jnp.tanh(i_n + r * h_n)
        h = (1.0 - z) * n + z * h
        logits = (jnp.dot(h.astype(bf16), params["out_w"], preferred_element_type=f32)
                  + params["out_b"])
        logps.append(jax.nn.log_softmax(logits, axis=-1)[:, :V])
        hs.append(h)
        aws.append(attn_w[:, :L])
    return (jnp.concatenate(logps, 0), jnp.concatenate(hs, 0),
            jnp.concatenate(aws, 0))


if __name__ == "__main__":
    # Small, TPU-friendly shapes consistent with the module's forward.
    HIDDEN = 128       # hidden_size (original uses 2000; kept small for the demo)
    VOCAB = 256        # output_size
    MAX_LENGTH = 16    # max_length (padded to 128 lanes in the attention path)
    STEPS = 6          # teacher-forced decoder steps run inside ONE kernel launch

    key = jax.random.PRNGKey(0)
    k_par, k_hid, k_enc, k_tok = jax.random.split(key, 4)

    params = init_params(k_par, HIDDEN, VOCAB, MAX_LENGTH)
    tokens = jax.random.randint(k_tok, (STEPS,), 0, VOCAB, dtype=jnp.int32)
    hidden = jax.random.normal(k_hid, (1, 1, HIDDEN), jnp.float32)
    encoder_outputs = jax.random.normal(k_enc, (MAX_LENGTH, HIDDEN), jnp.float32)
    # `encoder_output` (singular) argument of the PyTorch forward is unused -> omitted.

    logp, hiddens, attn_w = attn_decoder_forward(params, tokens, hidden,
                                                 encoder_outputs, tn=128)
    jax.block_until_ready((logp, hiddens, attn_w))

    # sanity check against a pure-JAX per-step reference (same bf16 cast points;
    # tolerance covers bf16 matmuls and the tiled online-logsumexp accumulation)
    r_logp, r_h, r_aw = reference_forward(params, tokens, hidden, encoder_outputs)
    assert logp.shape == (STEPS, VOCAB)
    assert hiddens.shape == (STEPS, HIDDEN)
    assert attn_w.shape == (STEPS, MAX_LENGTH)
    assert jnp.allclose(logp, r_logp, rtol=2e-3, atol=2e-3)
    assert jnp.allclose(hiddens, r_h, rtol=2e-3, atol=2e-3)
    assert jnp.allclose(attn_w, r_aw, rtol=2e-3, atol=2e-3)

    # module's (output, hidden, attn_weights) for step t:
    #   (logp[t:t+1], hiddens[t].reshape(1, 1, HIDDEN), attn_w[t:t+1])
    print("KERNEL_OK")
</pallas_src>

<mosaic_0001>
module attributes {stable_mosaic.version = 11 : i64} {
  func.func @_attn_decoder_kernel(%arg0: i32, %arg1: i32, %arg2: memref<6xi32, #tpu.memory_space<smem>>, %arg3: memref<1x1x128xf32, #tpu.memory_space<vmem>>, %arg4: memref<1x128xf32, #tpu.memory_space<vmem>>, %arg5: memref<128x128xbf16, #tpu.memory_space<vmem>>, %arg6: memref<256x128xbf16, #tpu.memory_space<vmem>>, %arg7: memref<1x128xf32, #tpu.memory_space<vmem>>, %arg8: memref<256x128xbf16, #tpu.memory_space<vmem>>, %arg9: memref<1x128xf32, #tpu.memory_space<vmem>>, %arg10: memref<128x384xbf16, #tpu.memory_space<vmem>>, %arg11: memref<128x384xbf16, #tpu.memory_space<vmem>>, %arg12: memref<1x384xf32, #tpu.memory_space<vmem>>, %arg13: memref<1x384xf32, #tpu.memory_space<vmem>>, %arg14: memref<128x128xbf16, #tpu.memory_space<vmem>>, %arg15: memref<1x128xf32, #tpu.memory_space<vmem>>, %arg16: memref<1x1x128xf32, #tpu.memory_space<vmem>>, %arg17: memref<1x1x128xf32, #tpu.memory_space<vmem>>, %arg18: memref<1x1x128xf32, #tpu.memory_space<vmem>>, %arg19: memref<1x1x1xf32, #tpu.memory_space<vmem>>, %arg20: memref<1x128xf32, #tpu.memory_space<vmem>>, %arg21: memref<1x1xf32, #tpu.memory_space<vmem>>, %arg22: memref<1x1xf32, #tpu.memory_space<vmem>>) attributes {dimension_semantics = [#tpu.dimension_semantics<arbitrary>, #tpu.dimension_semantics<arbitrary>], iteration_bounds = array<i64: 6, 2>, scalar_prefetch = 1 : i64, scratch_operands = 3 : i64, tpu.core_type = #tpu.core_type<tc>, window_params = [{transform_indices = @transform_0, window_bounds = array<i64: 1, 1, 128>}, {pipeline_mode = #tpu.pipeline_mode<synchronous>, transform_indices = @transform_1, window_bounds = array<i64: 1, 128>}, {pipeline_mode = #tpu.pipeline_mode<synchronous>, transform_indices = @transform_2, window_bounds = array<i64: 128, 128>}, {pipeline_mode = #tpu.pipeline_mode<synchronous>, transform_indices = @transform_3, window_bounds = array<i64: 256, 128>}, {pipeline_mode = #tpu.pipeline_mode<synchronous>, transform_indices = @transform_4, window_bounds = array<i64: 1, 128>}, {pipeline_mode = #tpu.pipeline_mode<synchronous>, transform_indices = @transform_5, window_bounds = array<i64: 256, 128>}, {pipeline_mode = #tpu.pipeline_mode<synchronous>, transform_indices = @transform_6, window_bounds = array<i64: 1, 128>}, {pipeline_mode = #tpu.pipeline_mode<synchronous>, transform_indices = @transform_7, window_bounds = array<i64: 128, 384>}, {pipeline_mode = #tpu.pipeline_mode<synchronous>, transform_indices = @transform_8, window_bounds = array<i64: 128, 384>}, {pipeline_mode = #tpu.pipeline_mode<synchronous>, transform_indices = @transform_9, window_bounds = array<i64: 1, 384>}, {pipeline_mode = #tpu.pipeline_mode<synchronous>, transform_indices = @transform_10, window_bounds = array<i64: 1, 384>}, {transform_indices = @transform_11, window_bounds = array<i64: 128, 128>}, {transform_indices = @transform_12, window_bounds = array<i64: 1, 128>}, {transform_indices = @transform_13, window_bounds = array<i64: 1, 1, 128>}, {transform_indices = @transform_14, window_bounds = array<i64: 1, 1, 128>}, {transform_indices = @transform_15, window_bounds = array<i64: 1, 1, 128>}, {transform_indices = @transform_16, window_bounds = array<i64: 1, 1, 1>}]} {
    %c0_i32 = arith.constant 0 : i32
    %0 = arith.cmpi eq, %arg0, %c0_i32 : i32
    %c0_i32_0 = arith.constant 0 : i32
    %1 = arith.cmpi eq, %arg1, %c0_i32_0 : i32
    %2 = arith.andi %0, %1 : i1
    %3 = arith.extui %2 : i1 to i32
    %c0_i32_1 = arith.constant 0 : i32
    %4 = arith.cmpi ne, %3, %c0_i32_1 : i32
    scf.if %4 {
      %c0_23 = arith.constant 0 : index
      %c0_24 = arith.constant 0 : index
      %36 = vector.load %arg4[%c0_23, %c0_24] : memref<1x128xf32, #tpu.memory_space<vmem>>, vector<1x128xf32>
      %c0_25 = arith.constant 0 : index
      %c0_26 = arith.constant 0 : index
      %37 = vector.load %arg20[%c0_25, %c0_26] : memref<1x128xf32, #tpu.memory_space<vmem>>, vector<1x128xf32>
      tpu.vector_store %arg20[%c0_25, %c0_26], %36 {strides = array<i32>} : memref<1x128xf32, #tpu.memory_space<vmem>>, vector<1x128xf32>,
    } else {
    }
    %c0_i32_2 = arith.constant 0 : i32
    %5 = arith.cmpi eq, %arg1, %c0_i32_2 : i32
    %6 = arith.extui %5 : i1 to i32
    %c0_i32_3 = arith.constant 0 : i32
    %7 = arith.cmpi ne, %6, %c0_i32_3 : i32
    scf.if %7 {
      %c0_23 = arith.constant 0 : index
      %c0_24 = arith.constant 0 : index
      %c0_25 = arith.constant 0 : index
      %36 = vector.load %arg3[%c0_23, %c0_24, %c0_25] : memref<1x1x128xf32, #tpu.memory_space<vmem>>, vector<1x1x128xf32>
      %37 = vector.shape_cast %36 : vector<1x1x128xf32> to vector<1x128xf32>
      %38 = arith.truncf %37 : vector<1x128xf32> to vector<1x128xbf16>
      %c0_26 = arith.constant 0 : index
      %c0_27 = arith.constant 0 : index
      %39 = vector.load %arg20[%c0_26, %c0_27] : memref<1x128xf32, #tpu.memory_space<vmem>>, vector<1x128xf32>
      %40 = arith.truncf %39 : vector<1x128xf32> to vector<1x128xbf16>
      %c0_28 = arith.constant 0 : index
      %c0_29 = arith.constant 0 : index
      %41 = vector.load %arg6[%c0_28, %c0_29] : memref<256x128xbf16, #tpu.memory_space<vmem>>, vector<128x128xbf16>
      %cst_30 = arith.constant dense<0.000000e+00> : vector<1x128xf32>
      %42 = tpu.matmul %38, %41, %cst_30 {dimension_numbers = #tpu.dot_dimension_numbers<[1], [0], [0], [1], [0, 0, 1, 1], [], []>} : vector<1x128xbf16>, vector<128x128xbf16>, vector<1x128xf32> -> vector<1x128xf32>
      %c128 = arith.constant 128 : index
      %c0_31 = arith.constant 0 : index
      %43 = vector.load %arg6[%c128, %c0_31] : memref<256x128xbf16, #tpu.memory_space<vmem>>, vector<128x128xbf16>
      %cst_32 = arith.constant dense<0.000000e+00> : vector<1x128xf32>
      %44 = tpu.matmul %40, %43, %cst_32 {dimension_numbers = #tpu.dot_dimension_numbers<[1], [0], [0], [1], [0, 0, 1, 1], [], []>} : vector<1x128xbf16>, vector<128x128xbf16>, vector<1x128xf32> -> vector<1x128xf32>
      %45 = arith.addf %42, %44 : vector<1x128xf32>
      %c0_33 = arith.constant 0 : index
      %c0_34 = arith.constant 0 : index
      %46 = vector.load %arg7[%c0_33, %c0_34] : memref<1x128xf32, #tpu.memory_space<vmem>>, vector<1x128xf32>
      %47 = arith.addf %45, %46 : vector<1x128xf32>
      %cst_35 = arith.constant dense<0xFF800000> : vector<1xf32>
      %48 = vector.multi_reduction <maximumf>, %47, %cst_35 [1] : vector<1x128xf32> to vector<1xf32>
      %49 = vector.shape_cast %48 : vector<1xf32> to vector<1x1xf32>
      %50 = vector.broadcast %49 : vector<1x1xf32> to vector<1x128xf32>
      %51 = arith.subf %47, %50 : vector<1x128xf32>
      %52 = math.exp %51 : vector<1x128xf32>
      %cst_36 = arith.constant dense<0.000000e+00> : vector<1xf32>
      %53 = vector.multi_reduction <add>, %52, %cst_36 [1] : vector<1x128xf32> to vector<1xf32>
      %54 = vector.shape_cast %53 : vector<1xf32> to vector<1x1xf32>
      %55 = vector.broadcast %54 : vector<1x1xf32> to vector<1x128xf32>
      %56 = arith.divf %52, %55 : vector<1x128xf32>
      %c0_37 = arith.constant 0 : index
      %c0_38 = arith.constant 0 : index
      %c0_39 = arith.constant 0 : index
      %57 = vector.load %arg18[%c0_37, %c0_38, %c0_39] : memref<1x1x128xf32, #tpu.memory_space<vmem>>, vector<1x1x128xf32>
      %58 = vector.shape_cast %57 : vector<1x1x128xf32> to vector<1x128xf32>
      %59 = vector.shape_cast %56 : vector<1x128xf32> to vector<1x1x128xf32>
      tpu.vector_store %arg18[%c0_37, %c0_38, %c0_39], %59 {strides = array<i32>} : memref<1x1x128xf32, #tpu.memory_space<vmem>>, vector<1x1x128xf32>,
      %60 = arith.truncf %56 : vector<1x128xf32> to vector<1x128xbf16>
      %c0_40 = arith.constant 0 : index
      %c0_41 = arith.constant 0 : index
      %61 = vector.load %arg5[%c0_40, %c0_41] : memref<128x128xbf16, #tpu.memory_space<vmem>>, vector<128x128xbf16>
      %cst_42 = arith.constant dense<0.000000e+00> : vector<1x128xf32>
      %62 = tpu.matmul %60, %61, %cst_42 {dimension_numbers = #tpu.dot_dimension_numbers<[1], [0], [0], [1], [0, 0, 1, 1], [], []>} : vector<1x128xbf16>, vector<128x128xbf16>, vector<1x128xf32> -> vector<1x128xf32>
      %c0_43 = arith.constant 0 : index
      %c0_44 = arith.constant 0 : index
      %63 = vector.load %arg8[%c0_43, %c0_44] : memref<256x128xbf16, #tpu.memory_space<vmem>>, vector<128x128xbf16>
      %cst_45 = arith.constant dense<0.000000e+00> : vector<1x128xf32>
      %64 = tpu.matmul %38, %63, %cst_45 {dimension_numbers = #tpu.dot_dimension_numbers<[1], [0], [0], [1], [0, 0, 1, 1], [], []>} : vector<1x128xbf16>, vector<128x128xbf16>, vector<1x128xf32> -> vector<1x128xf32>
      %65 = arith.truncf %62 : vector<1x128xf32> to vector<1x128xbf16>
      %c128_46 = arith.constant 128 : index
      %c0_47 = arith.constant 0 : index
      %66 = vector.load %arg8[%c128_46, %c0_47] : memref<256x128xbf16, #tpu.memory_space<vmem>>, vector<128x128xbf16>
      %cst_48 = arith.constant dense<0.000000e+00> : vector<1x128xf32>
      %67 = tpu.matmul %65, %66, %cst_48 {dimension_numbers = #tpu.dot_dimension_numbers<[1], [0], [0], [1], [0, 0, 1, 1], [], []>} : vector<1x128xbf16>, vector<128x128xbf16>, vector<1x128xf32> -> vector<1x128xf32>
      %68 = arith.addf %64, %67 : vector<1x128xf32>
      %c0_49 = arith.constant 0 : index
      %c0_50 = arith.constant 0 : index
      %69 = vector.load %arg9[%c0_49, %c0_50] : memref<1x128xf32, #tpu.memory_space<vmem>>, vector<1x128xf32>
      %70 = arith.addf %68, %69 : vector<1x128xf32>
      %cst_51 = arith.constant 0.000000e+00 : f32
      %71 = vector.broadcast %cst_51 : f32 to vector<1x128xf32>
      %72 = arith.maximumf %70, %71 : vector<1x128xf32>
      %73 = arith.truncf %72 : vector<1x128xf32> to vector<1x128xbf16>
      %c0_52 = arith.constant 0 : index
      %c0_53 = arith.constant 0 : index
      %74 = vector.load %arg10[%c0_52, %c0_53] : memref<128x384xbf16, #tpu.memory_space<vmem>>, vector<128x384xbf16>
      %cst_54 = arith.constant dense<0.000000e+00> : vector<1x384xf32>
      %75 = tpu.matmul %73, %74, %cst_54 {dimension_numbers = #tpu.dot_dimension_numbers<[1], [0], [0], [1], [0, 0, 1, 1], [], []>} : vector<1x128xbf16>, vector<128x384xbf16>, vector<1x384xf32> -> vector<1x384xf32>
      %c0_55 = arith.constant 0 : index
      %c0_56 = arith.constant 0 : index
      %76 = vector.load %arg12[%c0_55, %c0_56] : memref<1x384xf32, #tpu.memory_space<vmem>>, vector<1x384xf32>
      %77 = arith.addf %75, %76 : vector<1x384xf32>
      %c0_57 = arith.constant 0 : index
      %c0_58 = arith.constant 0 : index
      %78 = vector.load %arg11[%c0_57, %c0_58] : memref<128x384xbf16, #tpu.memory_space<vmem>>, vector<128x384xbf16>
      %cst_59 = arith.constant dense<0.000000e+00> : vector<1x384xf32>
      %79 = tpu.matmul %40, %78, %cst_59 {dimension_numbers = #tpu.dot_dimension_numbers<[1], [0], [0], [1], [0, 0, 1, 1], [], []>} : vector<1x128xbf16>, vector<128x384xbf16>, vector<1x384xf32> -> vector<1x384xf32>
      %c0_60 = arith.constant 0 : index
      %c0_61 = arith.constant 0 : index
      %80 = vector.load %arg13[%c0_60, %c0_61] : memref<1x384xf32, #tpu.memory_space<vmem>>, vector<1x384xf32>
      %81 = arith.addf %79, %80 : vector<1x384xf32>
      %82 = vector.extract_strided_slice %77 {offsets = [0, 0], sizes = [1, 128], strides = [1, 1]} : vector<1x384xf32> to vector<1x128xf32>
      %83 = vector.extract_strided_slice %81 {offsets = [0, 0], sizes = [1, 128], strides = [1, 1]} : vector<1x384xf32> to vector<1x128xf32>
      %84 = arith.addf %82, %83 : vector<1x128xf32>
      %85 = arith.negf %84 : vector<1x128xf32>
      %86 = math.exp %85 : vector<1x128xf32>
      %cst_62 = arith.constant 1.000000e+00 : f32
      %87 = vector.broadcast %cst_62 : f32 to vector<1x128xf32>
      %88 = arith.addf %87, %86 : vector<1x128xf32>
      %89 = arith.divf %87, %88 : vector<1x128xf32>
      %90 = vector.extract_strided_slice %77 {offsets = [0, 128], sizes = [1, 128], strides = [1, 1]} : vector<1x384xf32> to vector<1x128xf32>
      %91 = vector.extract_strided_slice %81 {offsets = [0, 128], sizes = [1, 128], strides = [1, 1]} : vector<1x384xf32> to vector<1x128xf32>
      %92 = arith.addf %90, %91 : vector<1x128xf32>
      %93 = arith.negf %92 : vector<1x128xf32>
      %94 = math.exp %93 : vector<1x128xf32>
      %cst_63 = arith.constant 1.000000e+00 : f32
      %95 = vector.broadcast %cst_63 : f32 to vector<1x128xf32>
      %96 = arith.addf %95, %94 : vector<1x128xf32>
      %97 = arith.divf %95, %96 : vector<1x128xf32>
      %98 = vector.extract_strided_slice %77 {offsets = [0, 256], sizes = [1, 128], strides = [1, 1]} : vector<1x384xf32> to vector<1x128xf32>
      %99 = vector.extract_strided_slice %81 {offsets = [0, 256], sizes = [1, 128], strides = [1, 1]} : vector<1x384xf32> to vector<1x128xf32>
      %100 = arith.mulf %89, %99 : vector<1x128xf32>
      %101 = arith.addf %98, %100 : vector<1x128xf32>
      %102 = math.tanh %101 : vector<1x128xf32>
      %cst_64 = arith.constant 1.000000e+00 : f32
      %103 = vector.broadcast %cst_64 : f32 to vector<1x128xf32>
      %104 = arith.subf %103, %97 : vector<1x128xf32>
      %105 = arith.mulf %104, %102 : vector<1x128xf32>
      %106 = arith.mulf %97, %39 : vector<1x128xf32>
      %107 = arith.addf %105, %106 : vector<1x128xf32>
      %c0_65 = arith.constant 0 : index
      %c0_66 = arith.constant 0 : index
      %108 = vector.load %arg20[%c0_65, %c0_66] : memref<1x128xf32, #tpu.memory_space<vmem>>, vector<1x128xf32>
      tpu.vector_store %arg20[%c0_65, %c0_66], %107 {strides = array<i32>} : memref<1x128xf32, #tpu.memory_space<vmem>>, vector<1x128xf32>,
      %c0_67 = arith.constant 0 : index
      %c0_68 = arith.constant 0 : index
      %c0_69 = arith.constant 0 : index
      %109 = vector.load %arg17[%c0_67, %c0_68, %c0_69] : memref<1x1x128xf32, #tpu.memory_space<vmem>>, vector<1x1x128xf32>
      %110 = vector.shape_cast %109 : vector<1x1x128xf32> to vector<1x128xf32>
      %111 = vector.shape_cast %107 : vector<1x128xf32> to vector<1x1x128xf32>
      tpu.vector_store %arg17[%c0_67, %c0_68, %c0_69], %111 {strides = array<i32>} : memref<1x1x128xf32, #tpu.memory_space<vmem>>, vector<1x1x128xf32>,
      %cst_70 = arith.constant 0xFF800000 : f32
      %112 = vector.broadcast %cst_70 : f32 to vector<1x1xf32>
      %c0_71 = arith.constant 0 : index
      %c0_72 = arith.constant 0 : index
      %113 = vector.load %arg21[%c0_71, %c0_72] : memref<1x1xf32, #tpu.memory_space<vmem>>, vector<1x1xf32>
      tpu.vector_store %arg21[%c0_71, %c0_72], %112 {strides = array<i32>} : memref<1x1xf32, #tpu.memory_space<vmem>>, vector<1x1xf32>,
      %cst_73 = arith.constant 0.000000e+00 : f32
      %114 = vector.broadcast %cst_73 : f32 to vector<1x1xf32>
      %c0_74 = arith.constant 0 : index
      %c0_75 = arith.constant 0 : index
      %115 = vector.load %arg22[%c0_74, %c0_75] : memref<1x1xf32, #tpu.memory_space<vmem>>, vector<1x1xf32>
      tpu.vector_store %arg22[%c0_74, %c0_75], %114 {strides = array<i32>} : memref<1x1xf32, #tpu.memory_space<vmem>>, vector<1x1xf32>,
    } else {
    }
    %c0 = arith.constant 0 : index
    %c0_4 = arith.constant 0 : index
    %8 = vector.load %arg20[%c0, %c0_4] : memref<1x128xf32, #tpu.memory_space<vmem>>, vector<1x128xf32>
    %9 = arith.truncf %8 : vector<1x128xf32> to vector<1x128xbf16>
    %c0_5 = arith.constant 0 : index
    %c0_6 = arith.constant 0 : index
    %10 = vector.load %arg14[%c0_5, %c0_6] : memref<128x128xbf16, #tpu.memory_space<vmem>>, vector<128x128xbf16>
    %cst = arith.constant dense<0.000000e+00> : vector<1x128xf32>
    %11 = tpu.matmul %9, %10, %cst {dimension_numbers = #tpu.dot_dimension_numbers<[1], [0], [0], [1], [0, 0, 1, 1], [], []>} : vector<1x128xbf16>, vector<128x128xbf16>, vector<1x128xf32> -> vector<1x128xf32>
    %c0_7 = arith.constant 0 : index
    %c0_8 = arith.constant 0 : index
    %12 = vector.load %arg15[%c0_7, %c0_8] : memref<1x128xf32, #tpu.memory_space<vmem>>, vector<1x128xf32>
    %13 = arith.addf %11, %12 : vector<1x128xf32>
    %c0_9 = arith.constant 0 : index
    %c0_10 = arith.constant 0 : index
    %c0_11 = arith.constant 0 : index
    %14 = vector.load %arg16[%c0_9, %c0_10, %c0_11] : memref<1x1x128xf32, #tpu.memory_space<vmem>>, vector<1x1x128xf32>
    %15 = vector.shape_cast %14 : vector<1x1x128xf32> to vector<1x128xf32>
    %16 = vector.shape_cast %13 : vector<1x128xf32> to vector<1x1x128xf32>
    tpu.vector_store %arg16[%c0_9, %c0_10, %c0_11], %16 {strides = array<i32>} : memref<1x1x128xf32, #tpu.memory_space<vmem>>, vector<1x1x128xf32>,
    %c0_12 = arith.constant 0 : index
    %c0_13 = arith.constant 0 : index
    %17 = vector.load %arg21[%c0_12, %c0_13] : memref<1x1xf32, #tpu.memory_space<vmem>>, vector<1x1xf32>
    %cst_14 = arith.constant dense<0xFF800000> : vector<1xf32>
    %18 = vector.multi_reduction <maximumf>, %13, %cst_14 [1] : vector<1x128xf32> to vector<1xf32>
    %19 = vector.shape_cast %18 : vector<1xf32> to vector<1x1xf32>
    %20 = arith.maximumf %17, %19 : vector<1x1xf32>
    %c0_15 = arith.constant 0 : index
    %c0_16 = arith.constant 0 : index
    %21 = vector.load %arg22[%c0_15, %c0_16] : memref<1x1xf32, #tpu.memory_space<vmem>>, vector<1x1xf32>
    %22 = arith.subf %17, %20 : vector<1x1xf32>
    %23 = math.exp %22 : vector<1x1xf32>
    %24 = arith.mulf %21, %23 : vector<1x1xf32>
    %25 = vector.broadcast %20 : vector<1x1xf32> to vector<1x128xf32>
    %26 = arith.subf %13, %25 : vector<1x128xf32>
    %27 = math.exp %26 : vector<1x128xf32>
    %cst_17 = arith.constant dense<0.000000e+00> : vector<1xf32>
    %28 = vector.multi_reduction <add>, %27, %cst_17 [1] : vector<1x128xf32> to vector<1xf32>
    %29 = vector.shape_cast %28 : vector<1xf32> to vector<1x1xf32>
    %30 = arith.addf %24, %29 : vector<1x1xf32>
    %c0_18 = arith.constant 0 : index
    %c0_19 = arith.constant 0 : index
    %31 = vector.load %arg22[%c0_18, %c0_19] : memref<1x1xf32, #tpu.memory_space<vmem>>, vector<1x1xf32>
    tpu.vector_store %arg22[%c0_18, %c0_19], %30 {strides = array<i32>} : memref<1x1xf32, #tpu.memory_space<vmem>>, vector<1x1xf32>,
    %c0_20 = arith.constant 0 : index
    %c0_21 = arith.constant 0 : index
    %32 = vector.load %arg21[%c0_20, %c0_21] : memref<1x1xf32, #tpu.memory_space<vmem>>, vector<1x1xf32>
    tpu.vector_store %arg21[%c0_20, %c0_21], %20 {strides = array<i32>} : memref<1x1xf32, #tpu.memory_space<vmem>>, vector<1x1xf32>,
    %c1_i32 = arith.constant 1 : i32
    %33 = arith.cmpi eq, %arg1, %c1_i32 : i32
    %34 = arith.extui %33 : i1 to i32
    %c0_i32_22 = arith.constant 0 : i32
    %35 = arith.cmpi ne, %34, %c0_i32_22 : i32
    scf.if %35 {
      %c0_23 = arith.constant 0 : index
      %c0_24 = arith.constant 0 : index
      %36 = vector.load %arg21[%c0_23, %c0_24] : memref<1x1xf32, #tpu.memory_space<vmem>>, vector<1x1xf32>
      %c0_25 = arith.constant 0 : index
      %c0_26 = arith.constant 0 : index
      %37 = vector.load %arg22[%c0_25, %c0_26] : memref<1x1xf32, #tpu.memory_space<vmem>>, vector<1x1xf32>
      %38 = math.log %37 : vector<1x1xf32>
      %39 = arith.addf %36, %38 : vector<1x1xf32>
      %c0_27 = arith.constant 0 : index
      %c0_28 = arith.constant 0 : index
      %c0_29 = arith.constant 0 : index
      %40 = vector.load %arg19[%c0_27, %c0_28, %c0_29] : memref<1x1x1xf32, #tpu.memory_space<vmem>>, vector<1x1x1xf32>
      %41 = vector.shape_cast %40 : vector<1x1x1xf32> to vector<1x1xf32>
      %42 = vector.shape_cast %39 : vector<1x1xf32> to vector<1x1x1xf32>
      tpu.vector_store %arg19[%c0_27, %c0_28, %c0_29], %42 {strides = array<i32>} : memref<1x1x1xf32, #tpu.memory_space<vmem>>, vector<1x1x1xf32>,
    } else {
    }
    return
  }
  func.func @transform_0(%arg0: i32, %arg1: i32, %arg2: memref<6xi32, #tpu.memory_space<smem>>) -> (i32, i32, i32) {
    %0 = arith.index_cast %arg0 : i32 to index
    %1 = memref.load %arg2[%0] : memref<6xi32, #tpu.memory_space<smem>>
    %c0_i32 = arith.constant 0 : i32
    %c0_i32_0 = arith.constant 0 : i32
    %c0_i32_1 = arith.constant 0 : i32
    return %1, %c0_i32, %c0_i32_0 : i32, i32, i32
  }
  func.func @transform_1(%arg0: i32, %arg1: i32, %arg2: memref<6xi32, #tpu.memory_space<smem>>) -> (i32, i32) {
    %c0_i32 = arith.constant 0 : i32
    %c0_i32_0 = arith.constant 0 : i32
    %c0_i32_1 = arith.constant 0 : i32
    return %c0_i32, %c0_i32_0 : i32, i32
  }
  func.func @transform_2(%arg0: i32, %arg1: i32, %arg2: memref<6xi32, #tpu.memory_space<smem>>) -> (i32, i32) {
    %c0_i32 = arith.constant 0 : i32
    %c0_i32_0 = arith.constant 0 : i32
    %c0_i32_1 = arith.constant 0 : i32
    return %c0_i32, %c0_i32_0 : i32, i32
  }
  func.func @transform_3(%arg0: i32, %arg1: i32, %arg2: memref<6xi32, #tpu.memory_space<smem>>) -> (i32, i32) {
    %c0_i32 = arith.constant 0 : i32
    %c0_i32_0 = arith.constant 0 : i32
    %c0_i32_1 = arith.constant 0 : i32
    return %c0_i32, %c0_i32_0 : i32, i32
  }
  func.func @transform_4(%arg0: i32, %arg1: i32, %arg2: memref<6xi32, #tpu.memory_space<smem>>) -> (i32, i32) {
    %c0_i32 = arith.constant 0 : i32
    %c0_i32_0 = arith.constant 0 : i32
    %c0_i32_1 = arith.constant 0 : i32
    return %c0_i32, %c0_i32_0 : i32, i32
  }
  func.func @transform_5(%arg0: i32, %arg1: i32, %arg2: memref<6xi32, #tpu.memory_space<smem>>) -> (i32, i32) {
    %c0_i32 = arith.constant 0 : i32
    %c0_i32_0 = arith.constant 0 : i32
    %c0_i32_1 = arith.constant 0 : i32
    return %c0_i32, %c0_i32_0 : i32, i32
  }
  func.func @transform_6(%arg0: i32, %arg1: i32, %arg2: memref<6xi32, #tpu.memory_space<smem>>) -> (i32, i32) {
    %c0_i32 = arith.constant 0 : i32
    %c0_i32_0 = arith.constant 0 : i32
    %c0_i32_1 = arith.constant 0 : i32
    return %c0_i32, %c0_i32_0 : i32, i32
  }
  func.func @transform_7(%arg0: i32, %arg1: i32, %arg2: memref<6xi32, #tpu.memory_space<smem>>) -> (i32, i32) {
    %c0_i32 = arith.constant 0 : i32
    %c0_i32_0 = arith.constant 0 : i32
    %c0_i32_1 = arith.constant 0 : i32
    return %c0_i32, %c0_i32_0 : i32, i32
  }
  func.func @transform_8(%arg0: i32, %arg1: i32, %arg2: memref<6xi32, #tpu.memory_space<smem>>) -> (i32, i32) {
    %c0_i32 = arith.constant 0 : i32
    %c0_i32_0 = arith.constant 0 : i32
    %c0_i32_1 = arith.constant 0 : i32
    return %c0_i32, %c0_i32_0 : i32, i32
  }
  func.func @transform_9(%arg0: i32, %arg1: i32, %arg2: memref<6xi32, #tpu.memory_space<smem>>) -> (i32, i32) {
    %c0_i32 = arith.constant 0 : i32
    %c0_i32_0 = arith.constant 0 : i32
    %c0_i32_1 = arith.constant 0 : i32
    return %c0_i32, %c0_i32_0 : i32, i32
  }
  func.func @transform_10(%arg0: i32, %arg1: i32, %arg2: memref<6xi32, #tpu.memory_space<smem>>) -> (i32, i32) {
    %c0_i32 = arith.constant 0 : i32
    %c0_i32_0 = arith.constant 0 : i32
    %c0_i32_1 = arith.constant 0 : i32
    return %c0_i32, %c0_i32_0 : i32, i32
  }
  func.func @transform_11(%arg0: i32, %arg1: i32, %arg2: memref<6xi32, #tpu.memory_space<smem>>) -> (i32, i32) {
    %c0_i32 = arith.constant 0 : i32
    %c0_i32_0 = arith.constant 0 : i32
    return %c0_i32, %arg1 : i32, i32
  }
  func.func @transform_12(%arg0: i32, %arg1: i32, %arg2: memref<6xi32, #tpu.memory_space<smem>>) -> (i32, i32) {
    %c0_i32 = arith.constant 0 : i32
    %c0_i32_0 = arith.constant 0 : i32
    return %c0_i32, %arg1 : i32, i32
  }
  func.func @transform_13(%arg0: i32, %arg1: i32, %arg2: memref<6xi32, #tpu.memory_space<smem>>) -> (i32, i32, i32) {
    %c0_i32 = arith.constant 0 : i32
    %c0_i32_0 = arith.constant 0 : i32
    return %arg0, %c0_i32, %arg1 : i32, i32, i32
  }
  func.func @transform_14(%arg0: i32, %arg1: i32, %arg2: memref<6xi32, #tpu.memory_space<smem>>) -> (i32, i32, i32) {
    %c0_i32 = arith.constant 0 : i32
    %c0_i32_0 = arith.constant 0 : i32
    %c0_i32_1 = arith.constant 0 : i32
    return %arg0, %c0_i32, %c0_i32_0 : i32, i32, i32
  }
  func.func @transform_15(%arg0: i32, %arg1: i32, %arg2: memref<6xi32, #tpu.memory_space<smem>>) -> (i32, i32, i32) {
    %c0_i32 = arith.constant 0 : i32
    %c0_i32_0 = arith.constant 0 : i32
    %c0_i32_1 = arith.constant 0 : i32
    return %arg0, %c0_i32, %c0_i32_0 : i32, i32, i32
  }
  func.func @transform_16(%arg0: i32, %arg1: i32, %arg2: memref<6xi32, #tpu.memory_space<smem>>) -> (i32, i32, i32) {
    %c0_i32 = arith.constant 0 : i32
    %c0_i32_0 = arith.constant 0 : i32
    %c0_i32_1 = arith.constant 0 : i32
    return %arg0, %c0_i32, %c0_i32_0 : i32, i32, i32
  }
}

module attributes {stable_mosaic.version = 11 : i64} {
  func.func @_attn_decoder_kernel(%arg0: i32, %arg1: i32, %arg2: memref<6xi32, #tpu.memory_space<smem>>, %arg3: memref<1x1x128xf32, #tpu.memory_space<vmem>>, %arg4: memref<1x128xf32, #tpu.memory_space<vmem>>, %arg5: memref<128x128xbf16, #tpu.memory_space<vmem>>, %arg6: memref<256x128xbf16, #tpu.memory_space<vmem>>, %arg7: memref<1x128xf32, #tpu.memory_space<vmem>>, %arg8: memref<256x128xbf16, #tpu.memory_space<vmem>>, %arg9: memref<1x128xf32, #tpu.memory_space<vmem>>, %arg10: memref<128x384xbf16, #tpu.memory_space<vmem>>, %arg11: memref<128x384xbf16, #tpu.memory_space<vmem>>, %arg12: memref<1x384xf32, #tpu.memory_space<vmem>>, %arg13: memref<1x384xf32, #tpu.memory_space<vmem>>, %arg14: memref<128x128xbf16, #tpu.memory_space<vmem>>, %arg15: memref<1x128xf32, #tpu.memory_space<vmem>>, %arg16: memref<1x1x128xf32, #tpu.memory_space<vmem>>, %arg17: memref<1x1x128xf32, #tpu.memory_space<vmem>>, %arg18: memref<1x1x128xf32, #tpu.memory_space<vmem>>, %arg19: memref<1x1x1xf32, #tpu.memory_space<vmem>>, %arg20: memref<1x128xf32, #tpu.memory_space<vmem>>, %arg21: memref<1x1xf32, #tpu.memory_space<vmem>>, %arg22: memref<1x1xf32, #tpu.memory_space<vmem>>) attributes {dimension_semantics = [#tpu.dimension_semantics<arbitrary>, #tpu.dimension_semantics<arbitrary>], iteration_bounds = array<i64: 6, 2>, scalar_prefetch = 1 : i64, scratch_operands = 3 : i64, tpu.core_type = #tpu.core_type<tc>, window_params = [{transform_indices = @transform_0, window_bounds = array<i64: 1, 1, 128>}, {pipeline_mode = #tpu.pipeline_mode<synchronous>, transform_indices = @transform_1, window_bounds = array<i64: 1, 128>}, {pipeline_mode = #tpu.pipeline_mode<synchronous>, transform_indices = @transform_2, window_bounds = array<i64: 128, 128>}, {pipeline_mode = #tpu.pipeline_mode<synchronous>, transform_indices = @transform_3, window_bounds = array<i64: 256, 128>}, {pipeline_mode = #tpu.pipeline_mode<synchronous>, transform_indices = @transform_4, window_bounds = array<i64: 1, 128>}, {pipeline_mode = #tpu.pipeline_mode<synchronous>, transform_indices = @transform_5, window_bounds = array<i64: 256, 128>}, {pipeline_mode = #tpu.pipeline_mode<synchronous>, transform_indices = @transform_6, window_bounds = array<i64: 1, 128>}, {pipeline_mode = #tpu.pipeline_mode<synchronous>, transform_indices = @transform_7, window_bounds = array<i64: 128, 384>}, {pipeline_mode = #tpu.pipeline_mode<synchronous>, transform_indices = @transform_8, window_bounds = array<i64: 128, 384>}, {pipeline_mode = #tpu.pipeline_mode<synchronous>, transform_indices = @transform_9, window_bounds = array<i64: 1, 384>}, {pipeline_mode = #tpu.pipeline_mode<synchronous>, transform_indices = @transform_10, window_bounds = array<i64: 1, 384>}, {transform_indices = @transform_11, window_bounds = array<i64: 128, 128>}, {transform_indices = @transform_12, window_bounds = array<i64: 1, 128>}, {transform_indices = @transform_13, window_bounds = array<i64: 1, 1, 128>}, {transform_indices = @transform_14, window_bounds = array<i64: 1, 1, 128>}, {transform_indices = @transform_15, window_bounds = array<i64: 1, 1, 128>}, {transform_indices = @transform_16, window_bounds = array<i64: 1, 1, 1>}]} {
    %c0_i32 = arith.constant 0 : i32
    %0 = arith.cmpi eq, %arg0, %c0_i32 : i32
    %c0_i32_0 = arith.constant 0 : i32
    %1 = arith.cmpi eq, %arg1, %c0_i32_0 : i32
    %2 = arith.andi %0, %1 : i1
    %3 = arith.extui %2 : i1 to i32
    %c0_i32_1 = arith.constant 0 : i32
    %4 = arith.cmpi ne, %3, %c0_i32_1 : i32
    scf.if %4 {
      %c0_23 = arith.constant 0 : index
      %c0_24 = arith.constant 0 : index
      %36 = vector.load %arg4[%c0_23, %c0_24] : memref<1x128xf32, #tpu.memory_space<vmem>>, vector<1x128xf32>
      %c0_25 = arith.constant 0 : index
      %c0_26 = arith.constant 0 : index
      %37 = vector.load %arg20[%c0_25, %c0_26] : memref<1x128xf32, #tpu.memory_space<vmem>>, vector<1x128xf32>
      tpu.vector_store %arg20[%c0_25, %c0_26], %36 {strides = array<i32>} : memref<1x128xf32, #tpu.memory_space<vmem>>, vector<1x128xf32>,
    } else {
    }
    %c0_i32_2 = arith.constant 0 : i32
    %5 = arith.cmpi eq, %arg1, %c0_i32_2 : i32
    %6 = arith.extui %5 : i1 to i32
    %c0_i32_3 = arith.constant 0 : i32
    %7 = arith.cmpi ne, %6, %c0_i32_3 : i32
    scf.if %7 {
      %c0_23 = arith.constant 0 : index
      %c0_24 = arith.constant 0 : index
      %c0_25 = arith.constant 0 : index
      %36 = vector.load %arg3[%c0_23, %c0_24, %c0_25] : memref<1x1x128xf32, #tpu.memory_space<vmem>>, vector<1x1x128xf32>
      %37 = vector.shape_cast %36 : vector<1x1x128xf32> to vector<1x128xf32>
      %38 = arith.truncf %37 : vector<1x128xf32> to vector<1x128xbf16>
      %c0_26 = arith.constant 0 : index
      %c0_27 = arith.constant 0 : index
      %39 = vector.load %arg20[%c0_26, %c0_27] : memref<1x128xf32, #tpu.memory_space<vmem>>, vector<1x128xf32>
      %40 = arith.truncf %39 : vector<1x128xf32> to vector<1x128xbf16>
      %c0_28 = arith.constant 0 : index
      %c0_29 = arith.constant 0 : index
      %41 = vector.load %arg6[%c0_28, %c0_29] : memref<256x128xbf16, #tpu.memory_space<vmem>>, vector<128x128xbf16>
      %cst_30 = arith.constant dense<0.000000e+00> : vector<1x128xf32>
      %42 = tpu.matmul %38, %41, %cst_30 {dimension_numbers = #tpu.dot_dimension_numbers<[1], [0], [0], [1], [0, 0, 1, 1], [], []>} : vector<1x128xbf16>, vector<128x128xbf16>, vector<1x128xf32> -> vector<1x128xf32>
      %c128 = arith.constant 128 : index
      %c0_31 = arith.constant 0 : index
      %43 = vector.load %arg6[%c128, %c0_31] : memref<256x128xbf16, #tpu.memory_space<vmem>>, vector<128x128xbf16>
      %cst_32 = arith.constant dense<0.000000e+00> : vector<1x128xf32>
      %44 = tpu.matmul %40, %43, %cst_32 {dimension_numbers = #tpu.dot_dimension_numbers<[1], [0], [0], [1], [0, 0, 1, 1], [], []>} : vector<1x128xbf16>, vector<128x128xbf16>, vector<1x128xf32> -> vector<1x128xf32>
      %45 = arith.addf %42, %44 : vector<1x128xf32>
      %c0_33 = arith.constant 0 : index
      %c0_34 = arith.constant 0 : index
      %46 = vector.load %arg7[%c0_33, %c0_34] : memref<1x128xf32, #tpu.memory_space<vmem>>, vector<1x128xf32>
      %47 = arith.addf %45, %46 : vector<1x128xf32>
      %cst_35 = arith.constant dense<0xFF800000> : vector<1xf32>
      %48 = vector.multi_reduction <maximumf>, %47, %cst_35 [1] : vector<1x128xf32> to vector<1xf32>
      %49 = vector.shape_cast %48 : vector<1xf32> to vector<1x1xf32>
      %50 = vector.broadcast %49 : vector<1x1xf32> to vector<1x128xf32>
      %51 = arith.subf %47, %50 : vector<1x128xf32>
      %52 = math.exp %51 : vector<1x128xf32>
      %cst_36 = arith.constant dense<0.000000e+00> : vector<1xf32>
      %53 = vector.multi_reduction <add>, %52, %cst_36 [1] : vector<1x128xf32> to vector<1xf32>
      %54 = vector.shape_cast %53 : vector<1xf32> to vector<1x1xf32>
      %55 = vector.broadcast %54 : vector<1x1xf32> to vector<1x128xf32>
      %56 = arith.divf %52, %55 : vector<1x128xf32>
      %c0_37 = arith.constant 0 : index
      %c0_38 = arith.constant 0 : index
      %c0_39 = arith.constant 0 : index
      %57 = vector.load %arg18[%c0_37, %c0_38, %c0_39] : memref<1x1x128xf32, #tpu.memory_space<vmem>>, vector<1x1x128xf32>
      %58 = vector.shape_cast %57 : vector<1x1x128xf32> to vector<1x128xf32>
      %59 = vector.shape_cast %56 : vector<1x128xf32> to vector<1x1x128xf32>
      tpu.vector_store %arg18[%c0_37, %c0_38, %c0_39], %59 {strides = array<i32>} : memref<1x1x128xf32, #tpu.memory_space<vmem>>, vector<1x1x128xf32>,
      %60 = arith.truncf %56 : vector<1x128xf32> to vector<1x128xbf16>
      %c0_40 = arith.constant 0 : index
      %c0_41 = arith.constant 0 : index
      %61 = vector.load %arg5[%c0_40, %c0_41] : memref<128x128xbf16, #tpu.memory_space<vmem>>, vector<128x128xbf16>
      %cst_42 = arith.constant dense<0.000000e+00> : vector<1x128xf32>
      %62 = tpu.matmul %60, %61, %cst_42 {dimension_numbers = #tpu.dot_dimension_numbers<[1], [0], [0], [1], [0, 0, 1, 1], [], []>} : vector<1x128xbf16>, vector<128x128xbf16>, vector<1x128xf32> -> vector<1x128xf32>
      %c0_43 = arith.constant 0 : index
      %c0_44 = arith.constant 0 : index
      %63 = vector.load %arg8[%c0_43, %c0_44] : memref<256x128xbf16, #tpu.memory_space<vmem>>, vector<128x128xbf16>
      %cst_45 = arith.constant dense<0.000000e+00> : vector<1x128xf32>
      %64 = tpu.matmul %38, %63, %cst_45 {dimension_numbers = #tpu.dot_dimension_numbers<[1], [0], [0], [1], [0, 0, 1, 1], [], []>} : vector<1x128xbf16>, vector<128x128xbf16>, vector<1x128xf32> -> vector<1x128xf32>
      %65 = arith.truncf %62 : vector<1x128xf32> to vector<1x128xbf16>
      %c128_46 = arith.constant 128 : index
      %c0_47 = arith.constant 0 : index
      %66 = vector.load %arg8[%c128_46, %c0_47] : memref<256x128xbf16, #tpu.memory_space<vmem>>, vector<128x128xbf16>
      %cst_48 = arith.constant dense<0.000000e+00> : vector<1x128xf32>
      %67 = tpu.matmul %65, %66, %cst_48 {dimension_numbers = #tpu.dot_dimension_numbers<[1], [0], [0], [1], [0, 0, 1, 1], [], []>} : vector<1x128xbf16>, vector<128x128xbf16>, vector<1x128xf32> -> vector<1x128xf32>
      %68 = arith.addf %64, %67 : vector<1x128xf32>
      %c0_49 = arith.constant 0 : index
      %c0_50 = arith.constant 0 : index
      %69 = vector.load %arg9[%c0_49, %c0_50] : memref<1x128xf32, #tpu.memory_space<vmem>>, vector<1x128xf32>
      %70 = arith.addf %68, %69 : vector<1x128xf32>
      %cst_51 = arith.constant 0.000000e+00 : f32
      %71 = vector.broadcast %cst_51 : f32 to vector<1x128xf32>
      %72 = arith.maximumf %70, %71 : vector<1x128xf32>
      %73 = arith.truncf %72 : vector<1x128xf32> to vector<1x128xbf16>
      %c0_52 = arith.constant 0 : index
      %c0_53 = arith.constant 0 : index
      %74 = vector.load %arg10[%c0_52, %c0_53] : memref<128x384xbf16, #tpu.memory_space<vmem>>, vector<128x384xbf16>
      %cst_54 = arith.constant dense<0.000000e+00> : vector<1x384xf32>
      %75 = tpu.matmul %73, %74, %cst_54 {dimension_numbers = #tpu.dot_dimension_numbers<[1], [0], [0], [1], [0, 0, 1, 1], [], []>} : vector<1x128xbf16>, vector<128x384xbf16>, vector<1x384xf32> -> vector<1x384xf32>
      %c0_55 = arith.constant 0 : index
      %c0_56 = arith.constant 0 : index
      %76 = vector.load %arg12[%c0_55, %c0_56] : memref<1x384xf32, #tpu.memory_space<vmem>>, vector<1x384xf32>
      %77 = arith.addf %75, %76 : vector<1x384xf32>
      %c0_57 = arith.constant 0 : index
      %c0_58 = arith.constant 0 : index
      %78 = vector.load %arg11[%c0_57, %c0_58] : memref<128x384xbf16, #tpu.memory_space<vmem>>, vector<128x384xbf16>
      %cst_59 = arith.constant dense<0.000000e+00> : vector<1x384xf32>
      %79 = tpu.matmul %40, %78, %cst_59 {dimension_numbers = #tpu.dot_dimension_numbers<[1], [0], [0], [1], [0, 0, 1, 1], [], []>} : vector<1x128xbf16>, vector<128x384xbf16>, vector<1x384xf32> -> vector<1x384xf32>
      %c0_60 = arith.constant 0 : index
      %c0_61 = arith.constant 0 : index
      %80 = vector.load %arg13[%c0_60, %c0_61] : memref<1x384xf32, #tpu.memory_space<vmem>>, vector<1x384xf32>
      %81 = arith.addf %79, %80 : vector<1x384xf32>
      %82 = vector.extract_strided_slice %77 {offsets = [0, 0], sizes = [1, 128], strides = [1, 1]} : vector<1x384xf32> to vector<1x128xf32>
      %83 = vector.extract_strided_slice %81 {offsets = [0, 0], sizes = [1, 128], strides = [1, 1]} : vector<1x384xf32> to vector<1x128xf32>
      %84 = arith.addf %82, %83 : vector<1x128xf32>
      %85 = arith.negf %84 : vector<1x128xf32>
      %86 = math.exp %85 : vector<1x128xf32>
      %cst_62 = arith.constant 1.000000e+00 : f32
      %87 = vector.broadcast %cst_62 : f32 to vector<1x128xf32>
      %88 = arith.addf %87, %86 : vector<1x128xf32>
      %89 = arith.divf %87, %88 : vector<1x128xf32>
      %90 = vector.extract_strided_slice %77 {offsets = [0, 128], sizes = [1, 128], strides = [1, 1]} : vector<1x384xf32> to vector<1x128xf32>
      %91 = vector.extract_strided_slice %81 {offsets = [0, 128], sizes = [1, 128], strides = [1, 1]} : vector<1x384xf32> to vector<1x128xf32>
      %92 = arith.addf %90, %91 : vector<1x128xf32>
      %93 = arith.negf %92 : vector<1x128xf32>
      %94 = math.exp %93 : vector<1x128xf32>
      %cst_63 = arith.constant 1.000000e+00 : f32
      %95 = vector.broadcast %cst_63 : f32 to vector<1x128xf32>
      %96 = arith.addf %95, %94 : vector<1x128xf32>
      %97 = arith.divf %95, %96 : vector<1x128xf32>
      %98 = vector.extract_strided_slice %77 {offsets = [0, 256], sizes = [1, 128], strides = [1, 1]} : vector<1x384xf32> to vector<1x128xf32>
      %99 = vector.extract_strided_slice %81 {offsets = [0, 256], sizes = [1, 128], strides = [1, 1]} : vector<1x384xf32> to vector<1x128xf32>
      %100 = arith.mulf %89, %99 : vector<1x128xf32>
      %101 = arith.addf %98, %100 : vector<1x128xf32>
      %102 = math.tanh %101 : vector<1x128xf32>
      %cst_64 = arith.constant 1.000000e+00 : f32
      %103 = vector.broadcast %cst_64 : f32 to vector<1x128xf32>
      %104 = arith.subf %103, %97 : vector<1x128xf32>
      %105 = arith.mulf %104, %102 : vector<1x128xf32>
      %106 = arith.mulf %97, %39 : vector<1x128xf32>
      %107 = arith.addf %105, %106 : vector<1x128xf32>
      %c0_65 = arith.constant 0 : index
      %c0_66 = arith.constant 0 : index
      %108 = vector.load %arg20[%c0_65, %c0_66] : memref<1x128xf32, #tpu.memory_space<vmem>>, vector<1x128xf32>
      tpu.vector_store %arg20[%c0_65, %c0_66], %107 {strides = array<i32>} : memref<1x128xf32, #tpu.memory_space<vmem>>, vector<1x128xf32>,
      %c0_67 = arith.constant 0 : index
      %c0_68 = arith.constant 0 : index
      %c0_69 = arith.constant 0 : index
      %109 = vector.load %arg17[%c0_67, %c0_68, %c0_69] : memref<1x1x128xf32, #tpu.memory_space<vmem>>, vector<1x1x128xf32>
      %110 = vector.shape_cast %109 : vector<1x1x128xf32> to vector<1x128xf32>
      %111 = vector.shape_cast %107 : vector<1x128xf32> to vector<1x1x128xf32>
      tpu.vector_store %arg17[%c0_67, %c0_68, %c0_69], %111 {strides = array<i32>} : memref<1x1x128xf32, #tpu.memory_space<vmem>>, vector<1x1x128xf32>,
      %cst_70 = arith.constant 0xFF800000 : f32
      %112 = vector.broadcast %cst_70 : f32 to vector<1x1xf32>
      %c0_71 = arith.constant 0 : index
      %c0_72 = arith.constant 0 : index
      %113 = vector.load %arg21[%c0_71, %c0_72] : memref<1x1xf32, #tpu.memory_space<vmem>>, vector<1x1xf32>
      tpu.vector_store %arg21[%c0_71, %c0_72], %112 {strides = array<i32>} : memref<1x1xf32, #tpu.memory_space<vmem>>, vector<1x1xf32>,
      %cst_73 = arith.constant 0.000000e+00 : f32
      %114 = vector.broadcast %cst_73 : f32 to vector<1x1xf32>
      %c0_74 = arith.constant 0 : index
      %c0_75 = arith.constant 0 : index
      %115 = vector.load %arg22[%c0_74, %c0_75] : memref<1x1xf32, #tpu.memory_space<vmem>>, vector<1x1xf32>
      tpu.vector_store %arg22[%c0_74, %c0_75], %114 {strides = array<i32>} : memref<1x1xf32, #tpu.memory_space<vmem>>, vector<1x1xf32>,
    } else {
    }
    %c0 = arith.constant 0 : index
    %c0_4 = arith.constant 0 : index
    %8 = vector.load %arg20[%c0, %c0_4] : memref<1x128xf32, #tpu.memory_space<vmem>>, vector<1x128xf32>
    %9 = arith.truncf %8 : vector<1x128xf32> to vector<1x128xbf16>
    %c0_5 = arith.constant 0 : index
    %c0_6 = arith.constant 0 : index
    %10 = vector.load %arg14[%c0_5, %c0_6] : memref<128x128xbf16, #tpu.memory_space<vmem>>, vector<128x128xbf16>
    %cst = arith.constant dense<0.000000e+00> : vector<1x128xf32>
    %11 = tpu.matmul %9, %10, %cst {dimension_numbers = #tpu.dot_dimension_numbers<[1], [0], [0], [1], [0, 0, 1, 1], [], []>} : vector<1x128xbf16>, vector<128x128xbf16>, vector<1x128xf32> -> vector<1x128xf32>
    %c0_7 = arith.constant 0 : index
    %c0_8 = arith.constant 0 : index
    %12 = vector.load %arg15[%c0_7, %c0_8] : memref<1x128xf32, #tpu.memory_space<vmem>>, vector<1x128xf32>
    %13 = arith.addf %11, %12 : vector<1x128xf32>
    %c0_9 = arith.constant 0 : index
    %c0_10 = arith.constant 0 : index
    %c0_11 = arith.constant 0 : index
    %14 = vector.load %arg16[%c0_9, %c0_10, %c0_11] : memref<1x1x128xf32, #tpu.memory_space<vmem>>, vector<1x1x128xf32>
    %15 = vector.shape_cast %14 : vector<1x1x128xf32> to vector<1x128xf32>
    %16 = vector.shape_cast %13 : vector<1x128xf32> to vector<1x1x128xf32>
    tpu.vector_store %arg16[%c0_9, %c0_10, %c0_11], %16 {strides = array<i32>} : memref<1x1x128xf32, #tpu.memory_space<vmem>>, vector<1x1x128xf32>,
    %c0_12 = arith.constant 0 : index
    %c0_13 = arith.constant 0 : index
    %17 = vector.load %arg21[%c0_12, %c0_13] : memref<1x1xf32, #tpu.memory_space<vmem>>, vector<1x1xf32>
    %cst_14 = arith.constant dense<0xFF800000> : vector<1xf32>
    %18 = vector.multi_reduction <maximumf>, %13, %cst_14 [1] : vector<1x128xf32> to vector<1xf32>
    %19 = vector.shape_cast %18 : vector<1xf32> to vector<1x1xf32>
    %20 = arith.maximumf %17, %19 : vector<1x1xf32>
    %c0_15 = arith.constant 0 : index
    %c0_16 = arith.constant 0 : index
    %21 = vector.load %arg22[%c0_15, %c0_16] : memref<1x1xf32, #tpu.memory_space<vmem>>, vector<1x1xf32>
    %22 = arith.subf %17, %20 : vector<1x1xf32>
    %23 = math.exp %22 : vector<1x1xf32>
    %24 = arith.mulf %21, %23 : vector<1x1xf32>
    %25 = vector.broadcast %20 : vector<1x1xf32> to vector<1x128xf32>
    %26 = arith.subf %13, %25 : vector<1x128xf32>
    %27 = math.exp %26 : vector<1x128xf32>
    %cst_17 = arith.constant dense<0.000000e+00> : vector<1xf32>
    %28 = vector.multi_reduction <add>, %27, %cst_17 [1] : vector<1x128xf32> to vector<1xf32>
    %29 = vector.shape_cast %28 : vector<1xf32> to vector<1x1xf32>
    %30 = arith.addf %24, %29 : vector<1x1xf32>
    %c0_18 = arith.constant 0 : index
    %c0_19 = arith.constant 0 : index
    %31 = vector.load %arg22[%c0_18, %c0_19] : memref<1x1xf32, #tpu.memory_space<vmem>>, vector<1x1xf32>
    tpu.vector_store %arg22[%c0_18, %c0_19], %30 {strides = array<i32>} : memref<1x1xf32, #tpu.memory_space<vmem>>, vector<1x1xf32>,
    %c0_20 = arith.constant 0 : index
    %c0_21 = arith.constant 0 : index
    %32 = vector.load %arg21[%c0_20, %c0_21] : memref<1x1xf32, #tpu.memory_space<vmem>>, vector<1x1xf32>
    tpu.vector_store %arg21[%c0_20, %c0_21], %20 {strides = array<i32>} : memref<1x1xf32, #tpu.memory_space<vmem>>, vector<1x1xf32>,
    %c1_i32 = arith.constant 1 : i32
    %33 = arith.cmpi eq, %arg1, %c1_i32 : i32
    %34 = arith.extui %33 : i1 to i32
    %c0_i32_22 = arith.constant 0 : i32
    %35 = arith.cmpi ne, %34, %c0_i32_22 : i32
    scf.if %35 {
      %c0_23 = arith.constant 0 : index
      %c0_24 = arith.constant 0 : index
      %36 = vector.load %arg21[%c0_23, %c0_24] : memref<1x1xf32, #tpu.memory_space<vmem>>, vector<1x1xf32>
      %c0_25 = arith.constant 0 : index
      %c0_26 = arith.constant 0 : index
      %37 = vector.load %arg22[%c0_25, %c0_26] : memref<1x1xf32, #tpu.memory_space<vmem>>, vector<1x1xf32>
      %38 = math.log %37 : vector<1x1xf32>
      %39 = arith.addf %36, %38 : vector<1x1xf32>
      %c0_27 = arith.constant 0 : index
      %c0_28 = arith.constant 0 : index
      %c0_29 = arith.constant 0 : index
      %40 = vector.load %arg19[%c0_27, %c0_28, %c0_29] : memref<1x1x1xf32, #tpu.memory_space<vmem>>, vector<1x1x1xf32>
      %41 = vector.shape_cast %40 : vector<1x1x1xf32> to vector<1x1xf32>
      %42 = vector.shape_cast %39 : vector<1x1xf32> to vector<1x1x1xf32>
      tpu.vector_store %arg19[%c0_27, %c0_28, %c0_29], %42 {strides = array<i32>} : memref<1x1x1xf32, #tpu.memory_space<vmem>>, vector<1x1x1xf32>,
    } else {
    }
    return
  }
  func.func @transform_0(%arg0: i32, %arg1: i32, %arg2: memref<6xi32, #tpu.memory_space<smem>>) -> (i32, i32, i32) {
    %0 = arith.index_cast %arg0 : i32 to index
    %1 = memref.load %arg2[%0] : memref<6xi32, #tpu.memory_space<smem>>
    %c0_i32 = arith.constant 0 : i32
    %c0_i32_0 = arith.constant 0 : i32
    %c0_i32_1 = arith.constant 0 : i32
    return %1, %c0_i32, %c0_i32_0 : i32, i32, i32
  }
  func.func @transform_1(%arg0: i32, %arg1: i32, %arg2: memref<6xi32, #tpu.memory_space<smem>>) -> (i32, i32) {
    %c0_i32 = arith.constant 0 : i32
    %c0_i32_0 = arith.constant 0 : i32
    %c0_i32_1 = arith.constant 0 : i32
    return %c0_i32, %c0_i32_0 : i32, i32
  }
  func.func @transform_2(%arg0: i32, %arg1: i32, %arg2: memref<6xi32, #tpu.memory_space<smem>>) -> (i32, i32) {
    %c0_i32 = arith.constant 0 : i32
    %c0_i32_0 = arith.constant 0 : i32
    %c0_i32_1 = arith.constant 0 : i32
    return %c0_i32, %c0_i32_0 : i32, i32
  }
  func.func @transform_3(%arg0: i32, %arg1: i32, %arg2: memref<6xi32, #tpu.memory_space<smem>>) -> (i32, i32) {
    %c0_i32 = arith.constant 0 : i32
    %c0_i32_0 = arith.constant 0 : i32
    %c0_i32_1 = arith.constant 0 : i32
    return %c0_i32, %c0_i32_0 : i32, i32
  }
  func.func @transform_4(%arg0: i32, %arg1: i32, %arg2: memref<6xi32, #tpu.memory_space<smem>>) -> (i32, i32) {
    %c0_i32 = arith.constant 0 : i32
    %c0_i32_0 = arith.constant 0 : i32
    %c0_i32_1 = arith.constant 0 : i32
    return %c0_i32, %c0_i32_0 : i32, i32
  }
  func.func @transform_5(%arg0: i32, %arg1: i32, %arg2: memref<6xi32, #tpu.memory_space<smem>>) -> (i32, i32) {
    %c0_i32 = arith.constant 0 : i32
    %c0_i32_0 = arith.constant 0 : i32
    %c0_i32_1 = arith.constant 0 : i32
    return %c0_i32, %c0_i32_0 : i32, i32
  }
  func.func @transform_6(%arg0: i32, %arg1: i32, %arg2: memref<6xi32, #tpu.memory_space<smem>>) -> (i32, i32) {
    %c0_i32 = arith.constant 0 : i32
    %c0_i32_0 = arith.constant 0 : i32
    %c0_i32_1 = arith.constant 0 : i32
    return %c0_i32, %c0_i32_0 : i32, i32
  }
  func.func @transform_7(%arg0: i32, %arg1: i32, %arg2: memref<6xi32, #tpu.memory_space<smem>>) -> (i32, i32) {
    %c0_i32 = arith.constant 0 : i32
    %c0_i32_0 = arith.constant 0 : i32
    %c0_i32_1 = arith.constant 0 : i32
    return %c0_i32, %c0_i32_0 : i32, i32
  }
  func.func @transform_8(%arg0: i32, %arg1: i32, %arg2: memref<6xi32, #tpu.memory_space<smem>>) -> (i32, i32) {
    %c0_i32 = arith.constant 0 : i32
    %c0_i32_0 = arith.constant 0 : i32
    %c0_i32_1 = arith.constant 0 : i32
    return %c0_i32, %c0_i32_0 : i32, i32
  }
  func.func @transform_9(%arg0: i32, %arg1: i32, %arg2: memref<6xi32, #tpu.memory_space<smem>>) -> (i32, i32) {
    %c0_i32 = arith.constant 0 : i32
    %c0_i32_0 = arith.constant 0 : i32
    %c0_i32_1 = arith.constant 0 : i32
    return %c0_i32, %c0_i32_0 : i32, i32
  }
  func.func @transform_10(%arg0: i32, %arg1: i32, %arg2: memref<6xi32, #tpu.memory_space<smem>>) -> (i32, i32) {
    %c0_i32 = arith.constant 0 : i32
    %c0_i32_0 = arith.constant 0 : i32
    %c0_i32_1 = arith.constant 0 : i32
    return %c0_i32, %c0_i32_0 : i32, i32
  }
  func.func @transform_11(%arg0: i32, %arg1: i32, %arg2: memref<6xi32, #tpu.memory_space<smem>>) -> (i32, i32) {
    %c0_i32 = arith.constant 0 : i32
    %c0_i32_0 = arith.constant 0 : i32
    return %c0_i32, %arg1 : i32, i32
  }
  func.func @transform_12(%arg0: i32, %arg1: i32, %arg2: memref<6xi32, #tpu.memory_space<smem>>) -> (i32, i32) {
    %c0_i32 = arith.constant 0 : i32
    %c0_i32_0 = arith.constant 0 : i32
    return %c0_i32, %arg1 : i32, i32
  }
  func.func @transform_13(%arg0: i32, %arg1: i32, %arg2: memref<6xi32, #tpu.memory_space<smem>>) -> (i32, i32, i32) {
    %c0_i32 = arith.constant 0 : i32
    %c0_i32_0 = arith.constant 0 : i32
    return %arg0, %c0_i32, %arg1 : i32, i32, i32
  }
  func.func @transform_14(%arg0: i32, %arg1: i32, %arg2: memref<6xi32, #tpu.memory_space<smem>>) -> (i32, i32, i32) {
    %c0_i32 = arith.constant 0 : i32
    %c0_i32_0 = arith.constant 0 : i32
    %c0_i32_1 = arith.constant 0 : i32
    return %arg0, %c0_i32, %c0_i32_0 : i32, i32, i32
  }
  func.func @transform_15(%arg0: i32, %arg1: i32, %arg2: memref<6xi32, #tpu.memory_space<smem>>) -> (i32, i32, i32) {
    %c0_i32 = arith.constant 0 : i32
    %c0_i32_0 = arith.constant 0 : i32
    %c0_i32_1 = arith.constant 0 : i32
    return %arg0, %c0_i32, %c0_i32_0 : i32, i32, i32
  }
  func.func @transform_16(%arg0: i32, %arg1: i32, %arg2: memref<6xi32, #tpu.memory_space<smem>>) -> (i32, i32, i32) {
    %c0_i32 = arith.constant 0 : i32
    %c0_i32_0 = arith.constant 0 : i32
    %c0_i32_1 = arith.constant 0 : i32
    return %arg0, %c0_i32, %c0_i32_0 : i32, i32, i32
  }
}

</mosaic_0001>

<bundles_post_ra>
// kernel: tpu_custom_call.1
= control target key start
LH: loop header
LB: loop body
LE: loop exit
PB: predicated region body
PF: predicated region fallthrough
CT: control target
= control target key end

     0   :  { %s3451_s27 = smov [#allocation6]   ;;  %s4083_s0 = inlined_call_operand.hbm [shape: s32[6], index: 0, kind: input, shape index: {}]   ;;  %s4084_s1 = inlined_call_operand.hbm [shape: f32[256,1,128], index: 1, kind: input, shape index: {}]   ;;  %s4085_s2 = inlined_call_operand.hbm [shape: f32[1,128], index: 2, kind: input, shape index: {}]   ;;  %s4086_s3 = inlined_call_operand.hbm [shape: bf16[128,128], index: 3, kind: input, shape index: {}]   ;;  %s4087_s4 = inlined_call_operand.hbm [shape: bf16[256,128], index: 4, kind: input, shape index: {}]   ;;  %s4088_s5 = inlined_call_operand.hbm [shape: f32[1,128], index: 5, kind: input, shape index: {}]   ;;  %s4089_s6 = inlined_call_operand.hbm [shape: bf16[256,128], index: 6, kind: input, shape index: {}]   ;;  %s4090_s7 = inlined_call_operand.hbm [shape: f32[1,128], index: 7, kind: input, shape index: {}]   ;;  %s4091_s8 = inlined_call_operand.hbm [shape: bf16[128,384], index: 8, kind: input, shape index: {}]   ;;  %s4092_s9 = inlined_call_operand.hbm [shape: bf16[128,384], index: 9, kind: input, shape index: {}]   ;;  %s4093_s10 = inlined_call_operand.vmem [shape: f32[1,384], index: 10, kind: input, shape index: {}]   ;;  %s4094_s11 = inlined_call_operand.vmem [shape: f32[1,384], index: 11, kind: input, shape index: {}]   ;;  %s4095_s12 = inlined_call_operand.hbm [shape: bf16[128,256], index: 12, kind: input, shape index: {}]   ;;  %s4096_s13 = inlined_call_operand.vmem [shape: f32[1,256], index: 13, kind: input, shape index: {}]   ;;  %s4097_s14 = inlined_call_operand.hbm [shape: f32[6,1,256], index: 14, kind: output, shape index: {0}]   ;;  %s4098_s15 = inlined_call_operand.hbm [shape: f32[6,1,128], index: 15, kind: output, shape index: {1}]   ;;  %s4099_s16 = inlined_call_operand.hbm [shape: f32[6,1,128], index: 16, kind: output, shape index: {2}]   ;;  %s4100_s17 = inlined_call_operand.vmem [shape: f32[6,1,1], index: 17, kind: output, shape index: {3}]  }
   0x1   :  { %4129 = sst [smem:[#allocation60_spill]] %s4083_s0 }
   0x2   :  { %4130 = sst [smem:[#allocation61_spill]] %s4084_s1 }
   0x3   :  { %4131 = sst [smem:[#allocation62_spill]] %s4085_s2 }
   0x4   :  { %4132 = sst [smem:[#allocation63_spill]] %s4086_s3 }
   0x5   :  { %4133 = sst [smem:[#allocation64_spill]] %s4087_s4 }
   0x6   :  { %4134 = sst [smem:[#allocation65_spill]] %s4088_s5 }
   0x7   :  { %4135 = sst [smem:[#allocation66_spill]] %s4089_s6 }
   0x8   :  { %4136 = sst [smem:[#allocation67_spill]] %s4090_s7 }
   0x9   :  { %4137 = sst [smem:[#allocation68_spill]] %s4091_s8 }
   0xa   :  { %4138 = sst [smem:[#allocation69_spill]] %s4092_s9 }
   0xb   :  { %4139 = sst [smem:[#allocation70_spill]] %s4093_s10 }
   0xc   :  { %4140 = sst [smem:[#allocation71_spill]] %s4094_s11 }
   0xd   :  { %4141 = sst [smem:[#allocation72_spill]] %s4095_s12 }
   0xe   :  { %4142 = sst [smem:[#allocation73_spill]] %s4096_s13 }
   0xf   :  { %4143 = sst [smem:[#allocation74_spill]] %s4097_s14 }
  0x10   :  { %4144 = sst [smem:[#allocation75_spill]] %s4098_s15 }
  0x11   :  { %4145 = sst [smem:[#allocation76_spill]] %s4099_s16 }
  0x12   :  { %4146 = sst [smem:[#allocation77_spill]] %s4100_s17 }
  0x13   :  { %s4147_s26 = sld [smem:[#allocation60_spill]] }
  0x19   :  { %s24_s10 = sshll.u32 %s4147_s26, 4  ;;  %s25_s10 = int_to_ptr.hbm [resolvable:$true] %s24_s10 }
  0x1a   :  { %27 = dma.hbm_to_smem %s25_s10, 16, %s3451_s27, [#allocation5] }
  0x1b   :  { %3349 = dma.done.wait [#allocation5], 16 }
  0x1c   :  { %3350 = vsyncadd [#allocation5], 4294967280 }
  0x1d   :  { %30 = sfence }
  0x1e   :  { %31 = vsyncpa [#allocation8], 0 }
  0x1f   :  { %33 = vsyncpa [#allocation8 + $0x1], 0 }
  0x20   :  { %34 = vsyncpa [#allocation11], 0 }
  0x21   :  { %35 = vsyncpa [#allocation14], 0 }
  0x22   :  { %36 = vsyncpa [#allocation17], 0 }
  0x23   :  { %37 = vsyncpa [#allocation20], 0 }
  0x24   :  { %38 = vsyncpa [#allocation23], 0 }
  0x25   :  { %40 = vsyncpa [#allocation23 + $0x1], 0 }
  0x26   :  { %41 = vsyncpa [#allocation9], 0 }
  0x27   :  { %43 = vsyncpa [#allocation9 + $0x1], 0 }
  0x28   :  { %44 = vsyncpa [#allocation26], 0 }
  0x29   :  { %46 = vsyncpa [#allocation26 + $0x1], 0  ;;  %s3561_s28 = smov 0   ;;  %s3563_s29 = smov 0  }
  0x2a   :  { %s3565_s10 = smov 0   ;;  %s3567_s0 = smov 0  }
  0x2b   :  { %s3569_s30 = smov 0   ;;  %s3571_s18 = smov 0  }
  0x2c   :  { %s3573_s19 = smov 0   ;;  %s3575_s1 = smov 0  }
  0x2d   :  { %s3577_s20 = smov 0   ;;  %s3579_s21 = smov 0  }
  0x2e   :  { %s3581_s22 = smov 0   ;;  %s3583_s23 = smov 0  }
  0x2f   :  { %s3585_s24 = smov 0   ;;  %s3587_s25 = smov 0  }
  0x30   :  { %s3589_s26 = smov 0   ;;  %s3591_s27 = smov 0  }
  0x31   :  { %s3593_s16 = smov 0  }
  0x32 LB: > { %4148 = sst [smem:[#allocation39_spill]] %s3385_s28  ;;  %s3647_s14 = sadd.s32 4294967295, %s3449_s16   ;;  %s3449_s16 = sphi %s3593_s16, %s52_s16   ;;  %s3445_s27 = sphi %s3591_s27, %s4252_s27   ;;  %s3441_s26 = sphi %s3589_s26, %s4251_s26   ;;  %s3437_s25 = sphi %s3587_s25, %s4250_s25   ;;  %s3433_s24 = sphi %s3585_s24, %s4257_s24   ;;  %s3429_s23 = sphi %s3583_s23, %s4248_s23   ;;  %s3425_s22 = sphi %s3581_s22, %s4256_s22   ;;  %s3421_s21 = sphi %s3579_s21, %s4255_s21   ;;  %s3417_s20 = sphi %s3577_s20, %s4246_s20   ;;  %s3413_s1 = sphi %s3575_s1, %s4254_s1   ;;  %s3409_s19 = sphi %s3573_s19, %s4253_s19   ;;  %s3405_s18 = sphi %s3571_s18, %s4244_s18   ;;  %s3401_s30 = sphi %s3569_s30, %s4243_s30   ;;  %s3397_s0 = sphi %s3567_s0, %s4242_s0   ;;  %s3393_s10 = sphi %s3565_s10, %s4241_s10   ;;  %s3389_s29 = sphi %s3563_s29, %s4240_s29   ;;  %s3385_s28 = sphi %s3561_s28, %s4239_s28  }
  0x33   : > { %4149 = sst [smem:[#allocation40_spill]] %s3389_s29  ;;  %p2096_p0 = scmp.ge.s32.totalorder %s3449_s16, 1 }
  0x34   : > { %4150 = sst [smem:[#allocation41_spill]] %s3393_s10  ;;  %p4116_p1 = scmp.eq.s32.totalorder %s3647_s14, 0 }
  0x35   : > { %4151 = sst [smem:[#allocation42_spill]] %s3397_s0  ;;  %p465_p2 = scmp.lt.s32.totalorder %s3449_s16, 13 }
  0x36   : > { %4152 = sst [smem:[#allocation43_spill]] %s3401_s30  ;;  %s3453_s15 = smov [#allocation13]  }
  0x37   : > { %4153 = sst [smem:[#allocation44_spill]] %s3405_s18  ;;  %p3655_p3 = pnand %p2096_p0, %p465_p2 }
  0x38   : > { %4154 = sst [smem:[#allocation45_spill]] %s3417_s20  ;;  %s4114_s0 = smov 64  }
  0x39   : > { %4155 = sst [smem:[#allocation46_spill]] %s3429_s23  ;;  %p2649_p4 = pneg %p3655_p3 }
  0x3a   : > { %4156 = sst [smem:[#allocation47_spill]] %s3433_s24  ;;  %s4115_s30 = smov 4  }
  0x3b   : > { %4157 = sst [smem:[#allocation48_spill]] %s3437_s25  ;;  %s3452_s25 = smov [#allocation10]  }
  0x3c   : > { %4158 = sst [smem:[#allocation49_spill]] %s3441_s26  ;;  %s479_s24 = sshll.u32 %s3452_s25, 4  ;;  %s480_s24 = int_to_ptr.vmem [resolvable:$true] %s479_s24 }
  0x3d   : > { %4159 = sst [smem:[#allocation50_spill]] %s3445_s27  ;;  %p3663_p5 = pnand %p2649_p4, %p4116_p1 }
  0x3e   : > { %4160 = sst [smem:[#allocation51_spill]] %s3449_s16  ;;  %s3462_s28 = smov [#allocation18]  }
  0x3f   : > { %s4161_s2 = sld [smem:[#allocation62_spill]]  ;;  %p80_p7 = scmp.ne.s32.totalorder %s3429_s23, %s3425_s22 }
  0x40   : > { %s4162_s13 = scalar_select %p3655_p3, 1, 0 }
  0x41   : > { %s4165_s4 = sld [smem:[#allocation64_spill]]  ;;  %p81_p8 = scmp.eq.s32.totalorder %s3449_s16, 0 }
  0x42   : > { %4163 = sst [smem:[#allocation52_spill]] %s4162_s13  ;;  %s3457_s13 = smov [#allocation19]  }
  0x43   : > { %s4166_s6 = sld [smem:[#allocation66_spill]]  ;;  %s556_s25 = sshll.u32 %s3457_s13, 4  ;;  %s557_s25 = int_to_ptr.vmem [resolvable:$true] %s556_s25 }
  0x44   : > { %s4167_s8 = sld [smem:[#allocation68_spill]]  ;;  %s64_s13 = sadd.s32 1, %s3445_s27 }
  0x45   : > { %s477_s17 = sshll.u32 %s4161_s2, 4  ;;  %s504_s2 = sshll.u32 %s3453_s15, 4  ;;  %s478_s17 = int_to_ptr.hbm [resolvable:$true] %s477_s17  ;;  %s505_s2 = int_to_ptr.vmem [resolvable:$true] %s504_s2 }
  0x46   : > { %2652 = dma.hbm_to_vmem [thread:$0]  (!%p3663_p5), %s478_s17, 16, %s480_s24, [#allocation11]  }
  0x47   : > { %s502_s11 = sshll.u32 %s4165_s4, 4  ;;  %s3456_s24 = smov [#allocation16]   ;;  %s503_s11 = int_to_ptr.hbm [resolvable:$true] %s502_s11 }
  0x48   : > { %2658 = dma.hbm_to_vmem [thread:$0]  (!%p3663_p5), %s503_s11, 2048, %s505_s2, [#allocation14], %s4114_s0, %s4114_s0, %s4115_s30  }
  0x49   : > { %s528_s10 = sshll.u32 %s4166_s6, 4  ;;  %s530_s15 = sshll.u32 %s3456_s24, 4  ;;  %s529_s10 = int_to_ptr.hbm [resolvable:$true] %s528_s10  ;;  %s531_s15 = int_to_ptr.vmem [resolvable:$true] %s530_s15 }
  0x4a   : > { %s554_s17 = sshll.u32 %s4167_s8, 4  ;;  %s3458_s4 = smov 192   ;;  %s555_s17 = int_to_ptr.hbm [resolvable:$true] %s554_s17 }
  0x4b   : > { %2664 = dma.hbm_to_vmem [thread:$0]  (!%p3663_p5), %s529_s10, 2048, %s531_s15, [#allocation17], %s4114_s0, %s4114_s0, %s4115_s30  }
  0x4c   : > { %s3459_s2 = smov 12   ;;  %s4168_s3 = sld [smem:[#allocation63_spill]] }
  0x4d   : > { %2670 = dma.hbm_to_vmem [thread:$0]  (!%p3663_p5), %s555_s17, 3072, %s557_s25, [#allocation20], %s3458_s4, %s3458_s4, %s3459_s2  }
  0x4e   : > { %s3460_s24 = smov [#allocation12]   ;;  %s4169_s5 = sld [smem:[#allocation65_spill]] }
  0x4f   : > { %s490_s6 = sshll.u32 %s3460_s24, 4  ;;  %s3461_s17 = smov [#allocation15]   ;;  %s491_s6 = int_to_ptr.vmem [resolvable:$true] %s490_s6 }
  0x50   : > { %s519_s15 = sshll.u32 %s3461_s17, 4  ;;  %s4170_s7 = sld [smem:[#allocation67_spill]]  ;;  %s520_s15 = int_to_ptr.vmem [resolvable:$true] %s519_s15 }
  0x51   : > { %s4171_s9 = sld [smem:[#allocation69_spill]]  ;;  %s3463_s24 = smov [#allocation21]  }
  0x52   : > { %s488_s29 = sshll.u32 %s4168_s3, 4  ;;  %s68_s25 = sld [smem:[#allocation6 + %s3445_s27]]  ;;  %s489_s29 = int_to_ptr.hbm [resolvable:$true] %s488_s29 }
  0x53   : > { %2655 = dma.hbm_to_vmem [thread:$0]  (!%p3663_p5), %s489_s29, 1024, %s491_s6, [#allocation11], %s4114_s0, %s4114_s0, %s4115_s30  }
  0x54   : > { %s517_s10 = sshll.u32 %s4169_s5, 4  ;;  %s545_s29 = sshll.u32 %s3462_s28, 4  ;;  %s518_s10 = int_to_ptr.hbm [resolvable:$true] %s517_s10  ;;  %s546_s29 = int_to_ptr.vmem [resolvable:$true] %s545_s29 }
  0x55   : > { %2661 = dma.hbm_to_vmem [thread:$0]  (!%p3663_p5), %s518_s10, 16, %s520_s15, [#allocation14]  }
  0x56   : > { %s543_s11 = sshll.u32 %s4170_s7, 4  ;;  %s570_s10 = sshll.u32 %s3463_s24, 4  ;;  %s544_s11 = int_to_ptr.hbm [resolvable:$true] %s543_s11  ;;  %s571_s10 = int_to_ptr.vmem [resolvable:$true] %s570_s10 }
  0x57   : > { %s568_s6 = sshll.u32 %s4171_s9, 4  ;;  %s61_s15 = sadd.s32 1, %s3441_s26  ;;  %s569_s6 = int_to_ptr.hbm [resolvable:$true] %s568_s6 }
  0x58   : > { %2667 = dma.hbm_to_vmem [thread:$0]  (!%p3663_p5), %s544_s11, 16, %s546_s29, [#allocation17]  }
  0x59   : > { %2673 = dma.hbm_to_vmem [thread:$0]  (!%p3663_p5), %s569_s6, 3072, %s571_s10, [#allocation20], %s3458_s4, %s3458_s4, %s3459_s2  }
  0x5a   : > { %p62_p6 = scmp.ge.s32.totalorder %s61_s15, 2  ;;  %s73_s11 = sadd.s32 1, %s3429_s23 }
  0x5b   : > { %s4173_s12 = sld [smem:[#allocation44_spill]]  ;;  %p86_p10 = scmp.ne.s32.totalorder %s3425_s22, %s3421_s21 }
  0x5c   : > { %s4259_s15 = smov (%p62_p6, %s61_s15), 0  ;;  %s4261_s13 = smov (!%p62_p6, %s64_s13), %s3445_s27 }
  0x5d   : > { %4172 = sst [smem:[#allocation53_spill]] %s4259_s15  ;;  %p66_p9 = scmp.ge.s32.totalorder %s4261_s13, 6 }
  0x5e   : > { %s4174_s4 = sld [smem:[#allocation43_spill]]  ;;  %p3728_p11 = por %p81_p8, %p80_p7 }
  0x5f   : > { %s306_s8 = ssub.s32 %s3441_s26, %s4259_s15  ;;  %s4263_s13 = smov (%p66_p9, %s4261_s13), 0 }
  0x60   : > { %4176 = sst [smem:[#allocation54_spill]] %s4263_s13  ;;  %p3738_p12 = por %p4116_p1, %p86_p10 }
  0x61   : > { %p307_p13 = scmp.eq.s32.totalorder %s306_s8, 0  ;;  %s69_s21 = sld [smem:[#allocation6 + %s4263_s13]] }
  0x62   : > { %s309_s6 = sadd.s32 1, %s3417_s20  ;;  %s4179_s29 = sld [smem:[#allocation42_spill]] }
  0x63   : > { %s3745_s28 = scalar_select %p307_p13, %s3417_s20, %s309_s6  }
  0x64   : > { %p316_p0 = scmp.ne.s32.totalorder %s3417_s20, %s3413_s1  ;;  %p322_p2 = scmp.ne.s32.totalorder %s3413_s1, %s3409_s19 }
  0x65   : > { %4178 = sst [smem:[#allocation55_spill]] %s3745_s28  ;;  %s358_s24 = ssub.s32 %s3445_s27, %s4263_s13 }
  0x66   : > { %s4180_s10 = sld [smem:[#allocation41_spill]]  ;;  %s363_s0 = sadd.s32 1, %s4173_s12 }
  0x67   : > { %s4181_s30 = sld [smem:[#allocation40_spill]]  ;;  %p3756_p4 = por %p316_p0, %p81_p8 }
  0x68   : > { %p3762_p5 = por %p322_p2, %p4116_p1  ;;  %s4184_s6 = sld [smem:[#allocation39_spill]] }
  0x69   : > { %s360_s5 = sor.u32 %s358_s24, %s306_s8  ;;  %p373_p6 = scmp.ne.s32.totalorder %s4173_s12, %s4174_s4 }
  0x6a   : > { %s4183_s3 = scalar_select %p3762_p5, 1, 0 }
  0x6b   : > { %s70_s19 = ssub.s32 %s68_s25, %s69_s21  ;;  %p361_p7 = scmp.eq.s32.totalorder %s360_s5, 0 }
  0x6c   : > { %p71_p9 = scmp.eq.s32.totalorder %s70_s19, 0  ;;  %p374_p10 = scmp.eq.s32.totalorder %s3647_s14, 11 }
  0x6d   : > { %s4265_s12 = smov (!%p361_p7, %s4173_s12), %s363_s0  ;;  %p379_p13 = scmp.ne.s32.totalorder %s4174_s4, %s4179_s29 }
  0x6e   : > { %4185 = sst [smem:[#allocation56_spill]] %s4265_s12  ;;  %p3775_p8 = por %p374_p10, %p373_p6 }
  0x6f   : > { %s3773_s7 = scalar_select %p71_p9, %s3429_s23, %s73_s11  }
  0x70   : > { %s4187_s9 = scalar_select %p3775_p8, 1, 0 }
  0x71   : > { %4186 = sst [smem:[#allocation57_spill]] %s3773_s7  ;;  %s4188_s8 = sadd.s32 4294967294, %s3449_s16  }
  0x72   : > { %p380_p0 = scmp.eq.s32.totalorder %s4188_s8, 11  ;;  %p387_p2 = scmp.eq.s32.totalorder %s358_s24, 0 }
  0x73   : > { %s389_s5 = sadd.s32 1, %s4180_s10  ;;  %p399_p1 = scmp.ne.s32.totalorder %s4180_s10, %s4181_s30 }
  0x74   : > { %p3786_p5 = por %p380_p0, %p379_p13  ;;  %p405_p7 = scmp.ne.s32.totalorder %s4181_s30, %s4184_s6 }
  0x75   : > { %s4267_s10 = smov (!%p387_p2, %s4180_s10), %s389_s5  ;;  %p3795_p6 = por %p399_p1, %p374_p10 }
  0x76   : > { %s4189_s25 = scalar_select %p3786_p5, 1, 0 }
  0x77   : > { %4191 = sst [smem:[#allocation58_spill]] %s4267_s10  ;;  %p3799_p9 = por %p405_p7, %p380_p0 }
  0x78   : > { %4190 = sst [smem:[#allocation39_spill]] %s4189_s25  ;;  %p2701_p8 = scmp.lt.s32.totalorder %s3449_s16, 12 }
  0x79   : > { %s4193_s11 = scalar_select %p3799_p9, 1, 0 }
  0x7a   : > { %s590_s4 = sand.u32 1, %s3429_s23   ;;  %p3812_p13 = pnand %p2701_p8, %p3728_p11 }
  0x7b   : > { %4194 = sst [smem:[#allocation59_spill]] %s4193_s11  ;;  %s593_s30 = scalar_lea.vmem [#allocation7], %s590_s4 }
  0x7c   : > { %s2621_s21 = scalar_select %p3728_p11, [#allocation6], [#allocation28] }
  0x7d   : > { %s2622_s29 = scalar_select %p3728_p11, %s3445_s27, 0 }
  0x7e   : > { %s4269_s21 = smov (!%p2701_p8, %s2621_s21), [#allocation29]  ;;  %s601_s24 = sshll.u32 %s593_s30, 4  ;;  %s3816_s24 = int_to_ptr.vmem [resolvable:$true] %s601_s24 }
  0x7f   : > { %s4271_s29 = smov (!%p2701_p8, %s2622_s29), 0  ;;  %p3820_p1 = pnand %p2701_p8, %p3756_p4 }
  0x80   : > { %s594_s19 = sld [smem:[%s4269_s21 + %s4271_s29]]  ;;  %s608_s5 = sand.u32 1, %s3417_s20  }
  0x81   : > { %s2107_s13 = sshll.u32 %s3441_s26, 2  ;;  %s2106_s15 = sshll.u32 %s608_s5, 6 }
  0x82   : > { %s4197_s30 = sld [smem:[#allocation72_spill]]  ;;  %s612_s17 = scalar_lea.vmem [#allocation22], %s2106_s15 }
  0x83   : > { %s4198_s10 = sld [smem:[#allocation61_spill]]  ;;  %s619_s25 = sshll.u32 %s612_s17, 4  ;;  %s620_s25 = int_to_ptr.vmem [resolvable:$true] %s619_s25 }
  0x84   : > { %s591_s16 = scalar_lea.sflag [#allocation8], %s590_s4  ;;  %p3141_p4 = pneg %p3812_p13 }
  0x88   : > { %s616_s2 = scalar_lea.hbm %s4197_s30, %s2107_s13 }
  0x89   : > { %s617_s23 = sshll.u32 %s616_s2, 4  ;;  %s4199_s11 = smov %s4198_s10  ;;  %s618_s23 = int_to_ptr.hbm [resolvable:$true] %s617_s23 }
  0x8a   : > { %s597_s21 = scalar_lea.hbm %s4198_s10, %s594_s19  ;;  %s3144_s13 = scalar_lea.hbm %s4199_s11, 256 }
  0x8b   : > { %s599_s29 = sshll.u32 %s597_s21, 4  ;;  %s600_s29 = int_to_ptr.hbm [resolvable:$true] %s599_s29 }
  0x8c   : > { %s3137_s20 = sshra.s32 %s600_s29, 4  ;;  %s3138_s20 = int_to_ptr.hbm [resolvable:$true] %s3137_s20 }
  0x8d   : > { %s3139_s26 = scalar_lea.hbm %s3138_s20, 1  ;;  %p3145_p0 = scmp.lt.s32.totalorder %s3138_s20, %s4199_s11 }
  0x8e   : > { %p3140_p11 = scmp.ne.s32.totalorder %s3138_s20, %s3139_s26  ;;  %p3146_p2 = scmp.lt.s32.totalorder %s3144_s13, %s3139_s26 }
  0x90   : > { %p3142_p10 = pnand %p3141_p4, %p3140_p11  ;;  %p3147_p7 = por %p3146_p2, %p3145_p0 }
  0x92   : > { %p3143_p8 = pneg %p3142_p10 }
  0x94   : > { %p3148_p9 = pnand %p3147_p7, %p3143_p8 }
  0x96   : > { %3151 = shalt.err (!%p3148_p9)
}
  0x97   : > { %2679 = dma.hbm_to_vmem [thread:$0]  (!%p3812_p13), %s600_s29, 16, %s3816_s24, %s591_s16  }
  0x98   : > { %s609_s15 = scalar_lea.sflag [#allocation23], %s608_s5  ;;  %s3464_s10 = smov 128  }
  0x99   : > { %s4200_s4 = smov 4   ;;  %s4201_s19 = smov 64  }
  0x9a   : > { %2682 = dma.hbm_to_vmem [thread:$0]  (!%p3820_p1), %s618_s23, 1024, %s620_s25, %s609_s15, %s3464_s10, %s4201_s19, %s4200_s4  }
  0x9b   : > { %637 = sbr.rel (%p3655_p3) target bundleno = 1698 (0x6a2), region = 72  ;;  %s639_s20 = sand.u32 (!%p3655_p3), 1, %s3425_s22  }
  0x9c   : > { %s640_s26 = scalar_lea.sflag (!%p3655_p3), [#allocation8], %s639_s20  ;;  %s3850_s2 = scalar_lea.vmem (!%p3655_p3), [#allocation7], %s639_s20 }
  0xa0   : > { %3352 = dma.done.wait (%p3738_p12), %s640_s26, 16  }
  0xa1   : > { %3354 = vsyncadd (%p3738_p12), %s640_s26, 4294967280  ;;  %p4203_p9 = scmp.eq.s32.totalorder %s3647_s14, 0 }
  0xa3   : > { %3356 = dma.done.wait (%p4203_p9), [#allocation11], 1040   ;;  %p4204_p13 = pmov %p4203_p9 }
  0xa4   : > { %p4205_p1 = pmov %p4203_p9 }
  0xa5   : > { %3358 = vsyncadd (%p4204_p13), [#allocation11], 4294966256 }
  0xa6   : > { %3360 = dma.done.wait (%p4205_p1), [#allocation14], 2064   ;;  %p4206_p3 = pmov %p4205_p1 }
  0xa7   : > { %p4207_p11 = pmov %p4205_p1 }
  0xa8   : > { %3362 = vsyncadd (%p4206_p3), [#allocation14], 4294965232 }
  0xa9   : > { %3364 = dma.done.wait (%p4207_p11), [#allocation17], 2064   ;;  %p4208_p4 = pmov %p4205_p1 }
  0xaa   : > { %p4209_p12 = pmov %p4205_p1 }
  0xab   : > { %3366 = vsyncadd (%p4208_p4), [#allocation17], 4294965232 }
  0xac   : > { %3368 = dma.done.wait (%p4209_p12), [#allocation20], 6144   ;;  %p4210_p10 = pmov %p4205_p1 }
  0xad   : > { %s688_s16 = sand.u32 1, %s3413_s1   ;;  %p4211_p8 = scmp.ne.s32.totalorder %s4183_s3, 0 }
  0xae   : > { %3370 = vsyncadd (%p4210_p10), [#allocation20], 4294961152  ;;  %s2117_s23 = sshll.u32 %s688_s16, 6  ;;  %s689_s18 = scalar_lea.sflag [#allocation23], %s688_s16 }
  0xaf   : > { %s3873_s25 = scalar_lea.vmem [#allocation22], %s2117_s23 }
  0xb0   : > { %3372 = dma.done.wait (%p4211_p8), %s689_s18, 1024  }
  0xb1   : > { %3374 = vsyncadd (%p4211_p8), %s689_s18, 4294966272  ;;  %s4212_s24 = sld [smem:[#allocation43_spill]] }
  0xb2   : > { %s4213_s6 = sld [smem:[#allocation40_spill]] }
  0xb3   : > { %s4214_s8 = sld [smem:[#allocation47_spill]] }
  0xb4   : > { %s4215_s5 = sld [smem:[#allocation48_spill]] }
  0xb5   : > { %s4216_s27 = sld [smem:[#allocation73_spill]] }
  0xb6   : > { %s4217_s15 = sld [smem:[#allocation77_spill]] }
  0xb7   : > { %s740_s21 = sand.u32 1, %s4212_s24  }
  0xb8   : > { %s746_s29 = sand.u32 1, %s4213_s6   ;;  %s3901_s4 = scalar_lea.vmem [#allocation24], %s740_s21 }
  0xb9   : > { %p760_p0 = scmp.lt.s32.totalorder %s4214_s8, 1  ;;  %p767_p9 = scmp.eq.s32.totalorder %s4214_s8, 0 }
  0xba   : > { %p763_p2 = scmp.lt.s32.totalorder %s4215_s5, 5  ;;  %p766_p7 = scmp.eq.s32.totalorder %s4215_s5, 0 }
  0xbb   : > { %s3885_s17 = scalar_select %p760_p0, %s4214_s8, 1 }
  0xbc   : > { %s4273_s5 = smov (!%p763_p2, %s4215_s5), 5  ;;  %p768_p13 = pnand %p767_p9, %p766_p7 }
  0xbd   : > { %s762_s13 = scalar_lea.vmem %s4216_s27, %s3885_s17  ;;  %s765_s10 = scalar_lea.vmem %s4217_s15, %s4273_s5 }
  0xbe   : > { %s3903_s19 = scalar_lea.vmem [#allocation25], %s746_s29  ;;  %s3905_s30 = scalar_lea.vmem [#allocation27], %s746_s29 }
  0xbf   : > { %771 = sbr.rel (%p768_p13) target bundleno = 198 (0xc6), region = 116 }
  0xc4   : > { %v772_v0 = vld [vmem:[#allocation10] sm:$0x1] }
  0xc5   : > { %773 = vst [vmem:[#allocation2] sm:$0x1] %v772_v0 }
  0xc6 PF: > { %s4218_s20 = sld [smem:[#allocation47_spill]] }
  0xcc   : > { %p2118_p1 = scmp.ne.s32.totalorder %s4218_s20, 0 }
  0xcd   : > { %s4219_s16 = sld [smem:[#allocation71_spill]] (!%p2118_p1) }
  0xce   : > { %776 = sbr.rel (%p2118_p1) target bundleno = 1096 (0x448), region = 120  ;;  %s4220_s24 = sld [smem:[#allocation70_spill]] (!%p2118_p1) }
  0xd3   : > { %v2524_v1 = vld [vmem:[#allocation13 + $0x78] sm:$0xff]  ;;  %v2523_v3 = vld [vmem:[#allocation13 + $0x70] sm:$0xff]  ;;  %v2522_v5 = vld [vmem:[#allocation13 + $0x68] sm:$0xff]  ;;  %vm937_vm0 = vcmask 1040384   ;;  %vm1663_vm5 = vcmask 0  }
  0xd4   : > { %v2516_v2 = vld [vmem:[#allocation13 + $0x38] sm:$0xff]  ;;  %861 = vmatpush.bf16.msra.mxu0 %v2524_v1  ;;  %v2515_v4 = vld [vmem:[#allocation13 + $0x30] sm:$0xff]  ;;  %v2514_v6 = vld [vmem:[#allocation13 + $0x28] sm:$0xff] }
  0xd5   : > { %922 = vmatpush.bf16.msra.mxu1 %v2516_v2  ;;  %v2521_v7 = vld [vmem:[#allocation13 + $0x60] sm:$0xff]  ;;  %v2520_v9 = vld [vmem:[#allocation13 + $0x58] sm:$0xff]  ;;  %v2519_v11 = vld [vmem:[#allocation13 + $0x50] sm:$0xff] }
  0xd6   : > { %v2513_v8 = vld [vmem:[#allocation13 + $0x20] sm:$0xff]  ;;  %v2512_v10 = vld [vmem:[#allocation13 + $0x18] sm:$0xff]  ;;  %v2511_v12 = vld [vmem:[#allocation13 + $0x10] sm:$0xff] }
  0xd7   : > { %v2518_v13 = vld [vmem:[#allocation13 + $0x48] sm:$0xff]  ;;  %v2517_v15 = vld [vmem:[#allocation13 + $0x40] sm:$0xff]  ;;  %v3908_v17 = vld [vmem:[#allocation2] sm:$0x1] }
  0xd8   : > { %862 = vmatpush.bf16.msra.mxu0 %v2523_v3  ;;  %v2510_v14 = vld [vmem:[#allocation13 + $0x8] sm:$0xff]  ;;  %v2509_v16 = vld [vmem:[#allocation13] sm:$0xff]  ;;  %v777_v18 = vld [vmem:[%s3850_s2] sm:$0x1]  ;;  %v3913_v19 = vpack.c.bf16 %v3908_v17, %v3908_v17 }
  0xd9   : > { %923 = vmatpush.bf16.msra.mxu1 %v2515_v4  ;;  %v3915_v20 = vpack.c.bf16 %v777_v18, %v777_v18  ;;  %v935_v23 = vld [vmem:[#allocation15] sm:$0x1]  ;;  %v2532_v29 = vld [vmem:[#allocation12 + $0x38] sm:$0xff]  ;;  %v2531_v30 = vld [vmem:[#allocation12 + $0x30] sm:$0xff] }
  0xda   : > { %1028 = vmatpush.bf16.msra.mxu2 %v2532_v29  ;;  %v2530_v31 = vld [vmem:[#allocation12 + $0x28] sm:$0xff]  ;;  %v2529_v37 = vld [vmem:[#allocation12 + $0x20] sm:$0xff]  ;;  %v2528_v38 = vld [vmem:[#allocation12 + $0x18] sm:$0xff] }
  0xdb   : > { %v2527_v39 = vld [vmem:[#allocation12 + $0x10] sm:$0xff]  ;;  %v2526_v40 = vld [vmem:[#allocation12 + $0x8] sm:$0xff]  ;;  %v2525_v41 = vld [vmem:[#allocation12] sm:$0xff] }
  0xdc   : > { %863 = vmatpush.bf16.msra.mxu0 %v2522_v5  ;;  %v2540_v42 = vld [vmem:[#allocation16 + $0x38] sm:$0xff]  ;;  %v2539_v44 = vld [vmem:[#allocation16 + $0x30] sm:$0xff]  ;;  %v2538_v46 = vld [vmem:[#allocation16 + $0x28] sm:$0xff] }
  0xdd   : > { %924 = vmatpush.bf16.msra.mxu1 %v2514_v6  ;;  %v2548_v43 = vld [vmem:[#allocation16 + $0x78] sm:$0xff]  ;;  %v2547_v45 = vld [vmem:[#allocation16 + $0x70] sm:$0xff]  ;;  %v2546_v47 = vld [vmem:[#allocation16 + $0x68] sm:$0xff] }
  0xde   : > { %1029 = vmatpush.bf16.msra.mxu2 %v2531_v30  ;;  %1122 = vmatpush.bf16.msra.mxu3 %v2548_v43  ;;  %v2537_v49 = vld [vmem:[#allocation16 + $0x20] sm:$0xff]  ;;  %v2536_v51 = vld [vmem:[#allocation16 + $0x18] sm:$0xff]  ;;  %v2535_v55 = vld [vmem:[#allocation16 + $0x10] sm:$0xff] }
  0xdf   : > { %v2545_v50 = vld [vmem:[#allocation16 + $0x60] sm:$0xff]  ;;  %v2544_v52 = vld [vmem:[#allocation16 + $0x58] sm:$0xff]  ;;  %v2543_v56 = vld [vmem:[#allocation16 + $0x50] sm:$0xff] }
  0xe0   : > { %864 = vmatpush.bf16.msra.mxu0 %v2521_v7  ;;  %v2534_v61 = vld [vmem:[#allocation16 + $0x8] sm:$0xff]  ;;  %v2533_v2 = vld [vmem:[#allocation16] sm:$0xff]  ;;  %v2341_v18 = vld [vmem:[#allocation19 + $0x78] sm:$0xf] }
  0xe1   : > { %925 = vmatpush.bf16.msra.mxu1 %v2513_v8  ;;  %v2542_v62 = vld [vmem:[#allocation16 + $0x48] sm:$0xff]  ;;  %v2541_v6 = vld [vmem:[#allocation16 + $0x40] sm:$0xff]  ;;  %v2571_v8 = vld [vmem:[#allocation19 + $0xb0] sm:$0xf0] }
  0xe2   : > { %1030 = vmatpush.bf16.msra.mxu2 %v2530_v31  ;;  %1123 = vmatpush.bf16.msra.mxu3 %v2547_v45  ;;  %v2365_v7 = vld [vmem:[#allocation19 + $0xa8] sm:$0xf]  ;;  %v2449_v31 = vld [vmem:[#allocation21 + $0x90] sm:$0xf]  ;;  %v2437_v43 = vld [vmem:[#allocation21 + $0x78] sm:$0xf] }
  0xe3   : > { %v2343_v29 = vld [vmem:[#allocation19 + $0x84] sm:$0xf0]  ;;  %v2349_v45 = vld [vmem:[#allocation19 + $0x80] sm:$0xf] }
  0xe4   : > { %865 = vmatpush.bf16.msra.mxu0 %v2520_v9  ;;  %v2353_v9 = vld [vmem:[#allocation19 + $0x90] sm:$0xf] }
  0xe5   : > { %926 = vmatpush.bf16.msra.mxu1 %v2512_v10  ;;  %v2366_v10 = vor.u32 %v2571_v8, %v2365_v7 }
  0xe6   : > { %1031 = vmatpush.bf16.msra.mxu2 %v2529_v37  ;;  %1124 = vmatpush.bf16.msra.mxu3 %v2546_v47  ;;  %v2562_v37 = vld [vmem:[#allocation19 + $0x68] sm:$0xf0] }
  0xe8   : > { %866 = vmatpush.bf16.msra.mxu0 %v2519_v11  ;;  %v2568_v11 = vld [vmem:[#allocation19 + $0x98] sm:$0xf0] }
  0xe9   : > { %927 = vmatpush.bf16.msra.mxu1 %v2511_v12  ;;  %v2570_v12 = vld [vmem:[#allocation19 + $0xac] sm:$0xf] }
  0xea   : > { %1032 = vmatpush.bf16.msra.mxu2 %v2528_v38  ;;  %1125 = vmatpush.bf16.msra.mxu3 %v2545_v50 }
  0xec   : > { %867 = vmatpush.bf16.msra.mxu0 %v2518_v13  ;;  %v2367_v13 = vld [vmem:[#allocation19 + $0xb4] sm:$0xf0] }
  0xed   : > { %928 = vmatpush.bf16.msra.mxu1 %v2510_v14  ;;  %v2370_v14 = vor.u32 %v2570_v12, %v2367_v13 }
  0xee   : > { %1033 = vmatpush.bf16.msra.mxu2 %v2527_v39  ;;  %1126 = vmatpush.bf16.msra.mxu3 %v2544_v52 }
  0xf0   : > { %868 = vmatpush.bf16.msra.mxu0 %v2517_v15  ;;  %v2567_v15 = vld [vmem:[#allocation19 + $0x94] sm:$0xf] }
  0xf1   : > { %929 = vmatpush.bf16.msra.mxu1 %v2509_v16  ;;  %v2354_v16 = vor.u32 %v2568_v11, %v2353_v9  ;;  %v2553_v11 = vld [vmem:[#allocation19 + $0x20] sm:$0xf0] }
  0xf2   : > { %1034 = vmatpush.bf16.msra.mxu2 %v2526_v40  ;;  %1127 = vmatpush.bf16.msra.mxu3 %v2543_v56  ;;  %v2319_v56 = vld [vmem:[#allocation19 + $0x54] sm:$0xf0] }
  0xf3   : > { %869 = vmatmul.bf16.vlgmr.msra.gmra.mxu0 %v3913_v19 }
  0xf4   : > { %930 = vmatmul.bf16.vlgmr.msra.gmra.mxu1 %v3915_v20  ;;  %1183 = vmatpush.bf16.msrb.mxu0 %v2540_v42  ;;  %v2331_v42 = vld [vmem:[#allocation19 + $0x6c] sm:$0xf0] }
  0xf5   : > { %1368 = vmatpush.bf16.msrb.mxu1 %v2366_v10  ;;  %v2293_v10 = vld [vmem:[#allocation19 + $0x18] sm:$0xf] }
  0xf6   : > { %1035 = vmatpush.bf16.msra.mxu2 %v2525_v41  ;;  %1128 = vmatpush.bf16.msra.mxu3 %v2542_v62  ;;  %v2561_v41 = vld [vmem:[#allocation19 + $0x64] sm:$0xf] }
  0xf8   : > { %1184 = vmatpush.bf16.msrb.mxu0 %v2539_v44  ;;  %v2589_v44 = vld [vmem:[#allocation21 + $0x80] sm:$0xf0] }
  0xf9   : > { %1369 = vmatpush.bf16.msrb.mxu1 %v2354_v16  ;;  %v2438_v50 = vor.u32 %v2589_v44, %v2437_v43  ;;  %v2401_v16 = vld [vmem:[#allocation21 + $0x30] sm:$0xf]  ;;  %v2577_v43 = vld [vmem:[#allocation21 + $0x20] sm:$0xf0] }
  0xfa   : > { %1129 = vmatpush.bf16.msra.mxu3 %v2541_v6  ;;  %1381 = vmatpush.bf16.msrb.mxu2 %v2370_v14  ;;  %v2560_v6 = vld [vmem:[#allocation19 + $0x58] sm:$0xf0]  ;;  %v2469_v44 = vld [vmem:[#allocation21 + $0xb0] sm:$0xf] }
  0xfb   : > { %v2552_v14 = vld [vmem:[#allocation19 + $0x1c] sm:$0xf] }
  0xfc   : > { %1185 = vmatpush.bf16.msrb.mxu0 %v2538_v46  ;;  %v2566_v46 = vld [vmem:[#allocation19 + $0x88] sm:$0xf0] }
  0xfd   : > { %v2350_v52 = vor.u32 %v2566_v46, %v2349_v45  ;;  %v2596_v46 = vld [vmem:[#allocation21 + $0xb8] sm:$0xf0] }
 0x100   : > { %1186 = vmatpush.bf16.msrb.mxu0 %v2537_v49  ;;  %v2559_v49 = vld [vmem:[#allocation19 + $0x50] sm:$0xf0] }
 0x104   : > { %1187 = vmatpush.bf16.msrb.mxu0 %v2536_v51  ;;  %v2334_v51 = vor.u32 %v2561_v41, %v2331_v42  ;;  %v2389_v42 = vld [vmem:[#allocation21 + $0x18] sm:$0xf] }
 0x105   : > { %v2390_v45 = vor.u32 %v2577_v43, %v2389_v42 }
 0x108   : > { %1188 = vmatpush.bf16.msrb.mxu0 %v2535_v55  ;;  %v2586_v55 = vld [vmem:[#allocation21 + $0x68] sm:$0xf0] }
 0x10c   : > { %1189 = vmatpush.bf16.msrb.mxu0 %v2534_v61  ;;  %v2556_v61 = vld [vmem:[#allocation19 + $0x38] sm:$0xf0] }
 0x110   : > { %1190 = vmatpush.bf16.msrb.mxu0 %v2533_v2  ;;  %v2413_v2 = vld [vmem:[#allocation21 + $0x48] sm:$0xf] }
 0x113   : > { %1191 = vmatmul.bf16.vlgmr.msrb.gmra.mxu0 %v3915_v20  ;;  %v2595_v20 = vld [vmem:[#allocation21 + $0xb0] sm:$0xf0] }
 0x170   : > { %v870_v21 = vpop.f32.mrf.mxu0 }
 0x171   : > { %v931_v22 = vpop.f32.mrf.mxu1 }
 0x172   : > { %v932_v24 = vadd.f32 %v931_v22, %v870_v21  ;;  %v2565_v21 = vld [vmem:[#allocation19 + $0x80] sm:$0xf0]  ;;  %v2355_v22 = vld [vmem:[#allocation19 + $0x9c] sm:$0xf0] }
 0x174   : > { %v936_v25 = vadd.f32 %v935_v23, %v932_v24  ;;  %v2358_v23 = vor.u32 %v2567_v15, %v2355_v22  ;;  %v2461_v24 = vld [vmem:[#allocation21 + $0xa8] sm:$0xf]  ;;  %v2557_v22 = vld [vmem:[#allocation19 + $0x40] sm:$0xf0] }
 0x175   : > { %v2295_v15 = vld [vmem:[#allocation19 + $0x24] sm:$0xf0] }
 0x176   : > { %v938_v26 = vsel %vm937_vm0, %v936_v25, -inf  ;;  %1382 = vmatpush.bf16.msrb.mxu2 %v2358_v23  ;;  %v2294_v23 = vor.u32 %v2553_v11, %v2293_v10  ;;  %v2587_v10 = vld [vmem:[#allocation21 + $0x70] sm:$0xf0] }
 0x177   : > { %939 = vmax.xlane.f32.xlu0 %v938_v26  ;;  %v2462_v26 = vor.u32 %v2595_v20, %v2461_v24  ;;  %v2281_v20 = vld [vmem:[#allocation19] sm:$0xf]  ;;  %v2579_v11 = vld [vmem:[#allocation21 + $0x34] sm:$0xf] }
 0x178   : > { %v872_v27 = vpop.f32.mrf.mxu0 }
 0x179   : > { %v933_v28 = vpop.f32.mrf.mxu1  ;;  %v2572_v27 = vld [vmem:[#allocation19 + $0xb8] sm:$0xf0]  ;;  %1575 = vmatpush.bf16.msra.mxu0 %v2462_v26  ;;  %v2298_v26 = vor.u32 %v2552_v14, %v2295_v15  ;;  %v2421_v14 = vld [vmem:[#allocation21 + $0x50] sm:$0xf] }
 0x17a   : > { %v2564_v28 = vld [vmem:[#allocation19 + $0x7c] sm:$0xf] }
 0x17b   : > { %v2346_v38 = vor.u32 %v2564_v28, %v2343_v29  ;;  %v2594_v29 = vld [vmem:[#allocation21 + $0xac] sm:$0xf]  ;;  %v2584_v15 = vld [vmem:[#allocation21 + $0x58] sm:$0xf0] }
 0x17d   : > { %1383 = vmatpush.bf16.msrb.mxu2 %v2346_v38 }
 0x181   : > { %1384 = vmatpush.bf16.msrb.mxu2 %v2334_v51  ;;  %v2588_v51 = vld [vmem:[#allocation21 + $0x7c] sm:$0xf] }
 0x190   : > { %v3923_v8 = vpop.f32.mrf.mxu0 }
 0x1ea   : > { %v940_v32 = vpop.xlane.xlu0 %939 }
 0x1eb   : > { %v941_v33 = vsub.f32 %v936_v25, %v940_v32  ;;  %v2373_v25 = vld [vmem:[#allocation19 + $0xb0] sm:$0xf]  ;;  %v2342_v32 = vor.u32 %v2565_v21, %v2341_v18  ;;  %v2580_v18 = vld [vmem:[#allocation21 + $0x38] sm:$0xf0]  ;;  %v2313_v21 = vld [vmem:[#allocation19 + $0x38] sm:$0xf] }
 0x1ec   : > { %v2374_v30 = vor.u32 %v2572_v27, %v2373_v25  ;;  %v2550_v25 = vld [vmem:[#allocation19 + $0x8] sm:$0xf0]  ;;  %v2402_v27 = vor.u32 %v2580_v18, %v2401_v16  ;;  %v2576_v18 = vld [vmem:[#allocation21 + $0x1c] sm:$0xf] }
 0x1ed   : > { %v942_v34 = vmul.f32 1.442695, %v941_v33  ;;  %v2592_v33 = vld [vmem:[#allocation21 + $0x98] sm:$0xf0]  ;;  %1370 = vmatpush.bf16.msrb.mxu1 %v2342_v32  ;;  %v2282_v32 = vor.u32 %v2550_v25, %v2281_v20  ;;  %v2581_v20 = vld [vmem:[#allocation21 + $0x40] sm:$0xf0] }
 0x1ee   : > { %1394 = vmatpush.bf16.msrb.mxu3 %v2374_v30  ;;  %v2450_v39 = vor.u32 %v2592_v33, %v2449_v31  ;;  %v2463_v30 = vld [vmem:[#allocation21 + $0xb4] sm:$0xf0]  ;;  %v2314_v31 = vor.u32 %v2557_v22, %v2313_v21  ;;  %v1194_v33 = vpop.f32.mrf.mxu0  ;;  %v2391_v21 = vld [vmem:[#allocation21 + $0x24] sm:$0xf0]  ;;  %v2422_v22 = vor.u32 %v2584_v15, %v2421_v14  ;;  %v2573_v25 = vld [vmem:[#allocation21 + $0x4] sm:$0xf] }
 0x1ef   : > { %2864 = vpow2.f32 %v942_v34  ;;  %v2361_v34 = vld [vmem:[#allocation19 + $0x98] sm:$0xf]  ;;  %v2575_v33 = vld [vmem:[#allocation21 + $0x10] sm:$0xf0] }
 0x1f0   : > { %1576 = vmatpush.bf16.msra.mxu0 %v2450_v39  ;;  %v2549_v39 = vld [vmem:[#allocation19 + $0x4] sm:$0xf] }
 0x1f4   : > { %1577 = vmatpush.bf16.msra.mxu0 %v2438_v50 }
 0x1f5   : > { %v2865_v35 = vpop.eup %2864 }
 0x1f6   : > { %v944_v36 = vsel %vm937_vm0, %v2865_v35, 0.0 }
 0x1f7   : > { %945 = vadd.xlane.f32.xlu0 %v944_v36  ;;  %v2329_v36 = vld [vmem:[#allocation19 + $0x60] sm:$0xf] }
 0x1f8   : > { %v2330_v47 = vor.u32 %v2562_v37, %v2329_v36  ;;  %v2451_v36 = vld [vmem:[#allocation21 + $0x9c] sm:$0xf0] }
 0x1fa   : > { %1371 = vmatpush.bf16.msrb.mxu1 %v2330_v47  ;;  %v2301_v47 = vld [vmem:[#allocation19 + $0x20] sm:$0xf] }
 0x26a   : > { %v946_v48 = vpop.xlane.xlu0 %945 }
 0x26b   : > { %2866 = vrcp.f32 %v946_v48  ;;  %v958_v58 = vand.u32 2147483648, %v946_v48  ;;  %v956_v60 = vand.u32 2147483647, %v946_v48  ;;  %vm952_vm2 = vweird.f32 %v946_v48 }
 0x26d   : > { %v959_v0 = vor.u32 1.1754944e-38, %v958_v58  ;;  %vm957_vm4 = vcmp.eq.f32.partialorder %v956_v60, 8.507059e+37  ;;  %v2563_v58 = vld [vmem:[#allocation19 + $0x70] sm:$0xf0]  ;;  %v2305_v60 = vld [vmem:[#allocation19 + $0x30] sm:$0xf] }
 0x26e   : > { %v2306_v7 = vor.u32 %v2556_v61, %v2305_v60  ;;  %v2551_v60 = vld [vmem:[#allocation19 + $0x10] sm:$0xf0] }
 0x271   : > { %v2867_v53 = vpop.eup %2866 }
 0x272   : > { %v948_v54 = vmul.f32 %v2867_v53, %v946_v48  ;;  %vm953_vm1 = vweird.f32 %v2867_v53  ;;  %v2317_v48 = vld [vmem:[#allocation19 + $0x48] sm:$0xf] }
 0x273   : > { %vm954_vm3 = vmor %vm952_vm2, %vm953_vm1 }
 0x274   : > { %v949_v57 = vsub.f32 1.0, %v948_v54  ;;  %v2425_v54 = vld [vmem:[#allocation21 + $0x60] sm:$0xf] }
 0x275   : > { %v2426_v62 = vor.u32 %v2586_v55, %v2425_v54  ;;  %v2377_v54 = vld [vmem:[#allocation21] sm:$0xf]  ;;  %v2574_v55 = vld [vmem:[#allocation21 + $0x8] sm:$0xf0] }
 0x276   : > { %v950_v59 = vmul.f32 %v2867_v53, %v949_v57  ;;  %v2337_v57 = vld [vmem:[#allocation19 + $0x68] sm:$0xf] }
 0x277   : > { %1578 = vmatpush.bf16.msra.mxu0 %v2426_v62 }
 0x278   : > { %v951_v63 = vadd.f32 %v2867_v53, %v950_v59  ;;  %v2318_v59 = vor.u32 %v2559_v49, %v2317_v48  ;;  %v2554_v48 = vld [vmem:[#allocation19 + $0x28] sm:$0xf0]  ;;  %v2470_v49 = vor.u32 %v2596_v46, %v2469_v44  ;;  %v1439_v44 = vld [vmem:[%s4219_s16] sm:$0x7] }
 0x279   : > { %v2302_v50 = vor.u32 %v2554_v48, %v2301_v47 }
 0x27a   : > { %v955_v1 = vsel %vm954_vm3, %v2867_v53, %v951_v63  ;;  %v2558_v53 = vld [vmem:[#allocation19 + $0x4c] sm:$0xf]  ;;  %1372 = vmatpush.bf16.msrb.mxu1 %v2318_v59  ;;  %v2289_v59 = vld [vmem:[#allocation19 + $0x8] sm:$0xf] }
 0x27b   : > { %v960_v3 = vsel %vm957_vm4, %v959_v0, %v955_v1  ;;  %v2322_v63 = vor.u32 %v2558_v53, %v2319_v56  ;;  %v2338_v0 = vor.u32 %v2563_v58, %v2337_v57  ;;  %v2555_v1 = vld [vmem:[#allocation19 + $0x34] sm:$0xf]  ;;  %v2457_v56 = vld [vmem:[#allocation21 + $0x98] sm:$0xf]  ;;  %v2378_v57 = vor.u32 %v2574_v55, %v2377_v54  ;;  %v2593_v58 = vld [vmem:[#allocation21 + $0xa0] sm:$0xf0] }
 0x27c   : > { %v961_v4 = vmul.f32 %v2865_v35, %v960_v3  ;;  %v2569_v35 = vld [vmem:[#allocation19 + $0xa0] sm:$0xf0]  ;;  %v2583_v3 = vld [vmem:[#allocation21 + $0x50] sm:$0xf0]  ;;  %v2458_v61 = vor.u32 %v2593_v58, %v2457_v56  ;;  %v2290_v62 = vor.u32 %v2551_v60, %v2289_v59  ;;  %v1570_v56 = vperm.slane %v1439_v44, 1 }
 0x27d   : > { %v2362_v40 = vor.u32 %v2569_v35, %v2361_v34  ;;  %v2414_v9 = vor.u32 %v2583_v3, %v2413_v2  ;;  %1385 = vmatpush.bf16.msrb.mxu2 %v2322_v63  ;;  %v2466_v34 = vor.u32 %v2594_v29, %v2463_v30  ;;  %v2591_v35 = vld [vmem:[#allocation21 + $0x94] sm:$0xf]  ;;  %v2585_v63 = vld [vmem:[#allocation21 + $0x64] sm:$0xf]  ;;  %v2445_v2 = vld [vmem:[#allocation21 + $0x80] sm:$0xf] }
 0x27e   : > { %962 = vst [vmem:[%s3905_s30] sm:$0x1] %v961_v4  ;;  %v963_v5 = vpack.c.bf16 %v961_v4, %v961_v4  ;;  %v2307_v4 = vld [vmem:[#allocation19 + $0x3c] sm:$0xf0]  ;;  %1373 = vmatpush.bf16.msrb.mxu1 %v2306_v7  ;;  %v2454_v38 = vor.u32 %v2591_v35, %v2451_v36  ;;  %v2590_v3 = vld [vmem:[#allocation21 + $0x88] sm:$0xf0] }
 0x27f   : > { %1395 = vmatpush.bf16.msrb.mxu3 %v2362_v40  ;;  %v2310_v12 = vor.u32 %v2555_v1, %v2307_v4  ;;  %1579 = vmatpush.bf16.msra.mxu0 %v2414_v9  ;;  %v2283_v40 = vld [vmem:[#allocation19 + $0xc] sm:$0xf0]  ;;  %v2446_v4 = vor.u32 %v2590_v3, %v2445_v2  ;;  %v2433_v9 = vld [vmem:[#allocation21 + $0x68] sm:$0xf]  ;;  %v2397_v29 = vld [vmem:[#allocation21 + $0x20] sm:$0xf] }
 0x280   : > { %1036 = vmatmul.bf16.vlgmr.msra.gmra.mxu2 %v963_v5  ;;  %v2325_v5 = vld [vmem:[#allocation19 + $0x50] sm:$0xf]  ;;  %v2286_v41 = vor.u32 %v2549_v39, %v2283_v40  ;;  %v2578_v30 = vld [vmem:[#allocation21 + $0x28] sm:$0xf0]  ;;  %v1196_v36 = vld [vmem:[#allocation18] sm:$0x1] }
 0x281   : > { %v2326_v13 = vor.u32 %v2560_v6, %v2325_v5  ;;  %1386 = vmatpush.bf16.msrb.mxu2 %v2310_v12  ;;  %v2582_v5 = vld [vmem:[#allocation21 + $0x4c] sm:$0xf]  ;;  %v2415_v6 = vld [vmem:[#allocation21 + $0x54] sm:$0xf0]  ;;  %v2434_v12 = vor.u32 %v2587_v10, %v2433_v9 }
 0x282   : > { %1374 = vmatpush.bf16.msrb.mxu1 %v2294_v23  ;;  %v2418_v7 = vor.u32 %v2582_v5, %v2415_v6  ;;  %v2394_v23 = vor.u32 %v2576_v18, %v2391_v21  ;;  %v3465_v6 = vmov -inf  }
 0x283   : > { %1396 = vmatpush.bf16.msrb.mxu3 %v2350_v52  ;;  %1580 = vmatpush.bf16.msra.mxu0 %v2402_v27  ;;  %v2439_v52 = vld [vmem:[#allocation21 + $0x84] sm:$0xf0]  ;;  %1664 = vst.msk [vmem:[#allocation3] sm:$0x1] %vm1663_vm5, %v3465_v6 }
 0x284   : > { %v2442_v53 = vor.u32 %v2588_v51, %v2439_v52 }
 0x285   : > { %1387 = vmatpush.bf16.msrb.mxu2 %v2298_v26  ;;  %v2379_v26 = vld [vmem:[#allocation21 + $0xc] sm:$0xf0] }
 0x286   : > { %1375 = vmatpush.bf16.msrb.mxu1 %v2282_v32  ;;  %v2385_v32 = vld [vmem:[#allocation21 + $0x8] sm:$0xf] }
 0x287   : > { %1397 = vmatpush.bf16.msrb.mxu3 %v2338_v0  ;;  %1581 = vmatpush.bf16.msra.mxu0 %v2390_v45  ;;  %v2427_v0 = vld [vmem:[#allocation21 + $0x6c] sm:$0xf0]  ;;  %v1569_v45 = vperm.slane %v1439_v44, 0 }
 0x288   : > { %v2430_v1 = vor.u32 %v2585_v63, %v2427_v0 }
 0x289   : > { %1388 = vmatpush.bf16.msrb.mxu2 %v2286_v41 }
 0x28a   : > { %1588 = vmatpush.bf16.msra.mxu1 %v2466_v34  ;;  %v2386_v34 = vor.u32 %v2575_v33, %v2385_v32 }
 0x28b   : > { %1398 = vmatpush.bf16.msrb.mxu3 %v2326_v13  ;;  %1582 = vmatpush.bf16.msra.mxu0 %v2378_v57  ;;  %v2403_v13 = vld [vmem:[#allocation21 + $0x3c] sm:$0xf0] }
 0x28c   : > { %v2406_v16 = vor.u32 %v2579_v11, %v2403_v13  ;;  %v1571_v11 = vperm.slane %v1439_v44, 2 }
 0x28d   : > { %1601 = vmatpush.bf16.msra.mxu2 %v2470_v49 }
 0x28e   : > { %1589 = vmatpush.bf16.msra.mxu1 %v2454_v38  ;;  %1583 = vmatmul.bf16.vlgmr.msra.gmra.mxu0 %v3913_v19 }
 0x28f   : > { %1399 = vmatpush.bf16.msrb.mxu3 %v2314_v31  ;;  %v2398_v31 = vor.u32 %v2578_v30, %v2397_v29 }
 0x291   : > { %1602 = vmatpush.bf16.msra.mxu2 %v2458_v61 }
 0x292   : > { %1590 = vmatpush.bf16.msra.mxu1 %v2442_v53 }
 0x293   : > { %1400 = vmatpush.bf16.msrb.mxu3 %v2302_v50 }
 0x295   : > { %1603 = vmatpush.bf16.msra.mxu2 %v2446_v4 }
 0x296   : > { %1591 = vmatpush.bf16.msra.mxu1 %v2430_v1 }
 0x297   : > { %1401 = vmatpush.bf16.msrb.mxu3 %v2290_v62 }
 0x299   : > { %1604 = vmatpush.bf16.msra.mxu2 %v2434_v12 }
 0x29a   : > { %1592 = vmatpush.bf16.msra.mxu1 %v2418_v7  ;;  %v3466_v7 = vmov 0.0  }
 0x29b   : > { %1665 = vst.msk [vmem:[#allocation4] sm:$0x1] %vm1663_vm5, %v3466_v7 }
 0x29d   : > { %1605 = vmatpush.bf16.msra.mxu2 %v2422_v22 }
 0x29e   : > { %1593 = vmatpush.bf16.msra.mxu1 %v2406_v16 }
 0x2a2   : > { %1594 = vmatpush.bf16.msra.mxu1 %v2394_v23 }
 0x303   : > { %v1037_v24 = vpop.f32.mrf.mxu2 }
 0x304   : > { %v1057_v28 = vpack.c.bf16 %v1037_v24, %v1037_v24  ;;  %v2409_v24 = vld [vmem:[#allocation21 + $0x38] sm:$0xf] }
 0x305   : > { %v2410_v27 = vor.u32 %v2581_v20, %v2409_v24 }
 0x306   : > { %1130 = vmatmul.bf16.vlgmr.msra.gmra.mxu3 %v1057_v28  ;;  %v2382_v28 = vor.u32 %v2573_v25, %v2379_v26 }
 0x307   : > { %1606 = vmatpush.bf16.msra.mxu2 %v2410_v27 }
 0x308   : > { %1595 = vmatpush.bf16.msra.mxu1 %v2382_v28 }
 0x30b   : > { %v1039_v37 = vpop.f32.mrf.mxu2  ;;  %1607 = vmatpush.bf16.msra.mxu2 %v2398_v31  ;;  %v1584_v42 = vpop.f32.mrf.mxu0 }
 0x30c   : > { %v1585_v47 = vadd.f32 %v1584_v42, %v1569_v45 }
 0x30f   : > { %1608 = vmatpush.bf16.msra.mxu2 %v2386_v34 }
 0x313   : > { %v1586_v43 = vpop.f32.mrf.mxu0 }
 0x389   : > { %v1131_v35 = vpop.f32.mrf.mxu3 }
 0x38a   : > { %v1193_v37 = vadd.f32 %v3923_v8, %v1131_v35  ;;  %v1232_v8 = vld [vmem:[%s4220_s24] sm:$0x7] }
 0x38b   : > { %v1362_v46 = vperm.slane %v1232_v8, 0  ;;  %v1363_v55 = vperm.slane %v1232_v8, 1  ;;  %v1364_v24 = vperm.slane %v1232_v8, 2 }
 0x38c   : > { %v1197_v38 = vadd.f32 %v1196_v36, %v1193_v37 }
 0x38e   : > { %v1198_v39 = vmax.f32 %v1197_v38, 0.0 }
 0x390   : > { %v1199_v40 = vpack.c.bf16 %v1198_v39, %v1198_v39 }
 0x391   : > { %v1133_v41 = vpop.f32.mrf.mxu3 }
 0x392   : > { %1376 = vmatmul.bf16.vlgmr.msrb.gmra.mxu1 %v1199_v40  ;;  %1389 = vmatmul.bf16.vlgmr.msrb.gmra.mxu2 %v1199_v40 }
 0x393   : > { %1402 = vmatmul.bf16.vlgmr.msrb.gmra.mxu3 %v1199_v40 }
 0x3a2   : > { %1596 = vmatmul.bf16.vlgmr.msra.gmra.mxu1 %v3913_v19  ;;  %1609 = vmatmul.bf16.vlgmr.msra.gmra.mxu2 %v3913_v19 }
 0x40f   : > { %v1377_v48 = vpop.f32.mrf.mxu1 }
 0x410   : > { %v1378_v49 = vadd.f32 %v1377_v48, %v1362_v46 }
 0x412   : > { %v1614_v50 = vadd.f32 %v1585_v47, %v1378_v49 }
 0x414   : > { %v2471_v51 = vmul.f32 -1.442695, %v1614_v50 }
 0x415   : > { %v1390_v52 = vpop.f32.mrf.mxu2 }
 0x416   : > { %2868 = vpow2.f32 %v2471_v51  ;;  %v1403_v19 = vpop.f32.mrf.mxu3  ;;  %v1391_v61 = vadd.f32 %v1390_v52, %v1363_v55 }
 0x417   : > { %v1379_v53 = vpop.f32.mrf.mxu1  ;;  %v1404_v26 = vadd.f32 %v1403_v19, %v1364_v24 }
 0x41c   : > { %v2869_v54 = vpop.eup %2868 }
 0x41d   : > { %v1618_v57 = vadd.f32 1.0, %v2869_v54  ;;  %v1392_v58 = vpop.f32.mrf.mxu2 }
 0x41e   : > { %v1405_v59 = vpop.f32.mrf.mxu3 }
 0x41f   : > { %2870 = vrcp.f32 %v1618_v57  ;;  %v1597_v60 = vpop.f32.mrf.mxu1  ;;  %v1630_v10 = vand.u32 2147483648, %v1618_v57  ;;  %v1628_v12 = vand.u32 2147483647, %v1618_v57  ;;  %vm1624_vm7 = vweird.f32 %v1618_v57 }
 0x420   : > { %v1598_v62 = vadd.f32 %v1597_v60, %v1570_v56 }
 0x421   : > { %v1631_v21 = vor.u32 1.1754944e-38, %v1630_v10  ;;  %vm1629_vm9 = vcmp.eq.f32.partialorder %v1628_v12, 8.507059e+37 }
 0x422   : > { %v1634_v63 = vadd.f32 %v1598_v62, %v1391_v61 }
 0x424   : > { %v2472_v0 = vmul.f32 -1.442695, %v1634_v63 }
 0x425   : > { %v2871_v1 = vpop.eup %2870  ;;  %v1610_v2 = vpop.f32.mrf.mxu2 }
 0x426   : > { %2872 = vpow2.f32 %v2472_v0  ;;  %v1620_v3 = vmul.f32 %v2871_v1, %v1618_v57  ;;  %vm1625_vm6 = vweird.f32 %v2871_v1  ;;  %v1611_v22 = vadd.f32 %v1610_v2, %v1571_v11 }
 0x427   : > { %v1599_v4 = vpop.f32.mrf.mxu1  ;;  %vm1626_vm8 = vmor %vm1624_vm7, %vm1625_vm6 }
 0x428   : > { %v1621_v5 = vsub.f32 1.0, %v1620_v3 }
 0x42a   : > { %v1622_v9 = vmul.f32 %v2871_v1, %v1621_v5 }
 0x42c   : > { %v2873_v13 = vpop.eup %2872  ;;  %v1623_v14 = vadd.f32 %v2871_v1, %v1622_v9 }
 0x42d   : > { %v1638_v15 = vadd.f32 1.0, %v2873_v13  ;;  %v1612_v16 = vpop.f32.mrf.mxu2 }
 0x42e   : > { %v1627_v18 = vsel %vm1626_vm8, %v2871_v1, %v1623_v14 }
 0x42f   : > { %2874 = vrcp.f32 %v1638_v15  ;;  %v1632_v23 = vsel %vm1629_vm9, %v1631_v21, %v1627_v18  ;;  %v1650_v30 = vand.u32 2147483648, %v1638_v15  ;;  %v1648_v32 = vand.u32 2147483647, %v1638_v15 }
 0x430   : > { %v1654_v20 = vmul.f32 %v1632_v23, %v1611_v22  ;;  %vm1644_vm11 = vweird.f32 %v1638_v15 }
 0x431   : > { %v1651_v34 = vor.u32 1.1754944e-38, %v1650_v30  ;;  %vm1649_vm13 = vcmp.eq.f32.partialorder %v1648_v32, 8.507059e+37 }
 0x432   : > { %v1655_v28 = vadd.f32 %v1654_v20, %v1404_v26 }
 0x434   : > { %2876 = vtanh.f32 %v1655_v28 }
 0x435   : > { %v2875_v25 = vpop.eup %2874 }
 0x436   : > { %v1640_v27 = vmul.f32 %v2875_v25, %v1638_v15  ;;  %vm1645_vm10 = vweird.f32 %v2875_v25 }
 0x437   : > { %vm1646_vm12 = vmor %vm1644_vm11, %vm1645_vm10 }
 0x438   : > { %v1641_v29 = vsub.f32 1.0, %v1640_v27 }
 0x43a   : > { %v1642_v31 = vmul.f32 %v2875_v25, %v1641_v29  ;;  %v2877_v38 = vpop.eup %2876 }
 0x43c   : > { %v1643_v33 = vadd.f32 %v2875_v25, %v1642_v31 }
 0x43e   : > { %v1647_v35 = vsel %vm1646_vm12, %v2875_v25, %v1643_v33 }
 0x43f   : > { %v1652_v36 = vsel %vm1649_vm13, %v1651_v34, %v1647_v35 }
 0x440   : > { %v1657_v37 = vsub.f32 1.0, %v1652_v36  ;;  %v1659_v40 = vmul.f32 %v1652_v36, %v3908_v17 }
 0x442   : > { %v1658_v39 = vmul.f32 %v2877_v38, %v1657_v37 }
 0x444   : > { %v1660_v41 = vadd.f32 %v1659_v40, %v1658_v39 }
 0x446   : > { %1661 = vst [vmem:[#allocation2] sm:$0x1] %v1660_v41 }
 0x447   : > { %1662 = vst [vmem:[%s3903_s19] sm:$0x1] %v1660_v41 }
 0x448 PF: > { %v2604_v42 = vld [vmem:[%s3873_s25 + $0x38] sm:$0xff]  ;;  %v2603_v43 = vld [vmem:[%s3873_s25 + $0x30] sm:$0xff]  ;;  %v2602_v44 = vld [vmem:[%s3873_s25 + $0x28] sm:$0xff]  ;;  %vm1748_vm14 = vcmask 1040384   ;;  %v3467_v54 = vmov 0   ;;  %vm1771_vm15 = vcmask 0  }
 0x449   : > { %1733 = vmatpush.bf16.msra.mxu0 %v2604_v42  ;;  %v2601_v17 = vld [vmem:[%s3873_s25 + $0x20] sm:$0xff]  ;;  %v2600_v8 = vld [vmem:[%s3873_s25 + $0x18] sm:$0xff]  ;;  %v2599_v45 = vld [vmem:[%s3873_s25 + $0x10] sm:$0xff]  ;;  %2878 = vset.pattern.permute.xlu0 %v3467_v54 }
 0x44a   : > { %v2598_v46 = vld [vmem:[%s3873_s25 + $0x8] sm:$0xff]  ;;  %v2597_v47 = vld [vmem:[%s3873_s25] sm:$0xff]  ;;  %v1684_v50 = vld [vmem:[%s762_s13] sm:$0x1]  ;;  %s4222_s25 = sld [smem:[#allocation47_spill]] }
 0x44b   : > { %v1747_v55 = vld [vmem:[#allocation3] sm:$0x1]  ;;  %v1753_v3 = vld [vmem:[#allocation4] sm:$0x1] }
 0x44d   : > { %1734 = vmatpush.bf16.msra.mxu0 %v2603_v43  ;;  %v1666_v48 = vld [vmem:[#allocation2] sm:$0x1] }
 0x44e   : > { %v1667_v49 = vpack.c.bf16 %v1666_v48, %v1666_v48 }
 0x450   : > { %p2505_p3 = scmp.ne.s32.totalorder %s4222_s25, 1 }
 0x451   : > { %1735 = vmatpush.bf16.msra.mxu0 %v2602_v44 }
 0x455   : > { %1736 = vmatpush.bf16.msra.mxu0 %v2601_v17 }
 0x459   : > { %1737 = vmatpush.bf16.msra.mxu0 %v2600_v8 }
 0x45d   : > { %1738 = vmatpush.bf16.msra.mxu0 %v2599_v45 }
 0x461   : > { %1739 = vmatpush.bf16.msra.mxu0 %v2598_v46 }
 0x465   : > { %1740 = vmatpush.bf16.msra.mxu0 %v2597_v47 }
 0x468   : > { %1741 = vmatmul.bf16.vlgmr.msra.gmra.mxu0 %v1667_v49 }
 0x4e5   : > { %v1742_v51 = vpop.f32.mrf.mxu0 }
 0x4e6   : > { %v1743_v52 = vadd.f32 %v1742_v51, %v1684_v50 }
 0x4e8   : > { %1746 = vst [vmem:[%s3901_s4] sm:$0x1] %v1743_v52  ;;  %v1749_v19 = vsel %vm1748_vm14, %v1743_v52, -inf }
 0x4e9   : > { %1750 = vmax.xlane.f32.xlu0 %v1749_v19 }
 0x4ed   : > { %v1744_v53 = vpop.f32.mrf.mxu0 }
 0x55c   : > { %v1751_v56 = vpop.xlane.xlu0 %1750 }
 0x55d   : > { %v1752_v57 = vmax.f32 %v1747_v55, %v1751_v56 }
 0x55f   : > { %v1754_v58 = vsub.f32 %v1747_v55, %v1752_v57  ;;  %1773 = vst.msk [vmem:[#allocation3] sm:$0x1] %vm1771_vm15, %v1752_v57  ;;  %1760 = vperm.xlu0 %2878, %v1752_v57  }
 0x561   : > { %v1755_v1 = vmul.f32 1.442695, %v1754_v58 }
 0x5d1   : > { %v1761_v59 = vpop.permute.xlu0 %1760 }
 0x5d2   : > { %v1763_v60 = vperm.slane %v1761_v59, 0 }
 0x5d4   : > { %v1764_v61 = vsub.f32 %v1743_v52, %v1763_v60 }
 0x5d6   : > { %v1765_v62 = vmul.f32 1.442695, %v1764_v61 }
 0x5d8   : > { %2879 = vpow2.f32 %v1765_v62 }
 0x5d9   : > { %2881 = vpow2.f32 %v1755_v1 }
 0x5de   : > { %v2880_v63 = vpop.eup %2879 }
 0x5df   : > { %v1767_v0 = vsel %vm1748_vm14, %v2880_v63, 0.0  ;;  %v2882_v2 = vpop.eup %2881 }
 0x5e0   : > { %1768 = vadd.xlane.f32.xlu1 %v1767_v0  ;;  %v1757_v4 = vmul.f32 %v2882_v2, %v1753_v3 }
 0x652   : > { %1777 = sbr.rel (%p2505_p3) target bundleno = 1642 (0x66a), region = 124 }
 0x653   : > { %v1769_v5 = vpop.xlane.xlu1 %1768 }
 0x654   : > { %v1770_v6 = vadd.f32 %v1769_v5, %v1757_v4 }
 0x656   : > { %1772 = vst.msk [vmem:[#allocation4] sm:$0x1] %vm1771_vm15, %v1770_v6 }
 0x657   : > { %v1778_v10 = vld [vmem:[#allocation3] sm:$0x1] }
 0x65d   : > { %v1779_v7 = vld [vmem:[#allocation4] sm:$0x1] }
 0x65e   : > { %2883 = vlog2.f32 %v1779_v7 }
 0x664   : > { %v2884_v9 = vpop.eup %2883 }
 0x665   : > { %v1781_v11 = vmul.f32 0.6931472, %v2884_v9 }
 0x667   : > { %v1782_v12 = vadd.f32 %v1781_v11, %v1778_v10 }
 0x669   : > { %1783 = vst.msk [vmem:[%s765_s10] sm:$0x1] %vm1771_vm15, %v1782_v12 }
 0x66a PF: > { %s4224_s27 = sld [smem:[#allocation48_spill]]  ;;  %s1788_s13 = sand.u32 1, %s3647_s14  }
 0x66b   : > { %s4225_s15 = sld [smem:[#allocation75_spill]]  ;;  %s1821_s26 = sshll.u32 %s3903_s19, 4  ;;  %s1822_s26 = int_to_ptr.vmem [resolvable:$true] %s1821_s26 }
 0x66c   : > { %s3968_s16 = scalar_lea.sflag [#allocation26], %s1788_s13 }
 0x671   : > { %s1819_s20 = scalar_lea.hbm %s4225_s15, %s4224_s27  ;;  %s3217_s14 = scalar_lea.hbm %s4225_s15, 6 }
 0x672   : > { %s1823_s2 = sshll.u32 %s1819_s20, 4  ;;  %s1824_s2 = int_to_ptr.hbm [resolvable:$true] %s1823_s2 }
 0x673   : > { %s3211_s23 = sshra.s32 %s1824_s2, 4  ;;  %s3212_s23 = int_to_ptr.hbm [resolvable:$true] %s3211_s23 }
 0x674   : > { %s3213_s5 = scalar_lea.hbm %s3212_s23, 1  ;;  %p3218_p10 = scmp.lt.s32.totalorder %s3212_s23, %s4225_s15 }
 0x675   : > { %p3214_p11 = scmp.ne.s32.totalorder %s3212_s23, %s3213_s5  ;;  %p3219_p8 = scmp.lt.s32.totalorder %s3217_s14, %s3213_s5 }
 0x677   : > { %p3215_p4 = pnand %p3214_p11, %p3795_p6  ;;  %p3220_p0 = por %p3219_p8, %p3218_p10 }
 0x679   : > { %p3216_p12 = pneg %p3215_p4 }
 0x67b   : > { %p3221_p2 = pnand %p3220_p0, %p3216_p12 }
 0x67d   : > { %3224 = shalt.err (!%p3221_p2)
}
 0x67e   : > { %s4226_s19 = sld [smem:[#allocation47_spill]]  ;;  %s2506_s29 = sshll.u32 %s4224_s27, 1 }
 0x67f   : > { %2644 = dma.vmem_to_hbm [thread:$0]  (%p3795_p6), %s1822_s26, 16, %s1824_s2, %s3968_s16  }
 0x680   : > { %s1808_s25 = sshll.u32 %s3901_s4, 4  ;;  %s4228_s13 = sld [smem:[#allocation74_spill]]  ;;  %s1809_s25 = int_to_ptr.vmem [resolvable:$true] %s1808_s25 }
 0x681   : > { %s4229_s23 = sld [smem:[#allocation76_spill]]  ;;  %s1834_s14 = sshll.u32 %s3905_s30, 4  ;;  %s3992_s14 = int_to_ptr.vmem [resolvable:$true] %s1834_s14 }
 0x682   : > { %s1785_s26 = scalar_lea.sflag [#allocation9], %s740_s21  ;;  %p4231_p9 = scmp.ne.s32.totalorder %s4187_s9, 0 }
 0x684   : > { %s1805_s17 = sadd.s32 %s4226_s19, %s2506_s29 }
 0x686   : > { %s1806_s12 = scalar_lea.hbm %s4228_s13, %s1805_s17  ;;  %s3245_s19 = scalar_lea.hbm %s4228_s13, 12 }
 0x687   : > { %s4230_s5 = smov %s4229_s23  ;;  %s1832_s10 = scalar_lea.hbm %s4229_s23, %s4224_s27 }
 0x688   : > { %s1810_s18 = sshll.u32 %s1806_s12, 4  ;;  %s1811_s18 = int_to_ptr.hbm [resolvable:$true] %s1810_s18 }
 0x689   : > { %s3239_s2 = sshra.s32 %s1811_s18, 4  ;;  %s3240_s2 = int_to_ptr.hbm [resolvable:$true] %s3239_s2 }
 0x68a   : > { %s3241_s4 = scalar_lea.hbm %s3240_s2, 1  ;;  %p3246_p3 = scmp.lt.s32.totalorder %s3240_s2, %s4228_s13 }
 0x68b   : > { %p3242_p7 = scmp.ne.s32.totalorder %s3240_s2, %s3241_s4  ;;  %p3247_p11 = scmp.lt.s32.totalorder %s3245_s19, %s3241_s4 }
 0x68d   : > { %p3243_p13 = pnand %p3242_p7, %p4231_p9  ;;  %p3248_p4 = por %p3247_p11, %p3246_p3 }
 0x68f   : > { %p3244_p1 = pneg %p3243_p13 }
 0x691   : > { %p3249_p12 = pnand %p3248_p4, %p3244_p1 }
 0x693   : > { %3252 = shalt.err (!%p3249_p12)
}
 0x694   : > { %2643 = dma.vmem_to_hbm [thread:$0]  (%p4231_p9), %s1809_s25, 16, %s1811_s18, %s1785_s26  }
 0x695   : > { %s1836_s21 = sshll.u32 %s1832_s10, 4  ;;  %s3273_s7 = scalar_lea.hbm %s4230_s5, 6  ;;  %s1837_s21 = int_to_ptr.hbm [resolvable:$true] %s1836_s21 }
 0x696   : > { %s3267_s30 = sshra.s32 %s1837_s21, 4  ;;  %s3268_s30 = int_to_ptr.hbm [resolvable:$true] %s3267_s30 }
 0x697   : > { %s3269_s8 = scalar_lea.hbm %s3268_s30, 1  ;;  %p3274_p2 = scmp.lt.s32.totalorder %s3268_s30, %s4230_s5 }
 0x698   : > { %p3270_p10 = scmp.ne.s32.totalorder %s3268_s30, %s3269_s8  ;;  %p3275_p7 = scmp.lt.s32.totalorder %s3273_s7, %s3269_s8 }
 0x69a   : > { %p3271_p8 = pnand %p3270_p10, %p3795_p6  ;;  %p3276_p13 = por %p3275_p7, %p3274_p2 }
 0x69c   : > { %p3272_p0 = pneg %p3271_p8 }
 0x69e   : > { %p3277_p9 = pnand %p3276_p13, %p3272_p0 }
 0x6a0   : > { %3280 = shalt.err (!%p3277_p9)
}
 0x6a1   : > { %2645 = dma.vmem_to_hbm [thread:$0]  (%p3795_p6), %s3992_s14, 16, %s1837_s21, %s3968_s16  }
 0x6a2 PF: > { %s4232_s9 = sld [smem:[#allocation51_spill]] }
 0x6a3   : > { %s4233_s25 = sld [smem:[#allocation42_spill]] }
 0x6a8   : > { %p2710_p1 = scmp.ge.s32.totalorder %s4232_s9, 2 }
 0x6a9   : > { %s1851_s23 = sand.u32 1, %s4233_s25  }
 0x6aa   : > { %p2684_p3 = pnand %p2710_p1, %p3786_p5  ;;  %s1852_s10 = scalar_lea.sflag [#allocation9], %s1851_s23 }
 0x6ac   : > { %p2685_p11 = pneg %p2684_p3 }
 0x6ae   : > { %3376 = dma.done.wait (%p2685_p11), %s1852_s10, 16  }
 0x6af   : > { %3378 = vsyncadd (%p2685_p11), %s1852_s10, 4294967280  ;;  %s4235_s18 = sadd.s32 4294967294, %s4232_s9   ;;  %s4236_s26 = sld [smem:[#allocation59_spill]] }
 0x6b0   : > { %s1860_s2 = sand.u32 1, %s4235_s18  }
 0x6b1   : > { %s1861_s0 = scalar_lea.sflag [#allocation26], %s1860_s2 }
 0x6b5   : > { %p4237_p4 = scmp.ne.s32.totalorder %s4236_s26, 0 }
 0x6b7   : > { %p2687_p12 = pnand %p2710_p1, %p4237_p4 }
 0x6b9   : > { %p2688_p10 = pneg %p2687_p12 }
 0x6bb   : > { %3380 = dma.done.wait (%p2688_p10), %s1861_s0, 32  }
 0x6bc   : > { %3382 = vsyncadd (%p2688_p10), %s1861_s0, 4294967264  ;;  %s52_s16 = sadd.s32 1, %s4232_s9   ;;  %s4239_s28 = sld [smem:[#allocation40_spill]] }
 0x6bd   : > { %p4027_p6 = scmp.ge.s32.totalorder %s52_s16, 14   ;;  %s4240_s29 = sld [smem:[#allocation41_spill]] }
 0x6be   : > { %s4241_s10 = sld [smem:[#allocation58_spill]]  ;;  %s4253_s19 = smov %s3413_s1 }
 0x6bf   : > { %s4242_s0 = sld [smem:[#allocation43_spill]]  ;;  %s4255_s21 = smov %s3425_s22 }
 0x6c0   : > { %s4243_s30 = sld [smem:[#allocation44_spill]] }
 0x6c1   : > { %s4244_s18 = sld [smem:[#allocation56_spill]] }
 0x6c2   : > { %s4245_s4 = sld [smem:[#allocation45_spill]] }
 0x6c3   : > { %s4246_s20 = sld [smem:[#allocation55_spill]] }
 0x6c4   : > { %s4247_s24 = sld [smem:[#allocation46_spill]] }
 0x6c5   : > { %s4248_s23 = sld [smem:[#allocation57_spill]] }
 0x6c6   : > { %s4249_s6 = sld [smem:[#allocation49_spill]] }
 0x6c7   : > { %s4250_s25 = sld [smem:[#allocation50_spill]] }
 0x6c8   : > { %s4251_s26 = sld [smem:[#allocation53_spill]]  ;;  %s4254_s1 = smov %s4245_s4 }
 0x6c9   : > { %s4252_s27 = sld [smem:[#allocation54_spill]]  ;;  %51 = sbr.rel (!%p4027_p6) target bundleno = 50 (0x32), region = 221 }
 0x6ca   : > { %s4256_s22 = smov %s4247_s24 }
 0x6cc   : > { %s4257_s24 = smov %s4249_s6 }
 0x6ce   :  { %1881 = vsyncpa [#allocation8], 1 }
 0x6cf   :  { %1883 = vsyncpa [#allocation8 + $0x1], 1 }
 0x6d0   :  { %1884 = vsyncpa [#allocation11], 1 }
 0x6d1   :  { %1885 = vsyncpa [#allocation14], 1 }
 0x6d2   :  { %1886 = vsyncpa [#allocation17], 1 }
 0x6d3   :  { %1887 = vsyncpa [#allocation20], 1 }
 0x6d4   :  { %1888 = vsyncpa [#allocation23], 1 }
 0x6d5   :  { %1890 = vsyncpa [#allocation23 + $0x1], 1 }
 0x6d6   :  { %1891 = vsyncpa [#allocation9], 1 }
 0x6d7   :  { %1893 = vsyncpa [#allocation9 + $0x1], 1 }
 0x6d8   :  { %1894 = vsyncpa [#allocation26], 1 }
 0x6d9   :  { %1896 = vsyncpa [#allocation26 + $0x1], 1 }

// kernel: tpu_custom_call.1
= control target key start
LH: loop header
LB: loop body
LE: loop exit
PB: predicated region body
PF: predicated region fallthrough
CT: control target
= control target key end

     0   :  { %s3451_s27 = smov [#allocation6]   ;;  %s4083_s0 = inlined_call_operand.hbm [shape: s32[6], index: 0, kind: input, shape index: {}]   ;;  %s4084_s1 = inlined_call_operand.hbm [shape: f32[256,1,128], index: 1, kind: input, shape index: {}]   ;;  %s4085_s2 = inlined_call_operand.hbm [shape: f32[1,128], index: 2, kind: input, shape index: {}]   ;;  %s4086_s3 = inlined_call_operand.hbm [shape: bf16[128,128], index: 3, kind: input, shape index: {}]   ;;  %s4087_s4 = inlined_call_operand.hbm [shape: bf16[256,128], index: 4, kind: input, shape index: {}]   ;;  %s4088_s5 = inlined_call_operand.hbm [shape: f32[1,128], index: 5, kind: input, shape index: {}]   ;;  %s4089_s6 = inlined_call_operand.hbm [shape: bf16[256,128], index: 6, kind: input, shape index: {}]   ;;  %s4090_s7 = inlined_call_operand.hbm [shape: f32[1,128], index: 7, kind: input, shape index: {}]   ;;  %s4091_s8 = inlined_call_operand.hbm [shape: bf16[128,384], index: 8, kind: input, shape index: {}]   ;;  %s4092_s9 = inlined_call_operand.hbm [shape: bf16[128,384], index: 9, kind: input, shape index: {}]   ;;  %s4093_s10 = inlined_call_operand.vmem [shape: f32[1,384], index: 10, kind: input, shape index: {}]   ;;  %s4094_s11 = inlined_call_operand.vmem [shape: f32[1,384], index: 11, kind: input, shape index: {}]   ;;  %s4095_s12 = inlined_call_operand.hbm [shape: bf16[128,256], index: 12, kind: input, shape index: {}]   ;;  %s4096_s13 = inlined_call_operand.vmem [shape: f32[1,256], index: 13, kind: input, shape index: {}]   ;;  %s4097_s14 = inlined_call_operand.hbm [shape: f32[6,1,256], index: 14, kind: output, shape index: {0}]   ;;  %s4098_s15 = inlined_call_operand.hbm [shape: f32[6,1,128], index: 15, kind: output, shape index: {1}]   ;;  %s4099_s16 = inlined_call_operand.hbm [shape: f32[6,1,128], index: 16, kind: output, shape index: {2}]   ;;  %s4100_s17 = inlined_call_operand.vmem [shape: f32[6,1,1], index: 17, kind: output, shape index: {3}]  }
   0x1   :  { %4129 = sst [smem:[#allocation60_spill]] %s4083_s0 }
   0x2   :  { %4130 = sst [smem:[#allocation61_spill]] %s4084_s1 }
   0x3   :  { %4131 = sst [smem:[#allocation62_spill]] %s4085_s2 }
   0x4   :  { %4132 = sst [smem:[#allocation63_spill]] %s4086_s3 }
   0x5   :  { %4133 = sst [smem:[#allocation64_spill]] %s4087_s4 }
   0x6   :  { %4134 = sst [smem:[#allocation65_spill]] %s4088_s5 }
   0x7   :  { %4135 = sst [smem:[#allocation66_spill]] %s4089_s6 }
   0x8   :  { %4136 = sst [smem:[#allocation67_spill]] %s4090_s7 }
   0x9   :  { %4137 = sst [smem:[#allocation68_spill]] %s4091_s8 }
   0xa   :  { %4138 = sst [smem:[#allocation69_spill]] %s4092_s9 }
   0xb   :  { %4139 = sst [smem:[#allocation70_spill]] %s4093_s10 }
   0xc   :  { %4140 = sst [smem:[#allocation71_spill]] %s4094_s11 }
   0xd   :  { %4141 = sst [smem:[#allocation72_spill]] %s4095_s12 }
   0xe   :  { %4142 = sst [smem:[#allocation73_spill]] %s4096_s13 }
   0xf   :  { %4143 = sst [smem:[#allocation74_spill]] %s4097_s14 }
  0x10   :  { %4144 = sst [smem:[#allocation75_spill]] %s4098_s15 }
  0x11   :  { %4145 = sst [smem:[#allocation76_spill]] %s4099_s16 }
  0x12   :  { %4146 = sst [smem:[#allocation77_spill]] %s4100_s17 }
  0x13   :  { %s4147_s26 = sld [smem:[#allocation60_spill]] }
  0x19   :  { %s24_s10 = sshll.u32 %s4147_s26, 4  ;;  %s25_s10 = int_to_ptr.hbm [resolvable:$true] %s24_s10 }
  0x1a   :  { %27 = dma.hbm_to_smem %s25_s10, 16, %s3451_s27, [#allocation5] }
  0x1b   :  { %3349 = dma.done.wait [#allocation5], 16 }
  0x1c   :  { %3350 = vsyncadd [#allocation5], 4294967280 }
  0x1d   :  { %30 = sfence }
  0x1e   :  { %31 = vsyncpa [#allocation8], 0 }
  0x1f   :  { %33 = vsyncpa [#allocation8 + $0x1], 0 }
  0x20   :  { %34 = vsyncpa [#allocation11], 0 }
  0x21   :  { %35 = vsyncpa [#allocation14], 0 }
  0x22   :  { %36 = vsyncpa [#allocation17], 0 }
  0x23   :  { %37 = vsyncpa [#allocation20], 0 }
  0x24   :  { %38 = vsyncpa [#allocation23], 0 }
  0x25   :  { %40 = vsyncpa [#allocation23 + $0x1], 0 }
  0x26   :  { %41 = vsyncpa [#allocation9], 0 }
  0x27   :  { %43 = vsyncpa [#allocation9 + $0x1], 0 }
  0x28   :  { %44 = vsyncpa [#allocation26], 0 }
  0x29   :  { %46 = vsyncpa [#allocation26 + $0x1], 0  ;;  %s3561_s28 = smov 0   ;;  %s3563_s29 = smov 0  }
  0x2a   :  { %s3565_s10 = smov 0   ;;  %s3567_s0 = smov 0  }
  0x2b   :  { %s3569_s30 = smov 0   ;;  %s3571_s18 = smov 0  }
  0x2c   :  { %s3573_s19 = smov 0   ;;  %s3575_s1 = smov 0  }
  0x2d   :  { %s3577_s20 = smov 0   ;;  %s3579_s21 = smov 0  }
  0x2e   :  { %s3581_s22 = smov 0   ;;  %s3583_s23 = smov 0  }
  0x2f   :  { %s3585_s24 = smov 0   ;;  %s3587_s25 = smov 0  }
  0x30   :  { %s3589_s26 = smov 0   ;;  %s3591_s27 = smov 0  }
  0x31   :  { %s3593_s16 = smov 0  }
  0x32 LB: > { %4148 = sst [smem:[#allocation39_spill]] %s3385_s28  ;;  %s3647_s14 = sadd.s32 4294967295, %s3449_s16   ;;  %s3449_s16 = sphi %s3593_s16, %s52_s16   ;;  %s3445_s27 = sphi %s3591_s27, %s4252_s27   ;;  %s3441_s26 = sphi %s3589_s26, %s4251_s26   ;;  %s3437_s25 = sphi %s3587_s25, %s4250_s25   ;;  %s3433_s24 = sphi %s3585_s24, %s4257_s24   ;;  %s3429_s23 = sphi %s3583_s23, %s4248_s23   ;;  %s3425_s22 = sphi %s3581_s22, %s4256_s22   ;;  %s3421_s21 = sphi %s3579_s21, %s4255_s21   ;;  %s3417_s20 = sphi %s3577_s20, %s4246_s20   ;;  %s3413_s1 = sphi %s3575_s1, %s4254_s1   ;;  %s3409_s19 = sphi %s3573_s19, %s4253_s19   ;;  %s3405_s18 = sphi %s3571_s18, %s4244_s18   ;;  %s3401_s30 = sphi %s3569_s30, %s4243_s30   ;;  %s3397_s0 = sphi %s3567_s0, %s4242_s0   ;;  %s3393_s10 = sphi %s3565_s10, %s4241_s10   ;;  %s3389_s29 = sphi %s3563_s29, %s4240_s29   ;;  %s3385_s28 = sphi %s3561_s28, %s4239_s28  }
  0x33   : > { %4149 = sst [smem:[#allocation40_spill]] %s3389_s29  ;;  %p2096_p0 = scmp.ge.s32.totalorder %s3449_s16, 1 }
  0x34   : > { %4150 = sst [smem:[#allocation41_spill]] %s3393_s10  ;;  %p4116_p1 = scmp.eq.s32.totalorder %s3647_s14, 0 }
  0x35   : > { %4151 = sst [smem:[#allocation42_spill]] %s3397_s0  ;;  %p465_p2 = scmp.lt.s32.totalorder %s3449_s16, 13 }
  0x36   : > { %4152 = sst [smem:[#allocation43_spill]] %s3401_s30  ;;  %s3453_s15 = smov [#allocation13]  }
  0x37   : > { %4153 = sst [smem:[#allocation44_spill]] %s3405_s18  ;;  %p3655_p3 = pnand %p2096_p0, %p465_p2 }
  0x38   : > { %4154 = sst [smem:[#allocation45_spill]] %s3417_s20  ;;  %s4114_s0 = smov 64  }
  0x39   : > { %4155 = sst [smem:[#allocation46_spill]] %s3429_s23  ;;  %p2649_p4 = pneg %p3655_p3 }
  0x3a   : > { %4156 = sst [smem:[#allocation47_spill]] %s3433_s24  ;;  %s4115_s30 = smov 4  }
  0x3b   : > { %4157 = sst [smem:[#allocation48_spill]] %s3437_s25  ;;  %s3452_s25 = smov [#allocation10]  }
  0x3c   : > { %4158 = sst [smem:[#allocation49_spill]] %s3441_s26  ;;  %s479_s24 = sshll.u32 %s3452_s25, 4  ;;  %s480_s24 = int_to_ptr.vmem [resolvable:$true] %s479_s24 }
  0x3d   : > { %4159 = sst [smem:[#allocation50_spill]] %s3445_s27  ;;  %p3663_p5 = pnand %p2649_p4, %p4116_p1 }
  0x3e   : > { %4160 = sst [smem:[#allocation51_spill]] %s3449_s16  ;;  %s3462_s28 = smov [#allocation18]  }
  0x3f   : > { %s4161_s2 = sld [smem:[#allocation62_spill]]  ;;  %p80_p7 = scmp.ne.s32.totalorder %s3429_s23, %s3425_s22 }
  0x40   : > { %s4162_s13 = scalar_select %p3655_p3, 1, 0 }
  0x41   : > { %s4165_s4 = sld [smem:[#allocation64_spill]]  ;;  %p81_p8 = scmp.eq.s32.totalorder %s3449_s16, 0 }
  0x42   : > { %4163 = sst [smem:[#allocation52_spill]] %s4162_s13  ;;  %s3457_s13 = smov [#allocation19]  }
  0x43   : > { %s4166_s6 = sld [smem:[#allocation66_spill]]  ;;  %s556_s25 = sshll.u32 %s3457_s13, 4  ;;  %s557_s25 = int_to_ptr.vmem [resolvable:$true] %s556_s25 }
  0x44   : > { %s4167_s8 = sld [smem:[#allocation68_spill]]  ;;  %s64_s13 = sadd.s32 1, %s3445_s27 }
  0x45   : > { %s477_s17 = sshll.u32 %s4161_s2, 4  ;;  %s504_s2 = sshll.u32 %s3453_s15, 4  ;;  %s478_s17 = int_to_ptr.hbm [resolvable:$true] %s477_s17  ;;  %s505_s2 = int_to_ptr.vmem [resolvable:$true] %s504_s2 }
  0x46   : > { %2652 = dma.hbm_to_vmem [thread:$0]  (!%p3663_p5), %s478_s17, 16, %s480_s24, [#allocation11]  }
  0x47   : > { %s502_s11 = sshll.u32 %s4165_s4, 4  ;;  %s3456_s24 = smov [#allocation16]   ;;  %s503_s11 = int_to_ptr.hbm [resolvable:$true] %s502_s11 }
  0x48   : > { %2658 = dma.hbm_to_vmem [thread:$0]  (!%p3663_p5), %s503_s11, 2048, %s505_s2, [#allocation14], %s4114_s0, %s4114_s0, %s4115_s30  }
  0x49   : > { %s528_s10 = sshll.u32 %s4166_s6, 4  ;;  %s530_s15 = sshll.u32 %s3456_s24, 4  ;;  %s529_s10 = int_to_ptr.hbm [resolvable:$true] %s528_s10  ;;  %s531_s15 = int_to_ptr.vmem [resolvable:$true] %s530_s15 }
  0x4a   : > { %s554_s17 = sshll.u32 %s4167_s8, 4  ;;  %s3458_s4 = smov 192   ;;  %s555_s17 = int_to_ptr.hbm [resolvable:$true] %s554_s17 }
  0x4b   : > { %2664 = dma.hbm_to_vmem [thread:$0]  (!%p3663_p5), %s529_s10, 2048, %s531_s15, [#allocation17], %s4114_s0, %s4114_s0, %s4115_s30  }
  0x4c   : > { %s3459_s2 = smov 12   ;;  %s4168_s3 = sld [smem:[#allocation63_spill]] }
  0x4d   : > { %2670 = dma.hbm_to_vmem [thread:$0]  (!%p3663_p5), %s555_s17, 3072, %s557_s25, [#allocation20], %s3458_s4, %s3458_s4, %s3459_s2  }
  0x4e   : > { %s3460_s24 = smov [#allocation12]   ;;  %s4169_s5 = sld [smem:[#allocation65_spill]] }
  0x4f   : > { %s490_s6 = sshll.u32 %s3460_s24, 4  ;;  %s3461_s17 = smov [#allocation15]   ;;  %s491_s6 = int_to_ptr.vmem [resolvable:$true] %s490_s6 }
  0x50   : > { %s519_s15 = sshll.u32 %s3461_s17, 4  ;;  %s4170_s7 = sld [smem:[#allocation67_spill]]  ;;  %s520_s15 = int_to_ptr.vmem [resolvable:$true] %s519_s15 }
  0x51   : > { %s4171_s9 = sld [smem:[#allocation69_spill]]  ;;  %s3463_s24 = smov [#allocation21]  }
  0x52   : > { %s488_s29 = sshll.u32 %s4168_s3, 4  ;;  %s68_s25 = sld [smem:[#allocation6 + %s3445_s27]]  ;;  %s489_s29 = int_to_ptr.hbm [resolvable:$true] %s488_s29 }
  0x53   : > { %2655 = dma.hbm_to_vmem [thread:$0]  (!%p3663_p5), %s489_s29, 1024, %s491_s6, [#allocation11], %s4114_s0, %s4114_s0, %s4115_s30  }
  0x54   : > { %s517_s10 = sshll.u32 %s4169_s5, 4  ;;  %s545_s29 = sshll.u32 %s3462_s28, 4  ;;  %s518_s10 = int_to_ptr.hbm [resolvable:$true] %s517_s10  ;;  %s546_s29 = int_to_ptr.vmem [resolvable:$true] %s545_s29 }
  0x55   : > { %2661 = dma.hbm_to_vmem [thread:$0]  (!%p3663_p5), %s518_s10, 16, %s520_s15, [#allocation14]  }
  0x56   : > { %s543_s11 = sshll.u32 %s4170_s7, 4  ;;  %s570_s10 = sshll.u32 %s3463_s24, 4  ;;  %s544_s11 = int_to_ptr.hbm [resolvable:$true] %s543_s11  ;;  %s571_s10 = int_to_ptr.vmem [resolvable:$true] %s570_s10 }
  0x57   : > { %s568_s6 = sshll.u32 %s4171_s9, 4  ;;  %s61_s15 = sadd.s32 1, %s3441_s26  ;;  %s569_s6 = int_to_ptr.hbm [resolvable:$true] %s568_s6 }
  0x58   : > { %2667 = dma.hbm_to_vmem [thread:$0]  (!%p3663_p5), %s544_s11, 16, %s546_s29, [#allocation17]  }
  0x59   : > { %2673 = dma.hbm_to_vmem [thread:$0]  (!%p3663_p5), %s569_s6, 3072, %s571_s10, [#allocation20], %s3458_s4, %s3458_s4, %s3459_s2  }
  0x5a   : > { %p62_p6 = scmp.ge.s32.totalorder %s61_s15, 2  ;;  %s73_s11 = sadd.s32 1, %s3429_s23 }
  0x5b   : > { %s4173_s12 = sld [smem:[#allocation44_spill]]  ;;  %p86_p10 = scmp.ne.s32.totalorder %s3425_s22, %s3421_s21 }
  0x5c   : > { %s4259_s15 = smov (%p62_p6, %s61_s15), 0  ;;  %s4261_s13 = smov (!%p62_p6, %s64_s13), %s3445_s27 }
  0x5d   : > { %4172 = sst [smem:[#allocation53_spill]] %s4259_s15  ;;  %p66_p9 = scmp.ge.s32.totalorder %s4261_s13, 6 }
  0x5e   : > { %s4174_s4 = sld [smem:[#allocation43_spill]]  ;;  %p3728_p11 = por %p81_p8, %p80_p7 }
  0x5f   : > { %s306_s8 = ssub.s32 %s3441_s26, %s4259_s15  ;;  %s4263_s13 = smov (%p66_p9, %s4261_s13), 0 }
  0x60   : > { %4176 = sst [smem:[#allocation54_spill]] %s4263_s13  ;;  %p3738_p12 = por %p4116_p1, %p86_p10 }
  0x61   : > { %p307_p13 = scmp.eq.s32.totalorder %s306_s8, 0  ;;  %s69_s21 = sld [smem:[#allocation6 + %s4263_s13]] }
  0x62   : > { %s309_s6 = sadd.s32 1, %s3417_s20  ;;  %s4179_s29 = sld [smem:[#allocation42_spill]] }
  0x63   : > { %s3745_s28 = scalar_select %p307_p13, %s3417_s20, %s309_s6  }
  0x64   : > { %p316_p0 = scmp.ne.s32.totalorder %s3417_s20, %s3413_s1  ;;  %p322_p2 = scmp.ne.s32.totalorder %s3413_s1, %s3409_s19 }
  0x65   : > { %4178 = sst [smem:[#allocation55_spill]] %s3745_s28  ;;  %s358_s24 = ssub.s32 %s3445_s27, %s4263_s13 }
  0x66   : > { %s4180_s10 = sld [smem:[#allocation41_spill]]  ;;  %s363_s0 = sadd.s32 1, %s4173_s12 }
  0x67   : > { %s4181_s30 = sld [smem:[#allocation40_spill]]  ;;  %p3756_p4 = por %p316_p0, %p81_p8 }
  0x68   : > { %p3762_p5 = por %p322_p2, %p4116_p1  ;;  %s4184_s6 = sld [smem:[#allocation39_spill]] }
  0x69   : > { %s360_s5 = sor.u32 %s358_s24, %s306_s8  ;;  %p373_p6 = scmp.ne.s32.totalorder %s4173_s12, %s4174_s4 }
  0x6a   : > { %s4183_s3 = scalar_select %p3762_p5, 1, 0 }
  0x6b   : > { %s70_s19 = ssub.s32 %s68_s25, %s69_s21  ;;  %p361_p7 = scmp.eq.s32.totalorder %s360_s5, 0 }
  0x6c   : > { %p71_p9 = scmp.eq.s32.totalorder %s70_s19, 0  ;;  %p374_p10 = scmp.eq.s32.totalorder %s3647_s14, 11 }
  0x6d   : > { %s4265_s12 = smov (!%p361_p7, %s4173_s12), %s363_s0  ;;  %p379_p13 = scmp.ne.s32.totalorder %s4174_s4, %s4179_s29 }
  0x6e   : > { %4185 = sst [smem:[#allocation56_spill]] %s4265_s12  ;;  %p3775_p8 = por %p374_p10, %p373_p6 }
  0x6f   : > { %s3773_s7 = scalar_select %p71_p9, %s3429_s23, %s73_s11  }
  0x70   : > { %s4187_s9 = scalar_select %p3775_p8, 1, 0 }
  0x71   : > { %4186 = sst [smem:[#allocation57_spill]] %s3773_s7  ;;  %s4188_s8 = sadd.s32 4294967294, %s3449_s16  }
  0x72   : > { %p380_p0 = scmp.eq.s32.totalorder %s4188_s8, 11  ;;  %p387_p2 = scmp.eq.s32.totalorder %s358_s24, 0 }
  0x73   : > { %s389_s5 = sadd.s32 1, %s4180_s10  ;;  %p399_p1 = scmp.ne.s32.totalorder %s4180_s10, %s4181_s30 }
  0x74   : > { %p3786_p5 = por %p380_p0, %p379_p13  ;;  %p405_p7 = scmp.ne.s32.totalorder %s4181_s30, %s4184_s6 }
  0x75   : > { %s4267_s10 = smov (!%p387_p2, %s4180_s10), %s389_s5  ;;  %p3795_p6 = por %p399_p1, %p374_p10 }
  0x76   : > { %s4189_s25 = scalar_select %p3786_p5, 1, 0 }
  0x77   : > { %4191 = sst [smem:[#allocation58_spill]] %s4267_s10  ;;  %p3799_p9 = por %p405_p7, %p380_p0 }
  0x78   : > { %4190 = sst [smem:[#allocation39_spill]] %s4189_s25  ;;  %p2701_p8 = scmp.lt.s32.totalorder %s3449_s16, 12 }
  0x79   : > { %s4193_s11 = scalar_select %p3799_p9, 1, 0 }
  0x7a   : > { %s590_s4 = sand.u32 1, %s3429_s23   ;;  %p3812_p13 = pnand %p2701_p8, %p3728_p11 }
  0x7b   : > { %4194 = sst [smem:[#allocation59_spill]] %s4193_s11  ;;  %s593_s30 = scalar_lea.vmem [#allocation7], %s590_s4 }
  0x7c   : > { %s2621_s21 = scalar_select %p3728_p11, [#allocation6], [#allocation28] }
  0x7d   : > { %s2622_s29 = scalar_select %p3728_p11, %s3445_s27, 0 }
  0x7e   : > { %s4269_s21 = smov (!%p2701_p8, %s2621_s21), [#allocation29]  ;;  %s601_s24 = sshll.u32 %s593_s30, 4  ;;  %s3816_s24 = int_to_ptr.vmem [resolvable:$true] %s601_s24 }
  0x7f   : > { %s4271_s29 = smov (!%p2701_p8, %s2622_s29), 0  ;;  %p3820_p1 = pnand %p2701_p8, %p3756_p4 }
  0x80   : > { %s594_s19 = sld [smem:[%s4269_s21 + %s4271_s29]]  ;;  %s608_s5 = sand.u32 1, %s3417_s20  }
  0x81   : > { %s2107_s13 = sshll.u32 %s3441_s26, 2  ;;  %s2106_s15 = sshll.u32 %s608_s5, 6 }
  0x82   : > { %s4197_s30 = sld [smem:[#allocation72_spill]]  ;;  %s612_s17 = scalar_lea.vmem [#allocation22], %s2106_s15 }
  0x83   : > { %s4198_s10 = sld [smem:[#allocation61_spill]]  ;;  %s619_s25 = sshll.u32 %s612_s17, 4  ;;  %s620_s25 = int_to_ptr.vmem [resolvable:$true] %s619_s25 }
  0x84   : > { %s591_s16 = scalar_lea.sflag [#allocation8], %s590_s4  ;;  %p3141_p4 = pneg %p3812_p13 }
  0x88   : > { %s616_s2 = scalar_lea.hbm %s4197_s30, %s2107_s13 }
  0x89   : > { %s617_s23 = sshll.u32 %s616_s2, 4  ;;  %s4199_s11 = smov %s4198_s10  ;;  %s618_s23 = int_to_ptr.hbm [resolvable:$true] %s617_s23 }
  0x8a   : > { %s597_s21 = scalar_lea.hbm %s4198_s10, %s594_s19  ;;  %s3144_s13 = scalar_lea.hbm %s4199_s11, 256 }
  0x8b   : > { %s599_s29 = sshll.u32 %s597_s21, 4  ;;  %s600_s29 = int_to_ptr.hbm [resolvable:$true] %s599_s29 }
  0x8c   : > { %s3137_s20 = sshra.s32 %s600_s29, 4  ;;  %s3138_s20 = int_to_ptr.hbm [resolvable:$true] %s3137_s20 }
  0x8d   : > { %s3139_s26 = scalar_lea.hbm %s3138_s20, 1  ;;  %p3145_p0 = scmp.lt.s32.totalorder %s3138_s20, %s4199_s11 }
  0x8e   : > { %p3140_p11 = scmp.ne.s32.totalorder %s3138_s20, %s3139_s26  ;;  %p3146_p2 = scmp.lt.s32.totalorder %s3144_s13, %s3139_s26 }
  0x90   : > { %p3142_p10 = pnand %p3141_p4, %p3140_p11  ;;  %p3147_p7 = por %p3146_p2, %p3145_p0 }
  0x92   : > { %p3143_p8 = pneg %p3142_p10 }
  0x94   : > { %p3148_p9 = pnand %p3147_p7, %p3143_p8 }
  0x96   : > { %3151 = shalt.err (!%p3148_p9)
}
  0x97   : > { %2679 = dma.hbm_to_vmem [thread:$0]  (!%p3812_p13), %s600_s29, 16, %s3816_s24, %s591_s16  }
  0x98   : > { %s609_s15 = scalar_lea.sflag [#allocation23], %s608_s5  ;;  %s3464_s10 = smov 128  }
  0x99   : > { %s4200_s4 = smov 4   ;;  %s4201_s19 = smov 64  }
  0x9a   : > { %2682 = dma.hbm_to_vmem [thread:$0]  (!%p3820_p1), %s618_s23, 1024, %s620_s25, %s609_s15, %s3464_s10, %s4201_s19, %s4200_s4  }
  0x9b   : > { %637 = sbr.rel (%p3655_p3) target bundleno = 1698 (0x6a2), region = 72  ;;  %s639_s20 = sand.u32 (!%p3655_p3), 1, %s3425_s22  }
  0x9c   : > { %s640_s26 = scalar_lea.sflag (!%p3655_p3), [#allocation8], %s639_s20  ;;  %s3850_s2 = scalar_lea.vmem (!%p3655_p3), [#allocation7], %s639_s20 }
  0xa0   : > { %3352 = dma.done.wait (%p3738_p12), %s640_s26, 16  }
  0xa1   : > { %3354 = vsyncadd (%p3738_p12), %s640_s26, 4294967280  ;;  %p4203_p9 = scmp.eq.s32.totalorder %s3647_s14, 0 }
  0xa3   : > { %3356 = dma.done.wait (%p4203_p9), [#allocation11], 1040   ;;  %p4204_p13 = pmov %p4203_p9 }
  0xa4   : > { %p4205_p1 = pmov %p4203_p9 }
  0xa5   : > { %3358 = vsyncadd (%p4204_p13), [#allocation11], 4294966256 }
  0xa6   : > { %3360 = dma.done.wait (%p4205_p1), [#allocation14], 2064   ;;  %p4206_p3 = pmov %p4205_p1 }
  0xa7   : > { %p4207_p11 = pmov %p4205_p1 }
  0xa8   : > { %3362 = vsyncadd (%p4206_p3), [#allocation14], 4294965232 }
  0xa9   : > { %3364 = dma.done.wait (%p4207_p11), [#allocation17], 2064   ;;  %p4208_p4 = pmov %p4205_p1 }
  0xaa   : > { %p4209_p12 = pmov %p4205_p1 }
  0xab   : > { %3366 = vsyncadd (%p4208_p4), [#allocation17], 4294965232 }
  0xac   : > { %3368 = dma.done.wait (%p4209_p12), [#allocation20], 6144   ;;  %p4210_p10 = pmov %p4205_p1 }
  0xad   : > { %s688_s16 = sand.u32 1, %s3413_s1   ;;  %p4211_p8 = scmp.ne.s32.totalorder %s4183_s3, 0 }
  0xae   : > { %3370 = vsyncadd (%p4210_p10), [#allocation20], 4294961152  ;;  %s2117_s23 = sshll.u32 %s688_s16, 6  ;;  %s689_s18 = scalar_lea.sflag [#allocation23], %s688_s16 }
  0xaf   : > { %s3873_s25 = scalar_lea.vmem [#allocation22], %s2117_s23 }
  0xb0   : > { %3372 = dma.done.wait (%p4211_p8), %s689_s18, 1024  }
  0xb1   : > { %3374 = vsyncadd (%p4211_p8), %s689_s18, 4294966272  ;;  %s4212_s24 = sld [smem:[#allocation43_spill]] }
  0xb2   : > { %s4213_s6 = sld [smem:[#allocation40_spill]] }
  0xb3   : > { %s4214_s8 = sld [smem:[#allocation47_spill]] }
  0xb4   : > { %s4215_s5 = sld [smem:[#allocation48_spill]] }
  0xb5   : > { %s4216_s27 = sld [smem:[#allocation73_spill]] }
  0xb6   : > { %s4217_s15 = sld [smem:[#allocation77_spill]] }
  0xb7   : > { %s740_s21 = sand.u32 1, %s4212_s24  }
  0xb8   : > { %s746_s29 = sand.u32 1, %s4213_s6   ;;  %s3901_s4 = scalar_lea.vmem [#allocation24], %s740_s21 }
  0xb9   : > { %p760_p0 = scmp.lt.s32.totalorder %s4214_s8, 1  ;;  %p767_p9 = scmp.eq.s32.totalorder %s4214_s8, 0 }
  0xba   : > { %p763_p2 = scmp.lt.s32.totalorder %s4215_s5, 5  ;;  %p766_p7 = scmp.eq.s32.totalorder %s4215_s5, 0 }
  0xbb   : > { %s3885_s17 = scalar_select %p760_p0, %s4214_s8, 1 }
  0xbc   : > { %s4273_s5 = smov (!%p763_p2, %s4215_s5), 5  ;;  %p768_p13 = pnand %p767_p9, %p766_p7 }
  0xbd   : > { %s762_s13 = scalar_lea.vmem %s4216_s27, %s3885_s17  ;;  %s765_s10 = scalar_lea.vmem %s4217_s15, %s4273_s5 }
  0xbe   : > { %s3903_s19 = scalar_lea.vmem [#allocation25], %s746_s29  ;;  %s3905_s30 = scalar_lea.vmem [#allocation27], %s746_s29 }
  0xbf   : > { %771 = sbr.rel (%p768_p13) target bundleno = 198 (0xc6), region = 116 }
  0xc4   : > { %v772_v0 = vld [vmem:[#allocation10] sm:$0x1] }
  0xc5   : > { %773 = vst [vmem:[#allocation2] sm:$0x1] %v772_v0 }
  0xc6 PF: > { %s4218_s20 = sld [smem:[#allocation47_spill]] }
  0xcc   : > { %p2118_p1 = scmp.ne.s32.totalorder %s4218_s20, 0 }
  0xcd   : > { %s4219_s16 = sld [smem:[#allocation71_spill]] (!%p2118_p1) }
  0xce   : > { %776 = sbr.rel (%p2118_p1) target bundleno = 1096 (0x448), region = 120  ;;  %s4220_s24 = sld [smem:[#allocation70_spill]] (!%p2118_p1) }
  0xd3   : > { %v2524_v1 = vld [vmem:[#allocation13 + $0x78] sm:$0xff]  ;;  %v2523_v3 = vld [vmem:[#allocation13 + $0x70] sm:$0xff]  ;;  %v2522_v5 = vld [vmem:[#allocation13 + $0x68] sm:$0xff]  ;;  %vm937_vm0 = vcmask 1040384   ;;  %vm1663_vm5 = vcmask 0  }
  0xd4   : > { %v2516_v2 = vld [vmem:[#allocation13 + $0x38] sm:$0xff]  ;;  %861 = vmatpush.bf16.msra.mxu0 %v2524_v1  ;;  %v2515_v4 = vld [vmem:[#allocation13 + $0x30] sm:$0xff]  ;;  %v2514_v6 = vld [vmem:[#allocation13 + $0x28] sm:$0xff] }
  0xd5   : > { %922 = vmatpush.bf16.msra.mxu1 %v2516_v2  ;;  %v2521_v7 = vld [vmem:[#allocation13 + $0x60] sm:$0xff]  ;;  %v2520_v9 = vld [vmem:[#allocation13 + $0x58] sm:$0xff]  ;;  %v2519_v11 = vld [vmem:[#allocation13 + $0x50] sm:$0xff] }
  0xd6   : > { %v2513_v8 = vld [vmem:[#allocation13 + $0x20] sm:$0xff]  ;;  %v2512_v10 = vld [vmem:[#allocation13 + $0x18] sm:$0xff]  ;;  %v2511_v12 = vld [vmem:[#allocation13 + $0x10] sm:$0xff] }
  0xd7   : > { %v2518_v13 = vld [vmem:[#allocation13 + $0x48] sm:$0xff]  ;;  %v2517_v15 = vld [vmem:[#allocation13 + $0x40] sm:$0xff]  ;;  %v3908_v17 = vld [vmem:[#allocation2] sm:$0x1] }
  0xd8   : > { %862 = vmatpush.bf16.msra.mxu0 %v2523_v3  ;;  %v2510_v14 = vld [vmem:[#allocation13 + $0x8] sm:$0xff]  ;;  %v2509_v16 = vld [vmem:[#allocation13] sm:$0xff]  ;;  %v777_v18 = vld [vmem:[%s3850_s2] sm:$0x1]  ;;  %v3913_v19 = vpack.c.bf16 %v3908_v17, %v3908_v17 }
  0xd9   : > { %923 = vmatpush.bf16.msra.mxu1 %v2515_v4  ;;  %v3915_v20 = vpack.c.bf16 %v777_v18, %v777_v18  ;;  %v935_v23 = vld [vmem:[#allocation15] sm:$0x1]  ;;  %v2532_v29 = vld [vmem:[#allocation12 + $0x38] sm:$0xff]  ;;  %v2531_v30 = vld [vmem:[#allocation12 + $0x30] sm:$0xff] }
  0xda   : > { %1028 = vmatpush.bf16.msra.mxu2 %v2532_v29  ;;  %v2530_v31 = vld [vmem:[#allocation12 + $0x28] sm:$0xff]  ;;  %v2529_v37 = vld [vmem:[#allocation12 + $0x20] sm:$0xff]  ;;  %v2528_v38 = vld [vmem:[#allocation12 + $0x18] sm:$0xff] }
  0xdb   : > { %v2527_v39 = vld [vmem:[#allocation12 + $0x10] sm:$0xff]  ;;  %v2526_v40 = vld [vmem:[#allocation12 + $0x8] sm:$0xff]  ;;  %v2525_v41 = vld [vmem:[#allocation12] sm:$0xff] }
  0xdc   : > { %863 = vmatpush.bf16.msra.mxu0 %v2522_v5  ;;  %v2540_v42 = vld [vmem:[#allocation16 + $0x38] sm:$0xff]  ;;  %v2539_v44 = vld [vmem:[#allocation16 + $0x30] sm:$0xff]  ;;  %v2538_v46 = vld [vmem:[#allocation16 + $0x28] sm:$0xff] }
  0xdd   : > { %924 = vmatpush.bf16.msra.mxu1 %v2514_v6  ;;  %v2548_v43 = vld [vmem:[#allocation16 + $0x78] sm:$0xff]  ;;  %v2547_v45 = vld [vmem:[#allocation16 + $0x70] sm:$0xff]  ;;  %v2546_v47 = vld [vmem:[#allocation16 + $0x68] sm:$0xff] }
  0xde   : > { %1029 = vmatpush.bf16.msra.mxu2 %v2531_v30  ;;  %1122 = vmatpush.bf16.msra.mxu3 %v2548_v43  ;;  %v2537_v49 = vld [vmem:[#allocation16 + $0x20] sm:$0xff]  ;;  %v2536_v51 = vld [vmem:[#allocation16 + $0x18] sm:$0xff]  ;;  %v2535_v55 = vld [vmem:[#allocation16 + $0x10] sm:$0xff] }
  0xdf   : > { %v2545_v50 = vld [vmem:[#allocation16 + $0x60] sm:$0xff]  ;;  %v2544_v52 = vld [vmem:[#allocation16 + $0x58] sm:$0xff]  ;;  %v2543_v56 = vld [vmem:[#allocation16 + $0x50] sm:$0xff] }
  0xe0   : > { %864 = vmatpush.bf16.msra.mxu0 %v2521_v7  ;;  %v2534_v61 = vld [vmem:[#allocation16 + $0x8] sm:$0xff]  ;;  %v2533_v2 = vld [vmem:[#allocation16] sm:$0xff]  ;;  %v2341_v18 = vld [vmem:[#allocation19 + $0x78] sm:$0xf] }
  0xe1   : > { %925 = vmatpush.bf16.msra.mxu1 %v2513_v8  ;;  %v2542_v62 = vld [vmem:[#allocation16 + $0x48] sm:$0xff]  ;;  %v2541_v6 = vld [vmem:[#allocation16 + $0x40] sm:$0xff]  ;;  %v2571_v8 = vld [vmem:[#allocation19 + $0xb0] sm:$0xf0] }
  0xe2   : > { %1030 = vmatpush.bf16.msra.mxu2 %v2530_v31  ;;  %1123 = vmatpush.bf16.msra.mxu3 %v2547_v45  ;;  %v2365_v7 = vld [vmem:[#allocation19 + $0xa8] sm:$0xf]  ;;  %v2449_v31 = vld [vmem:[#allocation21 + $0x90] sm:$0xf]  ;;  %v2437_v43 = vld [vmem:[#allocation21 + $0x78] sm:$0xf] }
  0xe3   : > { %v2343_v29 = vld [vmem:[#allocation19 + $0x84] sm:$0xf0]  ;;  %v2349_v45 = vld [vmem:[#allocation19 + $0x80] sm:$0xf] }
  0xe4   : > { %865 = vmatpush.bf16.msra.mxu0 %v2520_v9  ;;  %v2353_v9 = vld [vmem:[#allocation19 + $0x90] sm:$0xf] }
  0xe5   : > { %926 = vmatpush.bf16.msra.mxu1 %v2512_v10  ;;  %v2366_v10 = vor.u32 %v2571_v8, %v2365_v7 }
  0xe6   : > { %1031 = vmatpush.bf16.msra.mxu2 %v2529_v37  ;;  %1124 = vmatpush.bf16.msra.mxu3 %v2546_v47  ;;  %v2562_v37 = vld [vmem:[#allocation19 + $0x68] sm:$0xf0] }
  0xe8   : > { %866 = vmatpush.bf16.msra.mxu0 %v2519_v11  ;;  %v2568_v11 = vld [vmem:[#allocation19 + $0x98] sm:$0xf0] }
  0xe9   : > { %927 = vmatpush.bf16.msra.mxu1 %v2511_v12  ;;  %v2570_v12 = vld [vmem:[#allocation19 + $0xac] sm:$0xf] }
  0xea   : > { %1032 = vmatpush.bf16.msra.mxu2 %v2528_v38  ;;  %1125 = vmatpush.bf16.msra.mxu3 %v2545_v50 }
  0xec   : > { %867 = vmatpush.bf16.msra.mxu0 %v2518_v13  ;;  %v2367_v13 = vld [vmem:[#allocation19 + $0xb4] sm:$0xf0] }
  0xed   : > { %928 = vmatpush.bf16.msra.mxu1 %v2510_v14  ;;  %v2370_v14 = vor.u32 %v2570_v12, %v2367_v13 }
  0xee   : > { %1033 = vmatpush.bf16.msra.mxu2 %v2527_v39  ;;  %1126 = vmatpush.bf16.msra.mxu3 %v2544_v52 }
  0xf0   : > { %868 = vmatpush.bf16.msra.mxu0 %v2517_v15  ;;  %v2567_v15 = vld [vmem:[#allocation19 + $0x94] sm:$0xf] }
  0xf1   : > { %929 = vmatpush.bf16.msra.mxu1 %v2509_v16  ;;  %v2354_v16 = vor.u32 %v2568_v11, %v2353_v9  ;;  %v2553_v11 = vld [vmem:[#allocation19 + $0x20] sm:$0xf0] }
  0xf2   : > { %1034 = vmatpush.bf16.msra.mxu2 %v2526_v40  ;;  %1127 = vmatpush.bf16.msra.mxu3 %v2543_v56  ;;  %v2319_v56 = vld [vmem:[#allocation19 + $0x54] sm:$0xf0] }
  0xf3   : > { %869 = vmatmul.bf16.vlgmr.msra.gmra.mxu0 %v3913_v19 }
  0xf4   : > { %930 = vmatmul.bf16.vlgmr.msra.gmra.mxu1 %v3915_v20  ;;  %1183 = vmatpush.bf16.msrb.mxu0 %v2540_v42  ;;  %v2331_v42 = vld [vmem:[#allocation19 + $0x6c] sm:$0xf0] }
  0xf5   : > { %1368 = vmatpush.bf16.msrb.mxu1 %v2366_v10  ;;  %v2293_v10 = vld [vmem:[#allocation19 + $0x18] sm:$0xf] }
  0xf6   : > { %1035 = vmatpush.bf16.msra.mxu2 %v2525_v41  ;;  %1128 = vmatpush.bf16.msra.mxu3 %v2542_v62  ;;  %v2561_v41 = vld [vmem:[#allocation19 + $0x64] sm:$0xf] }
  0xf8   : > { %1184 = vmatpush.bf16.msrb.mxu0 %v2539_v44  ;;  %v2589_v44 = vld [vmem:[#allocation21 + $0x80] sm:$0xf0] }
  0xf9   : > { %1369 = vmatpush.bf16.msrb.mxu1 %v2354_v16  ;;  %v2438_v50 = vor.u32 %v2589_v44, %v2437_v43  ;;  %v2401_v16 = vld [vmem:[#allocation21 + $0x30] sm:$0xf]  ;;  %v2577_v43 = vld [vmem:[#allocation21 + $0x20] sm:$0xf0] }
  0xfa   : > { %1129 = vmatpush.bf16.msra.mxu3 %v2541_v6  ;;  %1381 = vmatpush.bf16.msrb.mxu2 %v2370_v14  ;;  %v2560_v6 = vld [vmem:[#allocation19 + $0x58] sm:$0xf0]  ;;  %v2469_v44 = vld [vmem:[#allocation21 + $0xb0] sm:$0xf] }
  0xfb   : > { %v2552_v14 = vld [vmem:[#allocation19 + $0x1c] sm:$0xf] }
  0xfc   : > { %1185 = vmatpush.bf16.msrb.mxu0 %v2538_v46  ;;  %v2566_v46 = vld [vmem:[#allocation19 + $0x88] sm:$0xf0] }
  0xfd   : > { %v2350_v52 = vor.u32 %v2566_v46, %v2349_v45  ;;  %v2596_v46 = vld [vmem:[#allocation21 + $0xb8] sm:$0xf0] }
 0x100   : > { %1186 = vmatpush.bf16.msrb.mxu0 %v2537_v49  ;;  %v2559_v49 = vld [vmem:[#allocation19 + $0x50] sm:$0xf0] }
 0x104   : > { %1187 = vmatpush.bf16.msrb.mxu0 %v2536_v51  ;;  %v2334_v51 = vor.u32 %v2561_v41, %v2331_v42  ;;  %v2389_v42 = vld [vmem:[#allocation21 + $0x18] sm:$0xf] }
 0x105   : > { %v2390_v45 = vor.u32 %v2577_v43, %v2389_v42 }
 0x108   : > { %1188 = vmatpush.bf16.msrb.mxu0 %v2535_v55  ;;  %v2586_v55 = vld [vmem:[#allocation21 + $0x68] sm:$0xf0] }
 0x10c   : > { %1189 = vmatpush.bf16.msrb.mxu0 %v2534_v61  ;;  %v2556_v61 = vld [vmem:[#allocation19 + $0x38] sm:$0xf0] }
 0x110   : > { %1190 = vmatpush.bf16.msrb.mxu0 %v2533_v2  ;;  %v2413_v2 = vld [vmem:[#allocation21 + $0x48] sm:$0xf] }
 0x113   : > { %1191 = vmatmul.bf16.vlgmr.msrb.gmra.mxu0 %v3915_v20  ;;  %v2595_v20 = vld [vmem:[#allocation21 + $0xb0] sm:$0xf0] }
 0x170   : > { %v870_v21 = vpop.f32.mrf.mxu0 }
 0x171   : > { %v931_v22 = vpop.f32.mrf.mxu1 }
 0x172   : > { %v932_v24 = vadd.f32 %v931_v22, %v870_v21  ;;  %v2565_v21 = vld [vmem:[#allocation19 + $0x80] sm:$0xf0]  ;;  %v2355_v22 = vld [vmem:[#allocation19 + $0x9c] sm:$0xf0] }
 0x174   : > { %v936_v25 = vadd.f32 %v935_v23, %v932_v24  ;;  %v2358_v23 = vor.u32 %v2567_v15, %v2355_v22  ;;  %v2461_v24 = vld [vmem:[#allocation21 + $0xa8] sm:$0xf]  ;;  %v2557_v22 = vld [vmem:[#allocation19 + $0x40] sm:$0xf0] }
 0x175   : > { %v2295_v15 = vld [vmem:[#allocation19 + $0x24] sm:$0xf0] }
 0x176   : > { %v938_v26 = vsel %vm937_vm0, %v936_v25, -inf  ;;  %1382 = vmatpush.bf16.msrb.mxu2 %v2358_v23  ;;  %v2294_v23 = vor.u32 %v2553_v11, %v2293_v10  ;;  %v2587_v10 = vld [vmem:[#allocation21 + $0x70] sm:$0xf0] }
 0x177   : > { %939 = vmax.xlane.f32.xlu0 %v938_v26  ;;  %v2462_v26 = vor.u32 %v2595_v20, %v2461_v24  ;;  %v2281_v20 = vld [vmem:[#allocation19] sm:$0xf]  ;;  %v2579_v11 = vld [vmem:[#allocation21 + $0x34] sm:$0xf] }
 0x178   : > { %v872_v27 = vpop.f32.mrf.mxu0 }
 0x179   : > { %v933_v28 = vpop.f32.mrf.mxu1  ;;  %v2572_v27 = vld [vmem:[#allocation19 + $0xb8] sm:$0xf0]  ;;  %1575 = vmatpush.bf16.msra.mxu0 %v2462_v26  ;;  %v2298_v26 = vor.u32 %v2552_v14, %v2295_v15  ;;  %v2421_v14 = vld [vmem:[#allocation21 + $0x50] sm:$0xf] }
 0x17a   : > { %v2564_v28 = vld [vmem:[#allocation19 + $0x7c] sm:$0xf] }
 0x17b   : > { %v2346_v38 = vor.u32 %v2564_v28, %v2343_v29  ;;  %v2594_v29 = vld [vmem:[#allocation21 + $0xac] sm:$0xf]  ;;  %v2584_v15 = vld [vmem:[#allocation21 + $0x58] sm:$0xf0] }
 0x17d   : > { %1383 = vmatpush.bf16.msrb.mxu2 %v2346_v38 }
 0x181   : > { %1384 = vmatpush.bf16.msrb.mxu2 %v2334_v51  ;;  %v2588_v51 = vld [vmem:[#allocation21 + $0x7c] sm:$0xf] }
 0x190   : > { %v3923_v8 = vpop.f32.mrf.mxu0 }
 0x1ea   : > { %v940_v32 = vpop.xlane.xlu0 %939 }
 0x1eb   : > { %v941_v33 = vsub.f32 %v936_v25, %v940_v32  ;;  %v2373_v25 = vld [vmem:[#allocation19 + $0xb0] sm:$0xf]  ;;  %v2342_v32 = vor.u32 %v2565_v21, %v2341_v18  ;;  %v2580_v18 = vld [vmem:[#allocation21 + $0x38] sm:$0xf0]  ;;  %v2313_v21 = vld [vmem:[#allocation19 + $0x38] sm:$0xf] }
 0x1ec   : > { %v2374_v30 = vor.u32 %v2572_v27, %v2373_v25  ;;  %v2550_v25 = vld [vmem:[#allocation19 + $0x8] sm:$0xf0]  ;;  %v2402_v27 = vor.u32 %v2580_v18, %v2401_v16  ;;  %v2576_v18 = vld [vmem:[#allocation21 + $0x1c] sm:$0xf] }
 0x1ed   : > { %v942_v34 = vmul.f32 1.442695, %v941_v33  ;;  %v2592_v33 = vld [vmem:[#allocation21 + $0x98] sm:$0xf0]  ;;  %1370 = vmatpush.bf16.msrb.mxu1 %v2342_v32  ;;  %v2282_v32 = vor.u32 %v2550_v25, %v2281_v20  ;;  %v2581_v20 = vld [vmem:[#allocation21 + $0x40] sm:$0xf0] }
 0x1ee   : > { %1394 = vmatpush.bf16.msrb.mxu3 %v2374_v30  ;;  %v2450_v39 = vor.u32 %v2592_v33, %v2449_v31  ;;  %v2463_v30 = vld [vmem:[#allocation21 + $0xb4] sm:$0xf0]  ;;  %v2314_v31 = vor.u32 %v2557_v22, %v2313_v21  ;;  %v1194_v33 = vpop.f32.mrf.mxu0  ;;  %v2391_v21 = vld [vmem:[#allocation21 + $0x24] sm:$0xf0]  ;;  %v2422_v22 = vor.u32 %v2584_v15, %v2421_v14  ;;  %v2573_v25 = vld [vmem:[#allocation21 + $0x4] sm:$0xf] }
 0x1ef   : > { %2864 = vpow2.f32 %v942_v34  ;;  %v2361_v34 = vld [vmem:[#allocation19 + $0x98] sm:$0xf]  ;;  %v2575_v33 = vld [vmem:[#allocation21 + $0x10] sm:$0xf0] }
 0x1f0   : > { %1576 = vmatpush.bf16.msra.mxu0 %v2450_v39  ;;  %v2549_v39 = vld [vmem:[#allocation19 + $0x4] sm:$0xf] }
 0x1f4   : > { %1577 = vmatpush.bf16.msra.mxu0 %v2438_v50 }
 0x1f5   : > { %v2865_v35 = vpop.eup %2864 }
 0x1f6   : > { %v944_v36 = vsel %vm937_vm0, %v2865_v35, 0.0 }
 0x1f7   : > { %945 = vadd.xlane.f32.xlu0 %v944_v36  ;;  %v2329_v36 = vld [vmem:[#allocation19 + $0x60] sm:$0xf] }
 0x1f8   : > { %v2330_v47 = vor.u32 %v2562_v37, %v2329_v36  ;;  %v2451_v36 = vld [vmem:[#allocation21 + $0x9c] sm:$0xf0] }
 0x1fa   : > { %1371 = vmatpush.bf16.msrb.mxu1 %v2330_v47  ;;  %v2301_v47 = vld [vmem:[#allocation19 + $0x20] sm:$0xf] }
 0x26a   : > { %v946_v48 = vpop.xlane.xlu0 %945 }
 0x26b   : > { %2866 = vrcp.f32 %v946_v48  ;;  %v958_v58 = vand.u32 2147483648, %v946_v48  ;;  %v956_v60 = vand.u32 2147483647, %v946_v48  ;;  %vm952_vm2 = vweird.f32 %v946_v48 }
 0x26d   : > { %v959_v0 = vor.u32 1.1754944e-38, %v958_v58  ;;  %vm957_vm4 = vcmp.eq.f32.partialorder %v956_v60, 8.507059e+37  ;;  %v2563_v58 = vld [vmem:[#allocation19 + $0x70] sm:$0xf0]  ;;  %v2305_v60 = vld [vmem:[#allocation19 + $0x30] sm:$0xf] }
 0x26e   : > { %v2306_v7 = vor.u32 %v2556_v61, %v2305_v60  ;;  %v2551_v60 = vld [vmem:[#allocation19 + $0x10] sm:$0xf0] }
 0x271   : > { %v2867_v53 = vpop.eup %2866 }
 0x272   : > { %v948_v54 = vmul.f32 %v2867_v53, %v946_v48  ;;  %vm953_vm1 = vweird.f32 %v2867_v53  ;;  %v2317_v48 = vld [vmem:[#allocation19 + $0x48] sm:$0xf] }
 0x273   : > { %vm954_vm3 = vmor %vm952_vm2, %vm953_vm1 }
 0x274   : > { %v949_v57 = vsub.f32 1.0, %v948_v54  ;;  %v2425_v54 = vld [vmem:[#allocation21 + $0x60] sm:$0xf] }
 0x275   : > { %v2426_v62 = vor.u32 %v2586_v55, %v2425_v54  ;;  %v2377_v54 = vld [vmem:[#allocation21] sm:$0xf]  ;;  %v2574_v55 = vld [vmem:[#allocation21 + $0x8] sm:$0xf0] }
 0x276   : > { %v950_v59 = vmul.f32 %v2867_v53, %v949_v57  ;;  %v2337_v57 = vld [vmem:[#allocation19 + $0x68] sm:$0xf] }
 0x277   : > { %1578 = vmatpush.bf16.msra.mxu0 %v2426_v62 }
 0x278   : > { %v951_v63 = vadd.f32 %v2867_v53, %v950_v59  ;;  %v2318_v59 = vor.u32 %v2559_v49, %v2317_v48  ;;  %v2554_v48 = vld [vmem:[#allocation19 + $0x28] sm:$0xf0]  ;;  %v2470_v49 = vor.u32 %v2596_v46, %v2469_v44  ;;  %v1439_v44 = vld [vmem:[%s4219_s16] sm:$0x7] }
 0x279   : > { %v2302_v50 = vor.u32 %v2554_v48, %v2301_v47 }
 0x27a   : > { %v955_v1 = vsel %vm954_vm3, %v2867_v53, %v951_v63  ;;  %v2558_v53 = vld [vmem:[#allocation19 + $0x4c] sm:$0xf]  ;;  %1372 = vmatpush.bf16.msrb.mxu1 %v2318_v59  ;;  %v2289_v59 = vld [vmem:[#allocation19 + $0x8] sm:$0xf] }
 0x27b   : > { %v960_v3 = vsel %vm957_vm4, %v959_v0, %v955_v1  ;;  %v2322_v63 = vor.u32 %v2558_v53, %v2319_v56  ;;  %v2338_v0 = vor.u32 %v2563_v58, %v2337_v57  ;;  %v2555_v1 = vld [vmem:[#allocation19 + $0x34] sm:$0xf]  ;;  %v2457_v56 = vld [vmem:[#allocation21 + $0x98] sm:$0xf]  ;;  %v2378_v57 = vor.u32 %v2574_v55, %v2377_v54  ;;  %v2593_v58 = vld [vmem:[#allocation21 + $0xa0] sm:$0xf0] }
 0x27c   : > { %v961_v4 = vmul.f32 %v2865_v35, %v960_v3  ;;  %v2569_v35 = vld [vmem:[#allocation19 + $0xa0] sm:$0xf0]  ;;  %v2583_v3 = vld [vmem:[#allocation21 + $0x50] sm:$0xf0]  ;;  %v2458_v61 = vor.u32 %v2593_v58, %v2457_v56  ;;  %v2290_v62 = vor.u32 %v2551_v60, %v2289_v59  ;;  %v1570_v56 = vperm.slane %v1439_v44, 1 }
 0x27d   : > { %v2362_v40 = vor.u32 %v2569_v35, %v2361_v34  ;;  %v2414_v9 = vor.u32 %v2583_v3, %v2413_v2  ;;  %1385 = vmatpush.bf16.msrb.mxu2 %v2322_v63  ;;  %v2466_v34 = vor.u32 %v2594_v29, %v2463_v30  ;;  %v2591_v35 = vld [vmem:[#allocation21 + $0x94] sm:$0xf]  ;;  %v2585_v63 = vld [vmem:[#allocation21 + $0x64] sm:$0xf]  ;;  %v2445_v2 = vld [vmem:[#allocation21 + $0x80] sm:$0xf] }
 0x27e   : > { %962 = vst [vmem:[%s3905_s30] sm:$0x1] %v961_v4  ;;  %v963_v5 = vpack.c.bf16 %v961_v4, %v961_v4  ;;  %v2307_v4 = vld [vmem:[#allocation19 + $0x3c] sm:$0xf0]  ;;  %1373 = vmatpush.bf16.msrb.mxu1 %v2306_v7  ;;  %v2454_v38 = vor.u32 %v2591_v35, %v2451_v36  ;;  %v2590_v3 = vld [vmem:[#allocation21 + $0x88] sm:$0xf0] }
 0x27f   : > { %1395 = vmatpush.bf16.msrb.mxu3 %v2362_v40  ;;  %v2310_v12 = vor.u32 %v2555_v1, %v2307_v4  ;;  %1579 = vmatpush.bf16.msra.mxu0 %v2414_v9  ;;  %v2283_v40 = vld [vmem:[#allocation19 + $0xc] sm:$0xf0]  ;;  %v2446_v4 = vor.u32 %v2590_v3, %v2445_v2  ;;  %v2433_v9 = vld [vmem:[#allocation21 + $0x68] sm:$0xf]  ;;  %v2397_v29 = vld [vmem:[#allocation21 + $0x20] sm:$0xf] }
 0x280   : > { %1036 = vmatmul.bf16.vlgmr.msra.gmra.mxu2 %v963_v5  ;;  %v2325_v5 = vld [vmem:[#allocation19 + $0x50] sm:$0xf]  ;;  %v2286_v41 = vor.u32 %v2549_v39, %v2283_v40  ;;  %v2578_v30 = vld [vmem:[#allocation21 + $0x28] sm:$0xf0]  ;;  %v1196_v36 = vld [vmem:[#allocation18] sm:$0x1] }
 0x281   : > { %v2326_v13 = vor.u32 %v2560_v6, %v2325_v5  ;;  %1386 = vmatpush.bf16.msrb.mxu2 %v2310_v12  ;;  %v2582_v5 = vld [vmem:[#allocation21 + $0x4c] sm:$0xf]  ;;  %v2415_v6 = vld [vmem:[#allocation21 + $0x54] sm:$0xf0]  ;;  %v2434_v12 = vor.u32 %v2587_v10, %v2433_v9 }
 0x282   : > { %1374 = vmatpush.bf16.msrb.mxu1 %v2294_v23  ;;  %v2418_v7 = vor.u32 %v2582_v5, %v2415_v6  ;;  %v2394_v23 = vor.u32 %v2576_v18, %v2391_v21  ;;  %v3465_v6 = vmov -inf  }
 0x283   : > { %1396 = vmatpush.bf16.msrb.mxu3 %v2350_v52  ;;  %1580 = vmatpush.bf16.msra.mxu0 %v2402_v27  ;;  %v2439_v52 = vld [vmem:[#allocation21 + $0x84] sm:$0xf0]  ;;  %1664 = vst.msk [vmem:[#allocation3] sm:$0x1] %vm1663_vm5, %v3465_v6 }
 0x284   : > { %v2442_v53 = vor.u32 %v2588_v51, %v2439_v52 }
 0x285   : > { %1387 = vmatpush.bf16.msrb.mxu2 %v2298_v26  ;;  %v2379_v26 = vld [vmem:[#allocation21 + $0xc] sm:$0xf0] }
 0x286   : > { %1375 = vmatpush.bf16.msrb.mxu1 %v2282_v32  ;;  %v2385_v32 = vld [vmem:[#allocation21 + $0x8] sm:$0xf] }
 0x287   : > { %1397 = vmatpush.bf16.msrb.mxu3 %v2338_v0  ;;  %1581 = vmatpush.bf16.msra.mxu0 %v2390_v45  ;;  %v2427_v0 = vld [vmem:[#allocation21 + $0x6c] sm:$0xf0]  ;;  %v1569_v45 = vperm.slane %v1439_v44, 0 }
 0x288   : > { %v2430_v1 = vor.u32 %v2585_v63, %v2427_v0 }
 0x289   : > { %1388 = vmatpush.bf16.msrb.mxu2 %v2286_v41 }
 0x28a   : > { %1588 = vmatpush.bf16.msra.mxu1 %v2466_v34  ;;  %v2386_v34 = vor.u32 %v2575_v33, %v2385_v32 }
 0x28b   : > { %1398 = vmatpush.bf16.msrb.mxu3 %v2326_v13  ;;  %1582 = vmatpush.bf16.msra.mxu0 %v2378_v57  ;;  %v2403_v13 = vld [vmem:[#allocation21 + $0x3c] sm:$0xf0] }
 0x28c   : > { %v2406_v16 = vor.u32 %v2579_v11, %v2403_v13  ;;  %v1571_v11 = vperm.slane %v1439_v44, 2 }
 0x28d   : > { %1601 = vmatpush.bf16.msra.mxu2 %v2470_v49 }
 0x28e   : > { %1589 = vmatpush.bf16.msra.mxu1 %v2454_v38  ;;  %1583 = vmatmul.bf16.vlgmr.msra.gmra.mxu0 %v3913_v19 }
 0x28f   : > { %1399 = vmatpush.bf16.msrb.mxu3 %v2314_v31  ;;  %v2398_v31 = vor.u32 %v2578_v30, %v2397_v29 }
 0x291   : > { %1602 = vmatpush.bf16.msra.mxu2 %v2458_v61 }
 0x292   : > { %1590 = vmatpush.bf16.msra.mxu1 %v2442_v53 }
 0x293   : > { %1400 = vmatpush.bf16.msrb.mxu3 %v2302_v50 }
 0x295   : > { %1603 = vmatpush.bf16.msra.mxu2 %v2446_v4 }
 0x296   : > { %1591 = vmatpush.bf16.msra.mxu1 %v2430_v1 }
 0x297   : > { %1401 = vmatpush.bf16.msrb.mxu3 %v2290_v62 }
 0x299   : > { %1604 = vmatpush.bf16.msra.mxu2 %v2434_v12 }
 0x29a   : > { %1592 = vmatpush.bf16.msra.mxu1 %v2418_v7  ;;  %v3466_v7 = vmov 0.0  }
 0x29b   : > { %1665 = vst.msk [vmem:[#allocation4] sm:$0x1] %vm1663_vm5, %v3466_v7 }
 0x29d   : > { %1605 = vmatpush.bf16.msra.mxu2 %v2422_v22 }
 0x29e   : > { %1593 = vmatpush.bf16.msra.mxu1 %v2406_v16 }
 0x2a2   : > { %1594 = vmatpush.bf16.msra.mxu1 %v2394_v23 }
 0x303   : > { %v1037_v24 = vpop.f32.mrf.mxu2 }
 0x304   : > { %v1057_v28 = vpack.c.bf16 %v1037_v24, %v1037_v24  ;;  %v2409_v24 = vld [vmem:[#allocation21 + $0x38] sm:$0xf] }
 0x305   : > { %v2410_v27 = vor.u32 %v2581_v20, %v2409_v24 }
 0x306   : > { %1130 = vmatmul.bf16.vlgmr.msra.gmra.mxu3 %v1057_v28  ;;  %v2382_v28 = vor.u32 %v2573_v25, %v2379_v26 }
 0x307   : > { %1606 = vmatpush.bf16.msra.mxu2 %v2410_v27 }
 0x308   : > { %1595 = vmatpush.bf16.msra.mxu1 %v2382_v28 }
 0x30b   : > { %v1039_v37 = vpop.f32.mrf.mxu2  ;;  %1607 = vmatpush.bf16.msra.mxu2 %v2398_v31  ;;  %v1584_v42 = vpop.f32.mrf.mxu0 }
 0x30c   : > { %v1585_v47 = vadd.f32 %v1584_v42, %v1569_v45 }
 0x30f   : > { %1608 = vmatpush.bf16.msra.mxu2 %v2386_v34 }
 0x313   : > { %v1586_v43 = vpop.f32.mrf.mxu0 }
 0x389   : > { %v1131_v35 = vpop.f32.mrf.mxu3 }
 0x38a   : > { %v1193_v37 = vadd.f32 %v3923_v8, %v1131_v35  ;;  %v1232_v8 = vld [vmem:[%s4220_s24] sm:$0x7] }
 0x38b   : > { %v1362_v46 = vperm.slane %v1232_v8, 0  ;;  %v1363_v55 = vperm.slane %v1232_v8, 1  ;;  %v1364_v24 = vperm.slane %v1232_v8, 2 }
 0x38c   : > { %v1197_v38 = vadd.f32 %v1196_v36, %v1193_v37 }
 0x38e   : > { %v1198_v39 = vmax.f32 %v1197_v38, 0.0 }
 0x390   : > { %v1199_v40 = vpack.c.bf16 %v1198_v39, %v1198_v39 }
 0x391   : > { %v1133_v41 = vpop.f32.mrf.mxu3 }
 0x392   : > { %1376 = vmatmul.bf16.vlgmr.msrb.gmra.mxu1 %v1199_v40  ;;  %1389 = vmatmul.bf16.vlgmr.msrb.gmra.mxu2 %v1199_v40 }
 0x393   : > { %1402 = vmatmul.bf16.vlgmr.msrb.gmra.mxu3 %v1199_v40 }
 0x3a2   : > { %1596 = vmatmul.bf16.vlgmr.msra.gmra.mxu1 %v3913_v19  ;;  %1609 = vmatmul.bf16.vlgmr.msra.gmra.mxu2 %v3913_v19 }
 0x40f   : > { %v1377_v48 = vpop.f32.mrf.mxu1 }
 0x410   : > { %v1378_v49 = vadd.f32 %v1377_v48, %v1362_v46 }
 0x412   : > { %v1614_v50 = vadd.f32 %v1585_v47, %v1378_v49 }
 0x414   : > { %v2471_v51 = vmul.f32 -1.442695, %v1614_v50 }
 0x415   : > { %v1390_v52 = vpop.f32.mrf.mxu2 }
 0x416   : > { %2868 = vpow2.f32 %v2471_v51  ;;  %v1403_v19 = vpop.f32.mrf.mxu3  ;;  %v1391_v61 = vadd.f32 %v1390_v52, %v1363_v55 }
 0x417   : > { %v1379_v53 = vpop.f32.mrf.mxu1  ;;  %v1404_v26 = vadd.f32 %v1403_v19, %v1364_v24 }
 0x41c   : > { %v2869_v54 = vpop.eup %2868 }
 0x41d   : > { %v1618_v57 = vadd.f32 1.0, %v2869_v54  ;;  %v1392_v58 = vpop.f32.mrf.mxu2 }
 0x41e   : > { %v1405_v59 = vpop.f32.mrf.mxu3 }
 0x41f   : > { %2870 = vrcp.f32 %v1618_v57  ;;  %v1597_v60 = vpop.f32.mrf.mxu1  ;;  %v1630_v10 = vand.u32 2147483648, %v1618_v57  ;;  %v1628_v12 = vand.u32 2147483647, %v1618_v57  ;;  %vm1624_vm7 = vweird.f32 %v1618_v57 }
 0x420   : > { %v1598_v62 = vadd.f32 %v1597_v60, %v1570_v56 }
 0x421   : > { %v1631_v21 = vor.u32 1.1754944e-38, %v1630_v10  ;;  %vm1629_vm9 = vcmp.eq.f32.partialorder %v1628_v12, 8.507059e+37 }
 0x422   : > { %v1634_v63 = vadd.f32 %v1598_v62, %v1391_v61 }
 0x424   : > { %v2472_v0 = vmul.f32 -1.442695, %v1634_v63 }
 0x425   : > { %v2871_v1 = vpop.eup %2870  ;;  %v1610_v2 = vpop.f32.mrf.mxu2 }
 0x426   : > { %2872 = vpow2.f32 %v2472_v0  ;;  %v1620_v3 = vmul.f32 %v2871_v1, %v1618_v57  ;;  %vm1625_vm6 = vweird.f32 %v2871_v1  ;;  %v1611_v22 = vadd.f32 %v1610_v2, %v1571_v11 }
 0x427   : > { %v1599_v4 = vpop.f32.mrf.mxu1  ;;  %vm1626_vm8 = vmor %vm1624_vm7, %vm1625_vm6 }
 0x428   : > { %v1621_v5 = vsub.f32 1.0, %v1620_v3 }
 0x42a   : > { %v1622_v9 = vmul.f32 %v2871_v1, %v1621_v5 }
 0x42c   : > { %v2873_v13 = vpop.eup %2872  ;;  %v1623_v14 = vadd.f32 %v2871_v1, %v1622_v9 }
 0x42d   : > { %v1638_v15 = vadd.f32 1.0, %v2873_v13  ;;  %v1612_v16 = vpop.f32.mrf.mxu2 }
 0x42e   : > { %v1627_v18 = vsel %vm1626_vm8, %v2871_v1, %v1623_v14 }
 0x42f   : > { %2874 = vrcp.f32 %v1638_v15  ;;  %v1632_v23 = vsel %vm1629_vm9, %v1631_v21, %v1627_v18  ;;  %v1650_v30 = vand.u32 2147483648, %v1638_v15  ;;  %v1648_v32 = vand.u32 2147483647, %v1638_v15 }
 0x430   : > { %v1654_v20 = vmul.f32 %v1632_v23, %v1611_v22  ;;  %vm1644_vm11 = vweird.f32 %v1638_v15 }
 0x431   : > { %v1651_v34 = vor.u32 1.1754944e-38, %v1650_v30  ;;  %vm1649_vm13 = vcmp.eq.f32.partialorder %v1648_v32, 8.507059e+37 }
 0x432   : > { %v1655_v28 = vadd.f32 %v1654_v20, %v1404_v26 }
 0x434   : > { %2876 = vtanh.f32 %v1655_v28 }
 0x435   : > { %v2875_v25 = vpop.eup %2874 }
 0x436   : > { %v1640_v27 = vmul.f32 %v2875_v25, %v1638_v15  ;;  %vm1645_vm10 = vweird.f32 %v2875_v25 }
 0x437   : > { %vm1646_vm12 = vmor %vm1644_vm11, %vm1645_vm10 }
 0x438   : > { %v1641_v29 = vsub.f32 1.0, %v1640_v27 }
 0x43a   : > { %v1642_v31 = vmul.f32 %v2875_v25, %v1641_v29  ;;  %v2877_v38 = vpop.eup %2876 }
 0x43c   : > { %v1643_v33 = vadd.f32 %v2875_v25, %v1642_v31 }
 0x43e   : > { %v1647_v35 = vsel %vm1646_vm12, %v2875_v25, %v1643_v33 }
 0x43f   : > { %v1652_v36 = vsel %vm1649_vm13, %v1651_v34, %v1647_v35 }
 0x440   : > { %v1657_v37 = vsub.f32 1.0, %v1652_v36  ;;  %v1659_v40 = vmul.f32 %v1652_v36, %v3908_v17 }
 0x442   : > { %v1658_v39 = vmul.f32 %v2877_v38, %v1657_v37 }
 0x444   : > { %v1660_v41 = vadd.f32 %v1659_v40, %v1658_v39 }
 0x446   : > { %1661 = vst [vmem:[#allocation2] sm:$0x1] %v1660_v41 }
 0x447   : > { %1662 = vst [vmem:[%s3903_s19] sm:$0x1] %v1660_v41 }
 0x448 PF: > { %v2604_v42 = vld [vmem:[%s3873_s25 + $0x38] sm:$0xff]  ;;  %v2603_v43 = vld [vmem:[%s3873_s25 + $0x30] sm:$0xff]  ;;  %v2602_v44 = vld [vmem:[%s3873_s25 + $0x28] sm:$0xff]  ;;  %vm1748_vm14 = vcmask 1040384   ;;  %v3467_v54 = vmov 0   ;;  %vm1771_vm15 = vcmask 0  }
 0x449   : > { %1733 = vmatpush.bf16.msra.mxu0 %v2604_v42  ;;  %v2601_v17 = vld [vmem:[%s3873_s25 + $0x20] sm:$0xff]  ;;  %v2600_v8 = vld [vmem:[%s3873_s25 + $0x18] sm:$0xff]  ;;  %v2599_v45 = vld [vmem:[%s3873_s25 + $0x10] sm:$0xff]  ;;  %2878 = vset.pattern.permute.xlu0 %v3467_v54 }
 0x44a   : > { %v2598_v46 = vld [vmem:[%s3873_s25 + $0x8] sm:$0xff]  ;;  %v2597_v47 = vld [vmem:[%s3873_s25] sm:$0xff]  ;;  %v1684_v50 = vld [vmem:[%s762_s13] sm:$0x1]  ;;  %s4222_s25 = sld [smem:[#allocation47_spill]] }
 0x44b   : > { %v1747_v55 = vld [vmem:[#allocation3] sm:$0x1]  ;;  %v1753_v3 = vld [vmem:[#allocation4] sm:$0x1] }
 0x44d   : > { %1734 = vmatpush.bf16.msra.mxu0 %v2603_v43  ;;  %v1666_v48 = vld [vmem:[#allocation2] sm:$0x1] }
 0x44e   : > { %v1667_v49 = vpack.c.bf16 %v1666_v48, %v1666_v48 }
 0x450   : > { %p2505_p3 = scmp.ne.s32.totalorder %s4222_s25, 1 }
 0x451   : > { %1735 = vmatpush.bf16.msra.mxu0 %v2602_v44 }
 0x455   : > { %1736 = vmatpush.bf16.msra.mxu0 %v2601_v17 }
 0x459   : > { %1737 = vmatpush.bf16.msra.mxu0 %v2600_v8 }
 0x45d   : > { %1738 = vmatpush.bf16.msra.mxu0 %v2599_v45 }
 0x461   : > { %1739 = vmatpush.bf16.msra.mxu0 %v2598_v46 }
 0x465   : > { %1740 = vmatpush.bf16.msra.mxu0 %v2597_v47 }
 0x468   : > { %1741 = vmatmul.bf16.vlgmr.msra.gmra.mxu0 %v1667_v49 }
 0x4e5   : > { %v1742_v51 = vpop.f32.mrf.mxu0 }
 0x4e6   : > { %v1743_v52 = vadd.f32 %v1742_v51, %v1684_v50 }
 0x4e8   : > { %1746 = vst [vmem:[%s3901_s4] sm:$0x1] %v1743_v52  ;;  %v1749_v19 = vsel %vm1748_vm14, %v1743_v52, -inf }
 0x4e9   : > { %1750 = vmax.xlane.f32.xlu0 %v1749_v19 }
 0x4ed   : > { %v1744_v53 = vpop.f32.mrf.mxu0 }
 0x55c   : > { %v1751_v56 = vpop.xlane.xlu0 %1750 }
 0x55d   : > { %v1752_v57 = vmax.f32 %v1747_v55, %v1751_v56 }
 0x55f   : > { %v1754_v58 = vsub.f32 %v1747_v55, %v1752_v57  ;;  %1773 = vst.msk [vmem:[#allocation3] sm:$0x1] %vm1771_vm15, %v1752_v57  ;;  %1760 = vperm.xlu0 %2878, %v1752_v57  }
 0x561   : > { %v1755_v1 = vmul.f32 1.442695, %v1754_v58 }
 0x5d1   : > { %v1761_v59 = vpop.permute.xlu0 %1760 }
 0x5d2   : > { %v1763_v60 = vperm.slane %v1761_v59, 0 }
 0x5d4   : > { %v1764_v61 = vsub.f32 %v1743_v52, %v1763_v60 }
 0x5d6   : > { %v1765_v62 = vmul.f32 1.442695, %v1764_v61 }
 0x5d8   : > { %2879 = vpow2.f32 %v1765_v62 }
 0x5d9   : > { %2881 = vpow2.f32 %v1755_v1 }
 0x5de   : > { %v2880_v63 = vpop.eup %2879 }
 0x5df   : > { %v1767_v0 = vsel %vm1748_vm14, %v2880_v63, 0.0  ;;  %v2882_v2 = vpop.eup %2881 }
 0x5e0   : > { %1768 = vadd.xlane.f32.xlu1 %v1767_v0  ;;  %v1757_v4 = vmul.f32 %v2882_v2, %v1753_v3 }
 0x652   : > { %1777 = sbr.rel (%p2505_p3) target bundleno = 1642 (0x66a), region = 124 }
 0x653   : > { %v1769_v5 = vpop.xlane.xlu1 %1768 }
 0x654   : > { %v1770_v6 = vadd.f32 %v1769_v5, %v1757_v4 }
 0x656   : > { %1772 = vst.msk [vmem:[#allocation4] sm:$0x1] %vm1771_vm15, %v1770_v6 }
 0x657   : > { %v1778_v10 = vld [vmem:[#allocation3] sm:$0x1] }
 0x65d   : > { %v1779_v7 = vld [vmem:[#allocation4] sm:$0x1] }
 0x65e   : > { %2883 = vlog2.f32 %v1779_v7 }
 0x664   : > { %v2884_v9 = vpop.eup %2883 }
 0x665   : > { %v1781_v11 = vmul.f32 0.6931472, %v2884_v9 }
 0x667   : > { %v1782_v12 = vadd.f32 %v1781_v11, %v1778_v10 }
 0x669   : > { %1783 = vst.msk [vmem:[%s765_s10] sm:$0x1] %vm1771_vm15, %v1782_v12 }
 0x66a PF: > { %s4224_s27 = sld [smem:[#allocation48_spill]]  ;;  %s1788_s13 = sand.u32 1, %s3647_s14  }
 0x66b   : > { %s4225_s15 = sld [smem:[#allocation75_spill]]  ;;  %s1821_s26 = sshll.u32 %s3903_s19, 4  ;;  %s1822_s26 = int_to_ptr.vmem [resolvable:$true] %s1821_s26 }
 0x66c   : > { %s3968_s16 = scalar_lea.sflag [#allocation26], %s1788_s13 }
 0x671   : > { %s1819_s20 = scalar_lea.hbm %s4225_s15, %s4224_s27  ;;  %s3217_s14 = scalar_lea.hbm %s4225_s15, 6 }
 0x672   : > { %s1823_s2 = sshll.u32 %s1819_s20, 4  ;;  %s1824_s2 = int_to_ptr.hbm [resolvable:$true] %s1823_s2 }
 0x673   : > { %s3211_s23 = sshra.s32 %s1824_s2, 4  ;;  %s3212_s23 = int_to_ptr.hbm [resolvable:$true] %s3211_s23 }
 0x674   : > { %s3213_s5 = scalar_lea.hbm %s3212_s23, 1  ;;  %p3218_p10 = scmp.lt.s32.totalorder %s3212_s23, %s4225_s15 }
 0x675   : > { %p3214_p11 = scmp.ne.s32.totalorder %s3212_s23, %s3213_s5  ;;  %p3219_p8 = scmp.lt.s32.totalorder %s3217_s14, %s3213_s5 }
 0x677   : > { %p3215_p4 = pnand %p3214_p11, %p3795_p6  ;;  %p3220_p0 = por %p3219_p8, %p3218_p10 }
 0x679   : > { %p3216_p12 = pneg %p3215_p4 }
 0x67b   : > { %p3221_p2 = pnand %p3220_p0, %p3216_p12 }
 0x67d   : > { %3224 = shalt.err (!%p3221_p2)
}
 0x67e   : > { %s4226_s19 = sld [smem:[#allocation47_spill]]  ;;  %s2506_s29 = sshll.u32 %s4224_s27, 1 }
 0x67f   : > { %2644 = dma.vmem_to_hbm [thread:$0]  (%p3795_p6), %s1822_s26, 16, %s1824_s2, %s3968_s16  }
 0x680   : > { %s1808_s25 = sshll.u32 %s3901_s4, 4  ;;  %s4228_s13 = sld [smem:[#allocation74_spill]]  ;;  %s1809_s25 = int_to_ptr.vmem [resolvable:$true] %s1808_s25 }
 0x681   : > { %s4229_s23 = sld [smem:[#allocation76_spill]]  ;;  %s1834_s14 = sshll.u32 %s3905_s30, 4  ;;  %s3992_s14 = int_to_ptr.vmem [resolvable:$true] %s1834_s14 }
 0x682   : > { %s1785_s26 = scalar_lea.sflag [#allocation9], %s740_s21  ;;  %p4231_p9 = scmp.ne.s32.totalorder %s4187_s9, 0 }
 0x684   : > { %s1805_s17 = sadd.s32 %s4226_s19, %s2506_s29 }
 0x686   : > { %s1806_s12 = scalar_lea.hbm %s4228_s13, %s1805_s17  ;;  %s3245_s19 = scalar_lea.hbm %s4228_s13, 12 }
 0x687   : > { %s4230_s5 = smov %s4229_s23  ;;  %s1832_s10 = scalar_lea.hbm %s4229_s23, %s4224_s27 }
 0x688   : > { %s1810_s18 = sshll.u32 %s1806_s12, 4  ;;  %s1811_s18 = int_to_ptr.hbm [resolvable:$true] %s1810_s18 }
 0x689   : > { %s3239_s2 = sshra.s32 %s1811_s18, 4  ;;  %s3240_s2 = int_to_ptr.hbm [resolvable:$true] %s3239_s2 }
 0x68a   : > { %s3241_s4 = scalar_lea.hbm %s3240_s2, 1  ;;  %p3246_p3 = scmp.lt.s32.totalorder %s3240_s2, %s4228_s13 }
 0x68b   : > { %p3242_p7 = scmp.ne.s32.totalorder %s3240_s2, %s3241_s4  ;;  %p3247_p11 = scmp.lt.s32.totalorder %s3245_s19, %s3241_s4 }
 0x68d   : > { %p3243_p13 = pnand %p3242_p7, %p4231_p9  ;;  %p3248_p4 = por %p3247_p11, %p3246_p3 }
 0x68f   : > { %p3244_p1 = pneg %p3243_p13 }
 0x691   : > { %p3249_p12 = pnand %p3248_p4, %p3244_p1 }
 0x693   : > { %3252 = shalt.err (!%p3249_p12)
}
 0x694   : > { %2643 = dma.vmem_to_hbm [thread:$0]  (%p4231_p9), %s1809_s25, 16, %s1811_s18, %s1785_s26  }
 0x695   : > { %s1836_s21 = sshll.u32 %s1832_s10, 4  ;;  %s3273_s7 = scalar_lea.hbm %s4230_s5, 6  ;;  %s1837_s21 = int_to_ptr.hbm [resolvable:$true] %s1836_s21 }
 0x696   : > { %s3267_s30 = sshra.s32 %s1837_s21, 4  ;;  %s3268_s30 = int_to_ptr.hbm [resolvable:$true] %s3267_s30 }
 0x697   : > { %s3269_s8 = scalar_lea.hbm %s3268_s30, 1  ;;  %p3274_p2 = scmp.lt.s32.totalorder %s3268_s30, %s4230_s5 }
 0x698   : > { %p3270_p10 = scmp.ne.s32.totalorder %s3268_s30, %s3269_s8  ;;  %p3275_p7 = scmp.lt.s32.totalorder %s3273_s7, %s3269_s8 }
 0x69a   : > { %p3271_p8 = pnand %p3270_p10, %p3795_p6  ;;  %p3276_p13 = por %p3275_p7, %p3274_p2 }
 0x69c   : > { %p3272_p0 = pneg %p3271_p8 }
 0x69e   : > { %p3277_p9 = pnand %p3276_p13, %p3272_p0 }
 0x6a0   : > { %3280 = shalt.err (!%p3277_p9)
}
 0x6a1   : > { %2645 = dma.vmem_to_hbm [thread:$0]  (%p3795_p6), %s3992_s14, 16, %s1837_s21, %s3968_s16  }
 0x6a2 PF: > { %s4232_s9 = sld [smem:[#allocation51_spill]] }
 0x6a3   : > { %s4233_s25 = sld [smem:[#allocation42_spill]] }
 0x6a8   : > { %p2710_p1 = scmp.ge.s32.totalorder %s4232_s9, 2 }
 0x6a9   : > { %s1851_s23 = sand.u32 1, %s4233_s25  }
 0x6aa   : > { %p2684_p3 = pnand %p2710_p1, %p3786_p5  ;;  %s1852_s10 = scalar_lea.sflag [#allocation9], %s1851_s23 }
 0x6ac   : > { %p2685_p11 = pneg %p2684_p3 }
 0x6ae   : > { %3376 = dma.done.wait (%p2685_p11), %s1852_s10, 16  }
 0x6af   : > { %3378 = vsyncadd (%p2685_p11), %s1852_s10, 4294967280  ;;  %s4235_s18 = sadd.s32 4294967294, %s4232_s9   ;;  %s4236_s26 = sld [smem:[#allocation59_spill]] }
 0x6b0   : > { %s1860_s2 = sand.u32 1, %s4235_s18  }
 0x6b1   : > { %s1861_s0 = scalar_lea.sflag [#allocation26], %s1860_s2 }
 0x6b5   : > { %p4237_p4 = scmp.ne.s32.totalorder %s4236_s26, 0 }
 0x6b7   : > { %p2687_p12 = pnand %p2710_p1, %p4237_p4 }
 0x6b9   : > { %p2688_p10 = pneg %p2687_p12 }
 0x6bb   : > { %3380 = dma.done.wait (%p2688_p10), %s1861_s0, 32  }
 0x6bc   : > { %3382 = vsyncadd (%p2688_p10), %s1861_s0, 4294967264  ;;  %s52_s16 = sadd.s32 1, %s4232_s9   ;;  %s4239_s28 = sld [smem:[#allocation40_spill]] }
 0x6bd   : > { %p4027_p6 = scmp.ge.s32.totalorder %s52_s16, 14   ;;  %s4240_s29 = sld [smem:[#allocation41_spill]] }
 0x6be   : > { %s4241_s10 = sld [smem:[#allocation58_spill]]  ;;  %s4253_s19 = smov %s3413_s1 }
 0x6bf   : > { %s4242_s0 = sld [smem:[#allocation43_spill]]  ;;  %s4255_s21 = smov %s3425_s22 }
 0x6c0   : > { %s4243_s30 = sld [smem:[#allocation44_spill]] }
 0x6c1   : > { %s4244_s18 = sld [smem:[#allocation56_spill]] }
 0x6c2   : > { %s4245_s4 = sld [smem:[#allocation45_spill]] }
 0x6c3   : > { %s4246_s20 = sld [smem:[#allocation55_spill]] }
 0x6c4   : > { %s4247_s24 = sld [smem:[#allocation46_spill]] }
 0x6c5   : > { %s4248_s23 = sld [smem:[#allocation57_spill]] }
 0x6c6   : > { %s4249_s6 = sld [smem:[#allocation49_spill]] }
 0x6c7   : > { %s4250_s25 = sld [smem:[#allocation50_spill]] }
 0x6c8   : > { %s4251_s26 = sld [smem:[#allocation53_spill]]  ;;  %s4254_s1 = smov %s4245_s4 }
 0x6c9   : > { %s4252_s27 = sld [smem:[#allocation54_spill]]  ;;  %51 = sbr.rel (!%p4027_p6) target bundleno = 50 (0x32), region = 221 }
 0x6ca   : > { %s4256_s22 = smov %s4247_s24 }
 0x6cc   : > { %s4257_s24 = smov %s4249_s6 }
 0x6ce   :  { %1881 = vsyncpa [#allocation8], 1 }
 0x6cf   :  { %1883 = vsyncpa [#allocation8 + $0x1], 1 }
 0x6d0   :  { %1884 = vsyncpa [#allocation11], 1 }
 0x6d1   :  { %1885 = vsyncpa [#allocation14], 1 }
 0x6d2   :  { %1886 = vsyncpa [#allocation17], 1 }
 0x6d3   :  { %1887 = vsyncpa [#allocation20], 1 }
 0x6d4   :  { %1888 = vsyncpa [#allocation23], 1 }
 0x6d5   :  { %1890 = vsyncpa [#allocation23 + $0x1], 1 }
 0x6d6   :  { %1891 = vsyncpa [#allocation9], 1 }
 0x6d7   :  { %1893 = vsyncpa [#allocation9 + $0x1], 1 }
 0x6d8   :  { %1894 = vsyncpa [#allocation26], 1 }
 0x6d9   :  { %1896 = vsyncpa [#allocation26 + $0x1], 1 }

</bundles_post_ra>
